<compile_context>
chip_gen: v7x
topology: tpu7x:2x2x1
jax: 0.10.0
libtpu: 0.0.40
codegen_flags: <defaults>
</compile_context>

<pallas_src>
import functools

import jax
import jax.numpy as jnp
from jax.experimental import pallas as pl
from jax.experimental.pallas import tpu as pltpu

# ----------------------------- config ---------------------------------------
IMG = 16                              # resize target (real: 224)
DEC_H0 = 1                            # decoder unflatten spatial (real: 7)
LATENT_DIMS = 256 * DEC_H0 * DEC_H0   # must match Unflatten(256, h0, w0)
ENC_FLAT = 128 * (IMG // 16) ** 2     # encoder flatten size (real: 128*14*14)
BACKBONE_OUT = 16                     # convnext head.fc.out_features stand-in
NUM_FEATURE = BACKBONE_OUT * 2
NUM_CLASSES = 2
BN_EPS = 1e-5
MATMUL_DTYPE = jnp.bfloat16           # MXU operand / activation dtype; acc is f32

ENC_CH = (16, 32, 64, 128)            # encoder / discriminator conv channels
DEC_CH = (64, 32, 16, 3)              # decoder conv-transpose channels


def _round_up(x, m):
    return ((x + m - 1) // m) * m


# ----------------------------- tiling heuristics ------------------------------
def _pad_k(k):
    """Pad the contraction dim so large tk values divide it cleanly."""
    kp = _round_up(k, 128)
    if kp > 32768:
        kp = _round_up(k, 2048)
    elif kp > 1024:
        kp = _round_up(k, 512)
    return kp


def _pad_n(n):
    """Pad N to 256 multiples where possible (full-width v6e/v7x MXU passes)."""
    if n <= 128:
        return _round_up(n, 128)
    if n <= 4096:
        return _round_up(n, 256)
    return _round_up(n, 1024)


def _pick_tn(np_):
    """N tile: full width when small, else the largest divisor <= 2048."""
    if np_ <= 2048:
        return np_
    for tn in (2048, 1024, 512, 256, 128):
        if np_ % tn == 0:
            return tn
    return np_


def _pick_tk(kp, tn):
    """Largest K tile whose bf16 weight block stays <= ~4 MiB (double-buffers
    comfortably even under v7x's 64 MiB VMEM)."""
    budget = 4 << 20
    for tk in (kp, 4096, 2048, 1024, 512, 256, 128):
        if tk <= kp and kp % tk == 0 and tk * tn * 2 <= budget:
            return tk
    return 128


def _pick_tm(m, tk, tn):
    """Adaptive M tile: whole M when small; otherwise as large as a ~24 MiB
    per-M-tile budget allows (cuts per-grid-step overhead for the real-scale
    conv matmuls where M is in the tens of thousands)."""
    mp = _round_up(m, 8)
    if mp <= 1024:
        return mp, mp
    budget = 24 << 20
    per_row = 2 * (tk * 2) + 2 * (tn * 4) + tn * 4   # A dbl-buf + out dbl-buf + acc
    tm = max(512, min(4096, (budget // per_row) // 512 * 512))
    tm = min(tm, _round_up(mp, 512))
    return _round_up(mp, tm), tm


def _vmem_limit(tm, tk, tn, extra_bytes=0):
    """Explicit scoped-VMEM limit computed from the actual block sizes."""
    need = (2 * tm * tk * 2        # A blocks (bf16, double-buffered)
            + 2 * tk * tn * 2      # weight blocks (bf16, double-buffered)
            + 2 * tm * tn * 4      # output blocks (double-buffered, worst-case f32)
            + tm * tn * 4          # f32 accumulator scratch
            + 4 * tn * 4           # scale / bias blocks
            + extra_bytes)
    return int(min(max(need + (8 << 20), 32 << 20), 48 << 20))


# ----------------------- Pallas kernel: fused matmul ------------------------
# grid = (M tiles [parallel], N tiles [parallel], K tiles [arbitrary]).
# f32 accumulation in VMEM scratch; bf16 (or requested dtype) output written
# only on the last K step with folded BN scale/bias + activation epilogue.
def _fused_matmul_kernel(a_ref, b_ref, s_ref, c_ref, o_ref, acc_ref, *, activation):
    k = pl.program_id(2)

    @pl.when(k == 0)
    def _():
        acc_ref[...] = jnp.zeros_like(acc_ref)

    acc_ref[...] += jnp.dot(a_ref[...], b_ref[...],
                            preferred_element_type=jnp.float32)

    @pl.when(k == pl.num_programs(2) - 1)
    def _():
        y = acc_ref[...] * s_ref[...] + c_ref[...]       # folded BN scale+bias
        if activation == "silu":
            y = y * pl.reciprocal(1.0 + jnp.exp(-y), approx=True)
        elif activation == "sigmoid":
            y = pl.reciprocal(1.0 + jnp.exp(-y), approx=True)
        o_ref[...] = y.astype(o_ref.dtype)


def fused_matmul(a, layer, n_out, activation="none",
                 out_dtype=MATMUL_DTYPE, rows=None):
    """act((a @ W) * scale + bias)[:rows, :n_out]; W/scale/bias pre-padded at init.

    `a` may already be padded to (mp, kp) in MATMUL_DTYPE (e.g. the im2col
    matrix); in that case no extra pad/astype pass is emitted."""
    w_p, s_p, c_p = layer["w"], layer["s"], layer["b"]
    kp, np_ = w_p.shape
    m, k = a.shape
    rows = m if rows is None else rows
    tn = _pick_tn(np_)
    tk = _pick_tk(kp, tn)
    mp, tm = _pick_tm(m, tk, tn)
    if (m, k) != (mp, kp) or a.dtype != w_p.dtype:
        a = jnp.pad(a.astype(w_p.dtype), ((0, mp - m), (0, kp - k)))

    out = pl.pallas_call(
        functools.partial(_fused_matmul_kernel, activation=activation),
        out_shape=jax.ShapeDtypeStruct((mp, np_), out_dtype),
        grid_spec=pltpu.PrefetchScalarGridSpec(
            num_scalar_prefetch=0,
            grid=(mp // tm, np_ // tn, kp // tk),
            in_specs=[
                pl.BlockSpec((tm, tk), lambda i, j, k: (i, k)),
                pl.BlockSpec((tk, tn), lambda i, j, k: (k, j)),
                pl.BlockSpec((1, tn), lambda i, j, k: (0, j)),
                pl.BlockSpec((1, tn), lambda i, j, k: (0, j)),
            ],
            out_specs=pl.BlockSpec((tm, tn), lambda i, j, k: (i, j)),
            scratch_shapes=[pltpu.VMEM((tm, tn), jnp.float32)],
        ),
        compiler_params=pltpu.CompilerParams(
            dimension_semantics=("parallel", "parallel", "arbitrary"),
            vmem_limit_bytes=_vmem_limit(tm, tk, tn)),
    )(a, w_p, s_p, c_p)
    return out[:rows, :n_out]


# ------------- Pallas kernel: mu-linear with fused reparameterization -------
def _mu_reparam_kernel(a_ref, b_ref, c_ref, e_ref, z_ref, acc_ref):
    k = pl.program_id(2)

    @pl.when(k == 0)
    def _():
        acc_ref[...] = jnp.zeros_like(acc_ref)

    acc_ref[...] += jnp.dot(a_ref[...], b_ref[...],
                            preferred_element_type=jnp.float32)

    @pl.when(k == pl.num_programs(2) - 1)
    def _():
        mu = acc_ref[...] + c_ref[...]
        # Matches the reference: std = exp(0.5 * mu(x)); z = eps * std + mu(x)
        z_ref[...] = (e_ref[...] * jnp.exp(0.5 * mu) + mu).astype(z_ref.dtype)


def mu_linear_reparam(a, layer, eps, n_out, out_dtype=MATMUL_DTYPE):
    w_p, c_p = layer["w"], layer["b"]
    kp, np_ = w_p.shape
    m, k = a.shape
    tn = _pick_tn(np_)
    tk = _pick_tk(kp, tn)
    mp, tm = _pick_tm(m, tk, tn)
    a_p = a
    if (m, k) != (mp, kp) or a.dtype != w_p.dtype:
        a_p = jnp.pad(a.astype(w_p.dtype), ((0, mp - m), (0, kp - k)))
    e_p = jnp.pad(eps.astype(jnp.float32),
                  ((0, mp - m), (0, np_ - eps.shape[1])))

    z = pl.pallas_call(
        _mu_reparam_kernel,
        out_shape=jax.ShapeDtypeStruct((mp, np_), out_dtype),
        grid_spec=pltpu.PrefetchScalarGridSpec(
            num_scalar_prefetch=0,
            grid=(mp // tm, np_ // tn, kp // tk),
            in_specs=[
                pl.BlockSpec((tm, tk), lambda i, j, k: (i, k)),
                pl.BlockSpec((tk, tn), lambda i, j, k: (k, j)),
                pl.BlockSpec((1, tn), lambda i, j, k: (0, j)),
                pl.BlockSpec((tm, tn), lambda i, j, k: (i, j)),
            ],
            out_specs=pl.BlockSpec((tm, tn), lambda i, j, k: (i, j)),
            scratch_shapes=[pltpu.VMEM((tm, tn), jnp.float32)],
        ),
        compiler_params=pltpu.CompilerParams(
            dimension_semantics=("parallel", "parallel", "arbitrary"),
            vmem_limit_bytes=_vmem_limit(tm, tk, tn,
                                         extra_bytes=2 * tm * tn * 4)),
    )(a_p, w_p, c_p, e_p)
    return z[:m, :n_out]


# --------------- Pallas kernel: fused 3-layer classification head -----------
def _mlp_head_kernel(x_ref, w1_ref, b1_ref, w2_ref, b2_ref, w3_ref, b3_ref, o_ref):
    def silu(v):
        return v * pl.reciprocal(1.0 + jnp.exp(-v), approx=True)

    h = jnp.dot(x_ref[...], w1_ref[...], preferred_element_type=jnp.float32) + b1_ref[...]
    h = silu(h)
    h = jnp.dot(h.astype(MATMUL_DTYPE), w2_ref[...],
                preferred_element_type=jnp.float32) + b2_ref[...]
    h = silu(h)
    o_ref[...] = jnp.dot(h.astype(MATMUL_DTYPE), w3_ref[...],
                         preferred_element_type=jnp.float32) + b3_ref[...]


def mlp_head(x, l1, l2, l3, n_out):
    m, f = x.shape
    mp = _round_up(m, 8)
    kp = l1["w"].shape[0]
    x_p = jnp.pad(x.astype(MATMUL_DTYPE), ((0, mp - m), (0, kp - f)))
    out = pl.pallas_call(
        _mlp_head_kernel,
        out_shape=jax.ShapeDtypeStruct((mp, l3["w"].shape[1]), jnp.float32),
    )(x_p, l1["w"], l1["b"], l2["w"], l2["b"], l3["w"], l3["b"])
    return out[:m, :n_out]


# ----------------------------- layer glue (NHWC) -----------------------------
def _im2col_nhwc(x, kh, kw, stride, pad, mp, kp):
    """im2col gather emitted directly in the matmul dtype with rows/K already
    padded to the plan (single HBM materialization; no second pad/astype pass)."""
    b, h, w, c = x.shape
    xp = jnp.pad(x, ((0, 0), (pad, pad), (pad, pad), (0, 0)))
    ho = (h + 2 * pad - kh) // stride + 1
    wo = (w + 2 * pad - kw) // stride + 1
    cols = [xp[:, i:i + stride * ho:stride, j:j + stride * wo:stride, :]
            for i in range(kh) for j in range(kw)]
    col = jnp.concatenate(cols, axis=-1)          # (B, Ho, Wo, kh*kw*C) lane-dense
    col = col.reshape(b * ho * wo, kh * kw * c)
    return jnp.pad(col, ((0, mp - b * ho * wo), (0, kp - kh * kw * c)))


def conv2d_fused(x, layer, c_out, kh, kw, stride, pad, activation="silu"):
    """Conv2d (+ folded eval-mode BN) + activation; NHWC in, NHWC out (bf16)."""
    b, h, w, cin = x.shape
    kp, np_ = layer["w"].shape
    ho = (h + 2 * pad - kh) // stride + 1
    wo = (w + 2 * pad - kw) // stride + 1
    m = b * ho * wo
    tn = _pick_tn(np_)
    tk = _pick_tk(kp, tn)
    mp, _ = _pick_tm(m, tk, tn)
    col = _im2col_nhwc(x.astype(MATMUL_DTYPE), kh, kw, stride, pad, mp, kp)
    y = fused_matmul(col, layer, c_out, activation, rows=m)
    return y.reshape(b, ho, wo, c_out)


def conv_transpose2x2_fused(x, layer, c_out, activation="silu"):
    """ConvTranspose2d(kernel=2, stride=2) + activation; NHWC in, NHWC out."""
    b, h, w, cin = x.shape
    a = x.reshape(b * h * w, cin)
    y = fused_matmul(a, layer, 4 * c_out, activation)        # (B*H*W, 4*Cout)
    y = y.reshape(b, h, w, 2, 2, c_out).transpose(0, 1, 3, 2, 4, 5)
    return y.reshape(b, 2 * h, 2 * w, c_out)


# ---------------------- parameter preparation (once, at init) ----------------
def _pack(wmat, scale, bias, k, n):
    kp, np_ = _pad_k(k), _pad_n(n)
    w_p = jnp.zeros((kp, np_), MATMUL_DTYPE).at[:k, :n].set(wmat.astype(MATMUL_DTYPE))
    s_p = jnp.zeros((1, np_), jnp.float32).at[0, :n].set(scale)
    b_p = jnp.zeros((1, np_), jnp.float32).at[0, :n].set(bias)
    return {"w": w_p, "s": s_p, "b": b_p}


def prep_conv(w, b, bn):
    cout, cin, kh, kw = w.shape
    k = cin * kh * kw
    wmat = w.transpose(2, 3, 1, 0).reshape(k, cout)   # (kh, kw, Cin) = im2col order
    if bn is not None:
        gamma, beta, mean, var = bn
        s = gamma / jnp.sqrt(var + BN_EPS)
        scale, bias = s, (b - mean) * s + beta
    else:
        scale, bias = jnp.ones((cout,), jnp.float32), b
    return _pack(wmat, scale, bias, k, cout)


def prep_convt(w, b):
    cin, cout, kh, kw = w.shape                        # kh = kw = 2
    n = kh * kw * cout
    wmat = w.transpose(0, 2, 3, 1).reshape(cin, n)     # column order (kh, kw, Cout)
    return _pack(wmat, jnp.ones((n,), jnp.float32), jnp.tile(b, kh * kw), cin, n)


def prep_linear(w, b, perm=None):
    out_f, in_f = w.shape
    wmat = w.T
    if perm is not None:
        wmat = wmat[perm]                              # reorder rows at pack time
    return _pack(wmat, jnp.ones((out_f,), jnp.float32), b, in_f, out_f)


def _nchw_to_nhwc_perm(c, h, w):
    """perm[j] = NCHW flat index of the feature at NHWC flatten position j."""
    return jnp.arange(c * h * w).reshape(c, h, w).transpose(1, 2, 0).reshape(-1)


def init_params(key):
    keys = iter(jax.random.split(key, 64))

    def nrm(shape, s):
        return s * jax.random.normal(next(keys), shape, jnp.float32)

    def conv(cout, cin, with_bn=True):
        bn = ((jnp.ones((cout,), jnp.float32), jnp.zeros((cout,), jnp.float32),
               jnp.zeros((cout,), jnp.float32), jnp.ones((cout,), jnp.float32))
              if with_bn else None)
        return prep_conv(nrm((cout, cin, 3, 3), 0.08), nrm((cout,), 0.01), bn)

    def convt(cin, cout):
        return prep_convt(nrm((cin, cout, 2, 2), 0.08), nrm((cout,), 0.01))

    def dense(out_f, in_f, perm=None):
        return prep_linear(nrm((out_f, in_f), in_f ** -0.5), nrm((out_f,), 0.01), perm)

    hf = IMG // 16                                     # encoder output spatial size
    mu_perm = _nchw_to_nhwc_perm(128, hf, hf)          # mu rows permuted so NHWC
                                                       # flatten needs no relayout
    return {
        "enc": [conv(16, 3), conv(32, 16), conv(64, 32), conv(128, 64)],
        "mu": dense(LATENT_DIMS, ENC_FLAT, perm=mu_perm),
        "dec": [convt(256, 64), convt(64, 32), convt(32, 16), convt(16, 3)],
        "disc": [conv(16, 3, with_bn=False), conv(32, 16), conv(64, 32), conv(128, 64)],
        "disc_fc": dense(1, 128),
        "backbone": dense(BACKBONE_OUT, 3 * IMG * IMG),
        "fc1": dense(NUM_FEATURE // 2, NUM_FEATURE),
        "fc2": dense(NUM_FEATURE // 4, NUM_FEATURE // 2),
        "fc_out": dense(NUM_CLASSES, NUM_FEATURE // 4),
    }


# ------------------------------ forward pass --------------------------------
def genconvit_vae_forward(params, x, eps):
    B = x.shape[0]
    # TODO(synk): torchvision antialiased bilinear Resize approximated with jax.image.resize.
    x = jax.image.resize(x, (B, 3, IMG, IMG), method="linear", antialias=True)
    x = x.transpose(0, 2, 3, 1)                    # NHWC from here on
    x_bf = x.astype(MATMUL_DTYPE)

    # ---- Encoder: 4x (Conv s2 p1 -> BN -> SiLU) ----
    h = x_bf
    for p, c_out in zip(params["enc"], ENC_CH):
        h = conv2d_fused(h, p, c_out, 3, 3, 2, 1, "silu")
    # NHWC flatten; the mu weight rows were permuted at pack time to match the
    # reference's NCHW torch.flatten order, so no relayout pass is needed here.
    h_flat = h.reshape(B, -1)
    # NOTE: var(x) and self.kl in the reference are side-effect-only (not part of
    # forward's return values) and are removed here explicitly.
    z = mu_linear_reparam(h_flat, params["mu"], eps, LATENT_DIMS)

    # ---- Decoder: Unflatten(256, h0, w0) + 4x (ConvTranspose2d k2 s2 -> SiLU) ----
    d = z.reshape(B, 256, DEC_H0, DEC_H0).transpose(0, 2, 3, 1)
    for p, c_out in zip(params["dec"], DEC_CH):
        d = conv_transpose2x2_fused(d, p, c_out, "silu")
    x_hat = d                                      # NHWC (B, IMG, IMG, 3), bf16

    # ---- Discriminator ----
    g = x_hat
    for p, c_out in zip(params["disc"], ENC_CH):
        g = conv2d_fused(g, p, c_out, 3, 3, 2, 1, "silu")
    g = jnp.mean(g.astype(jnp.float32), axis=(1, 2))   # AdaptiveAvgPool2d(1) + Flatten
    disc_score = fused_matmul(g, params["disc_fc"], 1, "sigmoid",
                              out_dtype=jnp.float32)

    # ---- Backbone features: both projections share ONE matmul (weight read once) ----
    # TODO(synk): pretrained timm ConvNeXt backbone + HybridEmbed embedder has no Pallas
    # equivalent; substituted with a deterministic linear projection of the same output shape.
    a_stack = jnp.concatenate([x_bf.reshape(B, -1), x_hat.reshape(B, -1)], axis=0)
    bb = fused_matmul(a_stack, params["backbone"], BACKBONE_OUT, "none")   # (2B, out)
    feats = jnp.concatenate([bb[:B], bb[B:]], axis=1)                      # (B, num_feature)

    # ---- Classification head: fc -> SiLU -> fc -> SiLU -> fc2 in one kernel ----
    logits = mlp_head(feats, params["fc1"], params["fc2"], params["fc_out"], NUM_CLASSES)

    x_hat_nchw = x_hat.astype(jnp.float32).transpose(0, 3, 1, 2)
    x_hat_resized = jax.image.resize(x_hat_nchw, (B, 3, IMG, IMG),
                                     method="linear", antialias=True)
    contrastive_loss = jnp.float32(0.0)            # target is None -> 0
    return logits, x_hat_resized, disc_score, contrastive_loss


# --------------------------------- main --------------------------------------
if __name__ == "__main__":
    key = jax.random.PRNGKey(0)
    k_in, k_eps = jax.random.split(key)
    x = jax.random.normal(k_in, (2, 3, 16, 16), jnp.float32)
    eps = jax.random.normal(k_eps, (2, LATENT_DIMS), jnp.float32)  # eps = randn_like(std)
    params = init_params(jax.random.PRNGKey(42))

    fwd = jax.jit(genconvit_vae_forward)
    logits, x_hat_resized, disc_score, closs = fwd(params, x, eps)
    jax.block_until_ready((logits, x_hat_resized, disc_score, closs))

    assert logits.shape == (2, NUM_CLASSES)
    assert x_hat_resized.shape == (2, 3, IMG, IMG)
    assert disc_score.shape == (2, 1)
    assert jnp.all(jnp.isfinite(logits)) and jnp.all(jnp.isfinite(x_hat_resized))
    assert jnp.all(jnp.isfinite(disc_score))
    print("KERNEL_OK")
</pallas_src>

<mosaic_0001>
module attributes {stable_mosaic.version = 11 : i64} {
  func.func @_fused_matmul_kernel(%arg0: i32, %arg1: i32, %arg2: i32, %arg3: memref<128x128xbf16, #tpu.memory_space<vmem>>, %arg4: memref<128x128xbf16, #tpu.memory_space<vmem>>, %arg5: memref<1x128xf32, #tpu.memory_space<vmem>>, %arg6: memref<1x128xf32, #tpu.memory_space<vmem>>, %arg7: memref<128x128xbf16, #tpu.memory_space<vmem>>, %arg8: memref<128x128xf32, #tpu.memory_space<vmem>>) attributes {dimension_semantics = [#tpu.dimension_semantics<parallel>, #tpu.dimension_semantics<parallel>, #tpu.dimension_semantics<arbitrary>], iteration_bounds = array<i64: 1, 1, 1>, scalar_prefetch = 0 : i64, scratch_operands = 1 : i64, tpu.core_type = #tpu.core_type<tc>, window_params = [{transform_indices = @transform_0, window_bounds = array<i64: 128, 128>}, {transform_indices = @transform_1, window_bounds = array<i64: 128, 128>}, {transform_indices = @transform_2, window_bounds = array<i64: 1, 128>}, {transform_indices = @transform_3, window_bounds = array<i64: 1, 128>}, {transform_indices = @transform_4, window_bounds = array<i64: 128, 128>}]} {
    %c0_i32 = arith.constant 0 : i32
    %0 = arith.cmpi eq, %arg2, %c0_i32 : i32
    %1 = arith.extui %0 : i1 to i32
    %c0_i32_0 = arith.constant 0 : i32
    %2 = arith.cmpi ne, %1, %c0_i32_0 : i32
    scf.if %2 {
      %cst_10 = arith.constant 0.000000e+00 : f32
      %12 = vector.broadcast %cst_10 : f32 to vector<128x128xf32>
      %c0_11 = arith.constant 0 : index
      %c0_12 = arith.constant 0 : index
      %13 = vector.load %arg8[%c0_11, %c0_12] : memref<128x128xf32, #tpu.memory_space<vmem>>, vector<128x128xf32>
      tpu.vector_store %arg8[%c0_11, %c0_12], %12 {strides = array<i32>} : memref<128x128xf32, #tpu.memory_space<vmem>>, vector<128x128xf32>,
    } else {
    }
    %c0 = arith.constant 0 : index
    %c0_1 = arith.constant 0 : index
    %3 = vector.load %arg8[%c0, %c0_1] : memref<128x128xf32, #tpu.memory_space<vmem>>, vector<128x128xf32>
    %c0_2 = arith.constant 0 : index
    %c0_3 = arith.constant 0 : index
    %4 = vector.load %arg3[%c0_2, %c0_3] : memref<128x128xbf16, #tpu.memory_space<vmem>>, vector<128x128xbf16>
    %c0_4 = arith.constant 0 : index
    %c0_5 = arith.constant 0 : index
    %5 = vector.load %arg4[%c0_4, %c0_5] : memref<128x128xbf16, #tpu.memory_space<vmem>>, vector<128x128xbf16>
    %cst = arith.constant dense<0.000000e+00> : vector<128x128xf32>
    %6 = tpu.matmul %4, %5, %cst {dimension_numbers = #tpu.dot_dimension_numbers<[1], [0], [0], [1], [0, 0, 1, 1], [], []>} : vector<128x128xbf16>, vector<128x128xbf16>, vector<128x128xf32> -> vector<128x128xf32>
    %7 = arith.addf %3, %6 : vector<128x128xf32>
    %c0_6 = arith.constant 0 : index
    %c0_7 = arith.constant 0 : index
    %8 = vector.load %arg8[%c0_6, %c0_7] : memref<128x128xf32, #tpu.memory_space<vmem>>, vector<128x128xf32>
    tpu.vector_store %arg8[%c0_6, %c0_7], %7 {strides = array<i32>} : memref<128x128xf32, #tpu.memory_space<vmem>>, vector<128x128xf32>,
    %c0_i32_8 = arith.constant 0 : i32
    %9 = arith.cmpi eq, %arg2, %c0_i32_8 : i32
    %10 = arith.extui %9 : i1 to i32
    %c0_i32_9 = arith.constant 0 : i32
    %11 = arith.cmpi ne, %10, %c0_i32_9 : i32
    scf.if %11 {
      %c0_10 = arith.constant 0 : index
      %c0_11 = arith.constant 0 : index
      %12 = vector.load %arg8[%c0_10, %c0_11] : memref<128x128xf32, #tpu.memory_space<vmem>>, vector<128x128xf32>
      %c0_12 = arith.constant 0 : index
      %c0_13 = arith.constant 0 : index
      %13 = vector.load %arg5[%c0_12, %c0_13] : memref<1x128xf32, #tpu.memory_space<vmem>>, vector<1x128xf32>
      %14 = vector.broadcast %13 : vector<1x128xf32> to vector<128x128xf32>
      %15 = arith.mulf %12, %14 : vector<128x128xf32>
      %c0_14 = arith.constant 0 : index
      %c0_15 = arith.constant 0 : index
      %16 = vector.load %arg6[%c0_14, %c0_15] : memref<1x128xf32, #tpu.memory_space<vmem>>, vector<1x128xf32>
      %17 = vector.broadcast %16 : vector<1x128xf32> to vector<128x128xf32>
      %18 = arith.addf %15, %17 : vector<128x128xf32>
      %cst_16 = arith.constant 0.000000e+00 : f32
      %19 = vector.broadcast %cst_16 : f32 to vector<128x128xf32>
      %20 = arith.subf %19, %18 : vector<128x128xf32>
      %21 = math.exp %20 : vector<128x128xf32>
      %cst_17 = arith.constant 1.000000e+00 : f32
      %22 = vector.broadcast %cst_17 : f32 to vector<128x128xf32>
      %23 = arith.addf %22, %21 : vector<128x128xf32>
      %24 = tpu.reciprocal %23 {approx = true} : vector<128x128xf32> -> vector<128x128xf32>
      %25 = arith.mulf %18, %24 : vector<128x128xf32>
      %26 = arith.truncf %25 : vector<128x128xf32> to vector<128x128xbf16>
      %c0_18 = arith.constant 0 : index
      %c0_19 = arith.constant 0 : index
      %27 = vector.load %arg7[%c0_18, %c0_19] : memref<128x128xbf16, #tpu.memory_space<vmem>>, vector<128x128xbf16>
      tpu.vector_store %arg7[%c0_18, %c0_19], %26 {strides = array<i32>} : memref<128x128xbf16, #tpu.memory_space<vmem>>, vector<128x128xbf16>,
    } else {
    }
    return
  }
  func.func @transform_0(%arg0: i32, %arg1: i32, %arg2: i32) -> (i32, i32) {
    %c0_i32 = arith.constant 0 : i32
    return %arg0, %arg2 : i32, i32
  }
  func.func @transform_1(%arg0: i32, %arg1: i32, %arg2: i32) -> (i32, i32) {
    %c0_i32 = arith.constant 0 : i32
    return %arg2, %arg1 : i32, i32
  }
  func.func @transform_2(%arg0: i32, %arg1: i32, %arg2: i32) -> (i32, i32) {
    %c0_i32 = arith.constant 0 : i32
    %c0_i32_0 = arith.constant 0 : i32
    return %c0_i32, %arg1 : i32, i32
  }
  func.func @transform_3(%arg0: i32, %arg1: i32, %arg2: i32) -> (i32, i32) {
    %c0_i32 = arith.constant 0 : i32
    %c0_i32_0 = arith.constant 0 : i32
    return %c0_i32, %arg1 : i32, i32
  }
  func.func @transform_4(%arg0: i32, %arg1: i32, %arg2: i32) -> (i32, i32) {
    %c0_i32 = arith.constant 0 : i32
    return %arg0, %arg1 : i32, i32
  }
}

module attributes {stable_mosaic.version = 11 : i64} {
  func.func @_fused_matmul_kernel(%arg0: i32, %arg1: i32, %arg2: i32, %arg3: memref<32x256xbf16, #tpu.memory_space<vmem>>, %arg4: memref<256x128xbf16, #tpu.memory_space<vmem>>, %arg5: memref<1x128xf32, #tpu.memory_space<vmem>>, %arg6: memref<1x128xf32, #tpu.memory_space<vmem>>, %arg7: memref<32x128xbf16, #tpu.memory_space<vmem>>, %arg8: memref<32x128xf32, #tpu.memory_space<vmem>>) attributes {dimension_semantics = [#tpu.dimension_semantics<parallel>, #tpu.dimension_semantics<parallel>, #tpu.dimension_semantics<arbitrary>], iteration_bounds = array<i64: 1, 1, 1>, scalar_prefetch = 0 : i64, scratch_operands = 1 : i64, tpu.core_type = #tpu.core_type<tc>, window_params = [{transform_indices = @transform_0, window_bounds = array<i64: 32, 256>}, {transform_indices = @transform_1, window_bounds = array<i64: 256, 128>}, {transform_indices = @transform_2, window_bounds = array<i64: 1, 128>}, {transform_indices = @transform_3, window_bounds = array<i64: 1, 128>}, {transform_indices = @transform_4, window_bounds = array<i64: 32, 128>}]} {
    %c0_i32 = arith.constant 0 : i32
    %0 = arith.cmpi eq, %arg2, %c0_i32 : i32
    %1 = arith.extui %0 : i1 to i32
    %c0_i32_0 = arith.constant 0 : i32
    %2 = arith.cmpi ne, %1, %c0_i32_0 : i32
    scf.if %2 {
      %cst_10 = arith.constant 0.000000e+00 : f32
      %12 = vector.broadcast %cst_10 : f32 to vector<32x128xf32>
      %c0_11 = arith.constant 0 : index
      %c0_12 = arith.constant 0 : index
      %13 = vector.load %arg8[%c0_11, %c0_12] : memref<32x128xf32, #tpu.memory_space<vmem>>, vector<32x128xf32>
      tpu.vector_store %arg8[%c0_11, %c0_12], %12 {strides = array<i32>} : memref<32x128xf32, #tpu.memory_space<vmem>>, vector<32x128xf32>,
    } else {
    }
    %c0 = arith.constant 0 : index
    %c0_1 = arith.constant 0 : index
    %3 = vector.load %arg8[%c0, %c0_1] : memref<32x128xf32, #tpu.memory_space<vmem>>, vector<32x128xf32>
    %c0_2 = arith.constant 0 : index
    %c0_3 = arith.constant 0 : index
    %4 = vector.load %arg3[%c0_2, %c0_3] : memref<32x256xbf16, #tpu.memory_space<vmem>>, vector<32x256xbf16>
    %c0_4 = arith.constant 0 : index
    %c0_5 = arith.constant 0 : index
    %5 = vector.load %arg4[%c0_4, %c0_5] : memref<256x128xbf16, #tpu.memory_space<vmem>>, vector<256x128xbf16>
    %cst = arith.constant dense<0.000000e+00> : vector<32x128xf32>
    %6 = tpu.matmul %4, %5, %cst {dimension_numbers = #tpu.dot_dimension_numbers<[1], [0], [0], [1], [0, 0, 1, 1], [], []>} : vector<32x256xbf16>, vector<256x128xbf16>, vector<32x128xf32> -> vector<32x128xf32>
    %7 = arith.addf %3, %6 : vector<32x128xf32>
    %c0_6 = arith.constant 0 : index
    %c0_7 = arith.constant 0 : index
    %8 = vector.load %arg8[%c0_6, %c0_7] : memref<32x128xf32, #tpu.memory_space<vmem>>, vector<32x128xf32>
    tpu.vector_store %arg8[%c0_6, %c0_7], %7 {strides = array<i32>} : memref<32x128xf32, #tpu.memory_space<vmem>>, vector<32x128xf32>,
    %c0_i32_8 = arith.constant 0 : i32
    %9 = arith.cmpi eq, %arg2, %c0_i32_8 : i32
    %10 = arith.extui %9 : i1 to i32
    %c0_i32_9 = arith.constant 0 : i32
    %11 = arith.cmpi ne, %10, %c0_i32_9 : i32
    scf.if %11 {
      %c0_10 = arith.constant 0 : index
      %c0_11 = arith.constant 0 : index
      %12 = vector.load %arg8[%c0_10, %c0_11] : memref<32x128xf32, #tpu.memory_space<vmem>>, vector<32x128xf32>
      %c0_12 = arith.constant 0 : index
      %c0_13 = arith.constant 0 : index
      %13 = vector.load %arg5[%c0_12, %c0_13] : memref<1x128xf32, #tpu.memory_space<vmem>>, vector<1x128xf32>
      %14 = vector.broadcast %13 : vector<1x128xf32> to vector<32x128xf32>
      %15 = arith.mulf %12, %14 : vector<32x128xf32>
      %c0_14 = arith.constant 0 : index
      %c0_15 = arith.constant 0 : index
      %16 = vector.load %arg6[%c0_14, %c0_15] : memref<1x128xf32, #tpu.memory_space<vmem>>, vector<1x128xf32>
      %17 = vector.broadcast %16 : vector<1x128xf32> to vector<32x128xf32>
      %18 = arith.addf %15, %17 : vector<32x128xf32>
      %cst_16 = arith.constant 0.000000e+00 : f32
      %19 = vector.broadcast %cst_16 : f32 to vector<32x128xf32>
      %20 = arith.subf %19, %18 : vector<32x128xf32>
      %21 = math.exp %20 : vector<32x128xf32>
      %cst_17 = arith.constant 1.000000e+00 : f32
      %22 = vector.broadcast %cst_17 : f32 to vector<32x128xf32>
      %23 = arith.addf %22, %21 : vector<32x128xf32>
      %24 = tpu.reciprocal %23 {approx = true} : vector<32x128xf32> -> vector<32x128xf32>
      %25 = arith.mulf %18, %24 : vector<32x128xf32>
      %26 = arith.truncf %25 : vector<32x128xf32> to vector<32x128xbf16>
      %c0_18 = arith.constant 0 : index
      %c0_19 = arith.constant 0 : index
      %27 = vector.load %arg7[%c0_18, %c0_19] : memref<32x128xbf16, #tpu.memory_space<vmem>>, vector<32x128xbf16>
      tpu.vector_store %arg7[%c0_18, %c0_19], %26 {strides = array<i32>} : memref<32x128xbf16, #tpu.memory_space<vmem>>, vector<32x128xbf16>,
    } else {
    }
    return
  }
  func.func @transform_0(%arg0: i32, %arg1: i32, %arg2: i32) -> (i32, i32) {
    %c0_i32 = arith.constant 0 : i32
    return %arg0, %arg2 : i32, i32
  }
  func.func @transform_1(%arg0: i32, %arg1: i32, %arg2: i32) -> (i32, i32) {
    %c0_i32 = arith.constant 0 : i32
    return %arg2, %arg1 : i32, i32
  }
  func.func @transform_2(%arg0: i32, %arg1: i32, %arg2: i32) -> (i32, i32) {
    %c0_i32 = arith.constant 0 : i32
    %c0_i32_0 = arith.constant 0 : i32
    return %c0_i32, %arg1 : i32, i32
  }
  func.func @transform_3(%arg0: i32, %arg1: i32, %arg2: i32) -> (i32, i32) {
    %c0_i32 = arith.constant 0 : i32
    %c0_i32_0 = arith.constant 0 : i32
    return %c0_i32, %arg1 : i32, i32
  }
  func.func @transform_4(%arg0: i32, %arg1: i32, %arg2: i32) -> (i32, i32) {
    %c0_i32 = arith.constant 0 : i32
    return %arg0, %arg1 : i32, i32
  }
}

module attributes {stable_mosaic.version = 11 : i64} {
  func.func @_fused_matmul_kernel(%arg0: i32, %arg1: i32, %arg2: i32, %arg3: memref<8x384xbf16, #tpu.memory_space<vmem>>, %arg4: memref<384x128xbf16, #tpu.memory_space<vmem>>, %arg5: memref<1x128xf32, #tpu.memory_space<vmem>>, %arg6: memref<1x128xf32, #tpu.memory_space<vmem>>, %arg7: memref<8x128xbf16, #tpu.memory_space<vmem>>, %arg8: memref<8x128xf32, #tpu.memory_space<vmem>>) attributes {dimension_semantics = [#tpu.dimension_semantics<parallel>, #tpu.dimension_semantics<parallel>, #tpu.dimension_semantics<arbitrary>], iteration_bounds = array<i64: 1, 1, 1>, scalar_prefetch = 0 : i64, scratch_operands = 1 : i64, tpu.core_type = #tpu.core_type<tc>, window_params = [{transform_indices = @transform_0, window_bounds = array<i64: 8, 384>}, {transform_indices = @transform_1, window_bounds = array<i64: 384, 128>}, {transform_indices = @transform_2, window_bounds = array<i64: 1, 128>}, {transform_indices = @transform_3, window_bounds = array<i64: 1, 128>}, {transform_indices = @transform_4, window_bounds = array<i64: 8, 128>}]} {
    %c0_i32 = arith.constant 0 : i32
    %0 = arith.cmpi eq, %arg2, %c0_i32 : i32
    %1 = arith.extui %0 : i1 to i32
    %c0_i32_0 = arith.constant 0 : i32
    %2 = arith.cmpi ne, %1, %c0_i32_0 : i32
    scf.if %2 {
      %cst_10 = arith.constant 0.000000e+00 : f32
      %12 = vector.broadcast %cst_10 : f32 to vector<8x128xf32>
      %c0_11 = arith.constant 0 : index
      %c0_12 = arith.constant 0 : index
      %13 = vector.load %arg8[%c0_11, %c0_12] : memref<8x128xf32, #tpu.memory_space<vmem>>, vector<8x128xf32>
      tpu.vector_store %arg8[%c0_11, %c0_12], %12 {strides = array<i32>} : memref<8x128xf32, #tpu.memory_space<vmem>>, vector<8x128xf32>,
    } else {
    }
    %c0 = arith.constant 0 : index
    %c0_1 = arith.constant 0 : index
    %3 = vector.load %arg8[%c0, %c0_1] : memref<8x128xf32, #tpu.memory_space<vmem>>, vector<8x128xf32>
    %c0_2 = arith.constant 0 : index
    %c0_3 = arith.constant 0 : index
    %4 = vector.load %arg3[%c0_2, %c0_3] : memref<8x384xbf16, #tpu.memory_space<vmem>>, vector<8x384xbf16>
    %c0_4 = arith.constant 0 : index
    %c0_5 = arith.constant 0 : index
    %5 = vector.load %arg4[%c0_4, %c0_5] : memref<384x128xbf16, #tpu.memory_space<vmem>>, vector<384x128xbf16>
    %cst = arith.constant dense<0.000000e+00> : vector<8x128xf32>
    %6 = tpu.matmul %4, %5, %cst {dimension_numbers = #tpu.dot_dimension_numbers<[1], [0], [0], [1], [0, 0, 1, 1], [], []>} : vector<8x384xbf16>, vector<384x128xbf16>, vector<8x128xf32> -> vector<8x128xf32>
    %7 = arith.addf %3, %6 : vector<8x128xf32>
    %c0_6 = arith.constant 0 : index
    %c0_7 = arith.constant 0 : index
    %8 = vector.load %arg8[%c0_6, %c0_7] : memref<8x128xf32, #tpu.memory_space<vmem>>, vector<8x128xf32>
    tpu.vector_store %arg8[%c0_6, %c0_7], %7 {strides = array<i32>} : memref<8x128xf32, #tpu.memory_space<vmem>>, vector<8x128xf32>,
    %c0_i32_8 = arith.constant 0 : i32
    %9 = arith.cmpi eq, %arg2, %c0_i32_8 : i32
    %10 = arith.extui %9 : i1 to i32
    %c0_i32_9 = arith.constant 0 : i32
    %11 = arith.cmpi ne, %10, %c0_i32_9 : i32
    scf.if %11 {
      %c0_10 = arith.constant 0 : index
      %c0_11 = arith.constant 0 : index
      %12 = vector.load %arg8[%c0_10, %c0_11] : memref<8x128xf32, #tpu.memory_space<vmem>>, vector<8x128xf32>
      %c0_12 = arith.constant 0 : index
      %c0_13 = arith.constant 0 : index
      %13 = vector.load %arg5[%c0_12, %c0_13] : memref<1x128xf32, #tpu.memory_space<vmem>>, vector<1x128xf32>
      %14 = vector.broadcast %13 : vector<1x128xf32> to vector<8x128xf32>
      %15 = arith.mulf %12, %14 : vector<8x128xf32>
      %c0_14 = arith.constant 0 : index
      %c0_15 = arith.constant 0 : index
      %16 = vector.load %arg6[%c0_14, %c0_15] : memref<1x128xf32, #tpu.memory_space<vmem>>, vector<1x128xf32>
      %17 = vector.broadcast %16 : vector<1x128xf32> to vector<8x128xf32>
      %18 = arith.addf %15, %17 : vector<8x128xf32>
      %cst_16 = arith.constant 0.000000e+00 : f32
      %19 = vector.broadcast %cst_16 : f32 to vector<8x128xf32>
      %20 = arith.subf %19, %18 : vector<8x128xf32>
      %21 = math.exp %20 : vector<8x128xf32>
      %cst_17 = arith.constant 1.000000e+00 : f32
      %22 = vector.broadcast %cst_17 : f32 to vector<8x128xf32>
      %23 = arith.addf %22, %21 : vector<8x128xf32>
      %24 = tpu.reciprocal %23 {approx = true} : vector<8x128xf32> -> vector<8x128xf32>
      %25 = arith.mulf %18, %24 : vector<8x128xf32>
      %26 = arith.truncf %25 : vector<8x128xf32> to vector<8x128xbf16>
      %c0_18 = arith.constant 0 : index
      %c0_19 = arith.constant 0 : index
      %27 = vector.load %arg7[%c0_18, %c0_19] : memref<8x128xbf16, #tpu.memory_space<vmem>>, vector<8x128xbf16>
      tpu.vector_store %arg7[%c0_18, %c0_19], %26 {strides = array<i32>} : memref<8x128xbf16, #tpu.memory_space<vmem>>, vector<8x128xbf16>,
    } else {
    }
    return
  }
  func.func @transform_0(%arg0: i32, %arg1: i32, %arg2: i32) -> (i32, i32) {
    %c0_i32 = arith.constant 0 : i32
    return %arg0, %arg2 : i32, i32
  }
  func.func @transform_1(%arg0: i32, %arg1: i32, %arg2: i32) -> (i32, i32) {
    %c0_i32 = arith.constant 0 : i32
    return %arg2, %arg1 : i32, i32
  }
  func.func @transform_2(%arg0: i32, %arg1: i32, %arg2: i32) -> (i32, i32) {
    %c0_i32 = arith.constant 0 : i32
    %c0_i32_0 = arith.constant 0 : i32
    return %c0_i32, %arg1 : i32, i32
  }
  func.func @transform_3(%arg0: i32, %arg1: i32, %arg2: i32) -> (i32, i32) {
    %c0_i32 = arith.constant 0 : i32
    %c0_i32_0 = arith.constant 0 : i32
    return %c0_i32, %arg1 : i32, i32
  }
  func.func @transform_4(%arg0: i32, %arg1: i32, %arg2: i32) -> (i32, i32) {
    %c0_i32 = arith.constant 0 : i32
    return %arg0, %arg1 : i32, i32
  }
}

module attributes {stable_mosaic.version = 11 : i64} {
  func.func @_mu_reparam_kernel(%arg0: i32, %arg1: i32, %arg2: i32, %arg3: memref<8x128xbf16, #tpu.memory_space<vmem>>, %arg4: memref<128x256xbf16, #tpu.memory_space<vmem>>, %arg5: memref<1x256xf32, #tpu.memory_space<vmem>>, %arg6: memref<8x256xf32, #tpu.memory_space<vmem>>, %arg7: memref<8x256xbf16, #tpu.memory_space<vmem>>, %arg8: memref<8x256xf32, #tpu.memory_space<vmem>>) attributes {dimension_semantics = [#tpu.dimension_semantics<parallel>, #tpu.dimension_semantics<parallel>, #tpu.dimension_semantics<arbitrary>], iteration_bounds = array<i64: 1, 1, 1>, scalar_prefetch = 0 : i64, scratch_operands = 1 : i64, tpu.core_type = #tpu.core_type<tc>, window_params = [{transform_indices = @transform_0, window_bounds = array<i64: 8, 128>}, {transform_indices = @transform_1, window_bounds = array<i64: 128, 256>}, {transform_indices = @transform_2, window_bounds = array<i64: 1, 256>}, {transform_indices = @transform_3, window_bounds = array<i64: 8, 256>}, {transform_indices = @transform_4, window_bounds = array<i64: 8, 256>}]} {
    %c0_i32 = arith.constant 0 : i32
    %0 = arith.cmpi eq, %arg2, %c0_i32 : i32
    %1 = arith.extui %0 : i1 to i32
    %c0_i32_0 = arith.constant 0 : i32
    %2 = arith.cmpi ne, %1, %c0_i32_0 : i32
    scf.if %2 {
      %cst_10 = arith.constant 0.000000e+00 : f32
      %12 = vector.broadcast %cst_10 : f32 to vector<8x256xf32>
      %c0_11 = arith.constant 0 : index
      %c0_12 = arith.constant 0 : index
      %13 = vector.load %arg8[%c0_11, %c0_12] : memref<8x256xf32, #tpu.memory_space<vmem>>, vector<8x256xf32>
      tpu.vector_store %arg8[%c0_11, %c0_12], %12 {strides = array<i32>} : memref<8x256xf32, #tpu.memory_space<vmem>>, vector<8x256xf32>,
    } else {
    }
    %c0 = arith.constant 0 : index
    %c0_1 = arith.constant 0 : index
    %3 = vector.load %arg8[%c0, %c0_1] : memref<8x256xf32, #tpu.memory_space<vmem>>, vector<8x256xf32>
    %c0_2 = arith.constant 0 : index
    %c0_3 = arith.constant 0 : index
    %4 = vector.load %arg3[%c0_2, %c0_3] : memref<8x128xbf16, #tpu.memory_space<vmem>>, vector<8x128xbf16>
    %c0_4 = arith.constant 0 : index
    %c0_5 = arith.constant 0 : index
    %5 = vector.load %arg4[%c0_4, %c0_5] : memref<128x256xbf16, #tpu.memory_space<vmem>>, vector<128x256xbf16>
    %cst = arith.constant dense<0.000000e+00> : vector<8x256xf32>
    %6 = tpu.matmul %4, %5, %cst {dimension_numbers = #tpu.dot_dimension_numbers<[1], [0], [0], [1], [0, 0, 1, 1], [], []>} : vector<8x128xbf16>, vector<128x256xbf16>, vector<8x256xf32> -> vector<8x256xf32>
    %7 = arith.addf %3, %6 : vector<8x256xf32>
    %c0_6 = arith.constant 0 : index
    %c0_7 = arith.constant 0 : index
    %8 = vector.load %arg8[%c0_6, %c0_7] : memref<8x256xf32, #tpu.memory_space<vmem>>, vector<8x256xf32>
    tpu.vector_store %arg8[%c0_6, %c0_7], %7 {strides = array<i32>} : memref<8x256xf32, #tpu.memory_space<vmem>>, vector<8x256xf32>,
    %c0_i32_8 = arith.constant 0 : i32
    %9 = arith.cmpi eq, %arg2, %c0_i32_8 : i32
    %10 = arith.extui %9 : i1 to i32
    %c0_i32_9 = arith.constant 0 : i32
    %11 = arith.cmpi ne, %10, %c0_i32_9 : i32
    scf.if %11 {
      %c0_10 = arith.constant 0 : index
      %c0_11 = arith.constant 0 : index
      %12 = vector.load %arg8[%c0_10, %c0_11] : memref<8x256xf32, #tpu.memory_space<vmem>>, vector<8x256xf32>
      %c0_12 = arith.constant 0 : index
      %c0_13 = arith.constant 0 : index
      %13 = vector.load %arg5[%c0_12, %c0_13] : memref<1x256xf32, #tpu.memory_space<vmem>>, vector<1x256xf32>
      %14 = vector.broadcast %13 : vector<1x256xf32> to vector<8x256xf32>
      %15 = arith.addf %12, %14 : vector<8x256xf32>
      %c0_14 = arith.constant 0 : index
      %c0_15 = arith.constant 0 : index
      %16 = vector.load %arg6[%c0_14, %c0_15] : memref<8x256xf32, #tpu.memory_space<vmem>>, vector<8x256xf32>
      %cst_16 = arith.constant 5.000000e-01 : f32
      %17 = vector.broadcast %cst_16 : f32 to vector<8x256xf32>
      %18 = arith.mulf %17, %15 : vector<8x256xf32>
      %19 = math.exp %18 : vector<8x256xf32>
      %20 = arith.mulf %16, %19 : vector<8x256xf32>
      %21 = arith.addf %20, %15 : vector<8x256xf32>
      %22 = arith.truncf %21 : vector<8x256xf32> to vector<8x256xbf16>
      %c0_17 = arith.constant 0 : index
      %c0_18 = arith.constant 0 : index
      %23 = vector.load %arg7[%c0_17, %c0_18] : memref<8x256xbf16, #tpu.memory_space<vmem>>, vector<8x256xbf16>
      tpu.vector_store %arg7[%c0_17, %c0_18], %22 {strides = array<i32>} : memref<8x256xbf16, #tpu.memory_space<vmem>>, vector<8x256xbf16>,
    } else {
    }
    return
  }
  func.func @transform_0(%arg0: i32, %arg1: i32, %arg2: i32) -> (i32, i32) {
    %c0_i32 = arith.constant 0 : i32
    return %arg0, %arg2 : i32, i32
  }
  func.func @transform_1(%arg0: i32, %arg1: i32, %arg2: i32) -> (i32, i32) {
    %c0_i32 = arith.constant 0 : i32
    return %arg2, %arg1 : i32, i32
  }
  func.func @transform_2(%arg0: i32, %arg1: i32, %arg2: i32) -> (i32, i32) {
    %c0_i32 = arith.constant 0 : i32
    %c0_i32_0 = arith.constant 0 : i32
    return %c0_i32, %arg1 : i32, i32
  }
  func.func @transform_3(%arg0: i32, %arg1: i32, %arg2: i32) -> (i32, i32) {
    %c0_i32 = arith.constant 0 : i32
    return %arg0, %arg1 : i32, i32
  }
  func.func @transform_4(%arg0: i32, %arg1: i32, %arg2: i32) -> (i32, i32) {
    %c0_i32 = arith.constant 0 : i32
    return %arg0, %arg1 : i32, i32
  }
}

module attributes {stable_mosaic.version = 11 : i64} {
  func.func @_fused_matmul_kernel(%arg0: i32, %arg1: i32, %arg2: i32, %arg3: memref<8x256xbf16, #tpu.memory_space<vmem>>, %arg4: memref<256x256xbf16, #tpu.memory_space<vmem>>, %arg5: memref<1x256xf32, #tpu.memory_space<vmem>>, %arg6: memref<1x256xf32, #tpu.memory_space<vmem>>, %arg7: memref<8x256xbf16, #tpu.memory_space<vmem>>, %arg8: memref<8x256xf32, #tpu.memory_space<vmem>>) attributes {dimension_semantics = [#tpu.dimension_semantics<parallel>, #tpu.dimension_semantics<parallel>, #tpu.dimension_semantics<arbitrary>], iteration_bounds = array<i64: 1, 1, 1>, scalar_prefetch = 0 : i64, scratch_operands = 1 : i64, tpu.core_type = #tpu.core_type<tc>, window_params = [{transform_indices = @transform_0, window_bounds = array<i64: 8, 256>}, {transform_indices = @transform_1, window_bounds = array<i64: 256, 256>}, {transform_indices = @transform_2, window_bounds = array<i64: 1, 256>}, {transform_indices = @transform_3, window_bounds = array<i64: 1, 256>}, {transform_indices = @transform_4, window_bounds = array<i64: 8, 256>}]} {
    %c0_i32 = arith.constant 0 : i32
    %0 = arith.cmpi eq, %arg2, %c0_i32 : i32
    %1 = arith.extui %0 : i1 to i32
    %c0_i32_0 = arith.constant 0 : i32
    %2 = arith.cmpi ne, %1, %c0_i32_0 : i32
    scf.if %2 {
      %cst_10 = arith.constant 0.000000e+00 : f32
      %12 = vector.broadcast %cst_10 : f32 to vector<8x256xf32>
      %c0_11 = arith.constant 0 : index
      %c0_12 = arith.constant 0 : index
      %13 = vector.load %arg8[%c0_11, %c0_12] : memref<8x256xf32, #tpu.memory_space<vmem>>, vector<8x256xf32>
      tpu.vector_store %arg8[%c0_11, %c0_12], %12 {strides = array<i32>} : memref<8x256xf32, #tpu.memory_space<vmem>>, vector<8x256xf32>,
    } else {
    }
    %c0 = arith.constant 0 : index
    %c0_1 = arith.constant 0 : index
    %3 = vector.load %arg8[%c0, %c0_1] : memref<8x256xf32, #tpu.memory_space<vmem>>, vector<8x256xf32>
    %c0_2 = arith.constant 0 : index
    %c0_3 = arith.constant 0 : index
    %4 = vector.load %arg3[%c0_2, %c0_3] : memref<8x256xbf16, #tpu.memory_space<vmem>>, vector<8x256xbf16>
    %c0_4 = arith.constant 0 : index
    %c0_5 = arith.constant 0 : index
    %5 = vector.load %arg4[%c0_4, %c0_5] : memref<256x256xbf16, #tpu.memory_space<vmem>>, vector<256x256xbf16>
    %cst = arith.constant dense<0.000000e+00> : vector<8x256xf32>
    %6 = tpu.matmul %4, %5, %cst {dimension_numbers = #tpu.dot_dimension_numbers<[1], [0], [0], [1], [0, 0, 1, 1], [], []>} : vector<8x256xbf16>, vector<256x256xbf16>, vector<8x256xf32> -> vector<8x256xf32>
    %7 = arith.addf %3, %6 : vector<8x256xf32>
    %c0_6 = arith.constant 0 : index
    %c0_7 = arith.constant 0 : index
    %8 = vector.load %arg8[%c0_6, %c0_7] : memref<8x256xf32, #tpu.memory_space<vmem>>, vector<8x256xf32>
    tpu.vector_store %arg8[%c0_6, %c0_7], %7 {strides = array<i32>} : memref<8x256xf32, #tpu.memory_space<vmem>>, vector<8x256xf32>,
    %c0_i32_8 = arith.constant 0 : i32
    %9 = arith.cmpi eq, %arg2, %c0_i32_8 : i32
    %10 = arith.extui %9 : i1 to i32
    %c0_i32_9 = arith.constant 0 : i32
    %11 = arith.cmpi ne, %10, %c0_i32_9 : i32
    scf.if %11 {
      %c0_10 = arith.constant 0 : index
      %c0_11 = arith.constant 0 : index
      %12 = vector.load %arg8[%c0_10, %c0_11] : memref<8x256xf32, #tpu.memory_space<vmem>>, vector<8x256xf32>
      %c0_12 = arith.constant 0 : index
      %c0_13 = arith.constant 0 : index
      %13 = vector.load %arg5[%c0_12, %c0_13] : memref<1x256xf32, #tpu.memory_space<vmem>>, vector<1x256xf32>
      %14 = vector.broadcast %13 : vector<1x256xf32> to vector<8x256xf32>
      %15 = arith.mulf %12, %14 : vector<8x256xf32>
      %c0_14 = arith.constant 0 : index
      %c0_15 = arith.constant 0 : index
      %16 = vector.load %arg6[%c0_14, %c0_15] : memref<1x256xf32, #tpu.memory_space<vmem>>, vector<1x256xf32>
      %17 = vector.broadcast %16 : vector<1x256xf32> to vector<8x256xf32>
      %18 = arith.addf %15, %17 : vector<8x256xf32>
      %cst_16 = arith.constant 0.000000e+00 : f32
      %19 = vector.broadcast %cst_16 : f32 to vector<8x256xf32>
      %20 = arith.subf %19, %18 : vector<8x256xf32>
      %21 = math.exp %20 : vector<8x256xf32>
      %cst_17 = arith.constant 1.000000e+00 : f32
      %22 = vector.broadcast %cst_17 : f32 to vector<8x256xf32>
      %23 = arith.addf %22, %21 : vector<8x256xf32>
      %24 = tpu.reciprocal %23 {approx = true} : vector<8x256xf32> -> vector<8x256xf32>
      %25 = arith.mulf %18, %24 : vector<8x256xf32>
      %26 = arith.truncf %25 : vector<8x256xf32> to vector<8x256xbf16>
      %c0_18 = arith.constant 0 : index
      %c0_19 = arith.constant 0 : index
      %27 = vector.load %arg7[%c0_18, %c0_19] : memref<8x256xbf16, #tpu.memory_space<vmem>>, vector<8x256xbf16>
      tpu.vector_store %arg7[%c0_18, %c0_19], %26 {strides = array<i32>} : memref<8x256xbf16, #tpu.memory_space<vmem>>, vector<8x256xbf16>,
    } else {
    }
    return
  }
  func.func @transform_0(%arg0: i32, %arg1: i32, %arg2: i32) -> (i32, i32) {
    %c0_i32 = arith.constant 0 : i32
    return %arg0, %arg2 : i32, i32
  }
  func.func @transform_1(%arg0: i32, %arg1: i32, %arg2: i32) -> (i32, i32) {
    %c0_i32 = arith.constant 0 : i32
    return %arg2, %arg1 : i32, i32
  }
  func.func @transform_2(%arg0: i32, %arg1: i32, %arg2: i32) -> (i32, i32) {
    %c0_i32 = arith.constant 0 : i32
    %c0_i32_0 = arith.constant 0 : i32
    return %c0_i32, %arg1 : i32, i32
  }
  func.func @transform_3(%arg0: i32, %arg1: i32, %arg2: i32) -> (i32, i32) {
    %c0_i32 = arith.constant 0 : i32
    %c0_i32_0 = arith.constant 0 : i32
    return %c0_i32, %arg1 : i32, i32
  }
  func.func @transform_4(%arg0: i32, %arg1: i32, %arg2: i32) -> (i32, i32) {
    %c0_i32 = arith.constant 0 : i32
    return %arg0, %arg1 : i32, i32
  }
}

module attributes {stable_mosaic.version = 11 : i64} {
  func.func @_fused_matmul_kernel(%arg0: i32, %arg1: i32, %arg2: i32, %arg3: memref<8x640xbf16, #tpu.memory_space<vmem>>, %arg4: memref<640x128xbf16, #tpu.memory_space<vmem>>, %arg5: memref<1x128xf32, #tpu.memory_space<vmem>>, %arg6: memref<1x128xf32, #tpu.memory_space<vmem>>, %arg7: memref<8x128xbf16, #tpu.memory_space<vmem>>, %arg8: memref<8x128xf32, #tpu.memory_space<vmem>>) attributes {dimension_semantics = [#tpu.dimension_semantics<parallel>, #tpu.dimension_semantics<parallel>, #tpu.dimension_semantics<arbitrary>], iteration_bounds = array<i64: 1, 1, 1>, scalar_prefetch = 0 : i64, scratch_operands = 1 : i64, tpu.core_type = #tpu.core_type<tc>, window_params = [{transform_indices = @transform_0, window_bounds = array<i64: 8, 640>}, {transform_indices = @transform_1, window_bounds = array<i64: 640, 128>}, {transform_indices = @transform_2, window_bounds = array<i64: 1, 128>}, {transform_indices = @transform_3, window_bounds = array<i64: 1, 128>}, {transform_indices = @transform_4, window_bounds = array<i64: 8, 128>}]} {
    %c0_i32 = arith.constant 0 : i32
    %0 = arith.cmpi eq, %arg2, %c0_i32 : i32
    %1 = arith.extui %0 : i1 to i32
    %c0_i32_0 = arith.constant 0 : i32
    %2 = arith.cmpi ne, %1, %c0_i32_0 : i32
    scf.if %2 {
      %cst_10 = arith.constant 0.000000e+00 : f32
      %12 = vector.broadcast %cst_10 : f32 to vector<8x128xf32>
      %c0_11 = arith.constant 0 : index
      %c0_12 = arith.constant 0 : index
      %13 = vector.load %arg8[%c0_11, %c0_12] : memref<8x128xf32, #tpu.memory_space<vmem>>, vector<8x128xf32>
      tpu.vector_store %arg8[%c0_11, %c0_12], %12 {strides = array<i32>} : memref<8x128xf32, #tpu.memory_space<vmem>>, vector<8x128xf32>,
    } else {
    }
    %c0 = arith.constant 0 : index
    %c0_1 = arith.constant 0 : index
    %3 = vector.load %arg8[%c0, %c0_1] : memref<8x128xf32, #tpu.memory_space<vmem>>, vector<8x128xf32>
    %c0_2 = arith.constant 0 : index
    %c0_3 = arith.constant 0 : index
    %4 = vector.load %arg3[%c0_2, %c0_3] : memref<8x640xbf16, #tpu.memory_space<vmem>>, vector<8x640xbf16>
    %c0_4 = arith.constant 0 : index
    %c0_5 = arith.constant 0 : index
    %5 = vector.load %arg4[%c0_4, %c0_5] : memref<640x128xbf16, #tpu.memory_space<vmem>>, vector<640x128xbf16>
    %cst = arith.constant dense<0.000000e+00> : vector<8x128xf32>
    %6 = tpu.matmul %4, %5, %cst {dimension_numbers = #tpu.dot_dimension_numbers<[1], [0], [0], [1], [0, 0, 1, 1], [], []>} : vector<8x640xbf16>, vector<640x128xbf16>, vector<8x128xf32> -> vector<8x128xf32>
    %7 = arith.addf %3, %6 : vector<8x128xf32>
    %c0_6 = arith.constant 0 : index
    %c0_7 = arith.constant 0 : index
    %8 = vector.load %arg8[%c0_6, %c0_7] : memref<8x128xf32, #tpu.memory_space<vmem>>, vector<8x128xf32>
    tpu.vector_store %arg8[%c0_6, %c0_7], %7 {strides = array<i32>} : memref<8x128xf32, #tpu.memory_space<vmem>>, vector<8x128xf32>,
    %c0_i32_8 = arith.constant 0 : i32
    %9 = arith.cmpi eq, %arg2, %c0_i32_8 : i32
    %10 = arith.extui %9 : i1 to i32
    %c0_i32_9 = arith.constant 0 : i32
    %11 = arith.cmpi ne, %10, %c0_i32_9 : i32
    scf.if %11 {
      %c0_10 = arith.constant 0 : index
      %c0_11 = arith.constant 0 : index
      %12 = vector.load %arg8[%c0_10, %c0_11] : memref<8x128xf32, #tpu.memory_space<vmem>>, vector<8x128xf32>
      %c0_12 = arith.constant 0 : index
      %c0_13 = arith.constant 0 : index
      %13 = vector.load %arg5[%c0_12, %c0_13] : memref<1x128xf32, #tpu.memory_space<vmem>>, vector<1x128xf32>
      %14 = vector.broadcast %13 : vector<1x128xf32> to vector<8x128xf32>
      %15 = arith.mulf %12, %14 : vector<8x128xf32>
      %c0_14 = arith.constant 0 : index
      %c0_15 = arith.constant 0 : index
      %16 = vector.load %arg6[%c0_14, %c0_15] : memref<1x128xf32, #tpu.memory_space<vmem>>, vector<1x128xf32>
      %17 = vector.broadcast %16 : vector<1x128xf32> to vector<8x128xf32>
      %18 = arith.addf %15, %17 : vector<8x128xf32>
      %cst_16 = arith.constant 0.000000e+00 : f32
      %19 = vector.broadcast %cst_16 : f32 to vector<8x128xf32>
      %20 = arith.subf %19, %18 : vector<8x128xf32>
      %21 = math.exp %20 : vector<8x128xf32>
      %cst_17 = arith.constant 1.000000e+00 : f32
      %22 = vector.broadcast %cst_17 : f32 to vector<8x128xf32>
      %23 = arith.addf %22, %21 : vector<8x128xf32>
      %24 = tpu.reciprocal %23 {approx = true} : vector<8x128xf32> -> vector<8x128xf32>
      %25 = arith.mulf %18, %24 : vector<8x128xf32>
      %26 = arith.truncf %25 : vector<8x128xf32> to vector<8x128xbf16>
      %c0_18 = arith.constant 0 : index
      %c0_19 = arith.constant 0 : index
      %27 = vector.load %arg7[%c0_18, %c0_19] : memref<8x128xbf16, #tpu.memory_space<vmem>>, vector<8x128xbf16>
      tpu.vector_store %arg7[%c0_18, %c0_19], %26 {strides = array<i32>} : memref<8x128xbf16, #tpu.memory_space<vmem>>, vector<8x128xbf16>,
    } else {
    }
    return
  }
  func.func @transform_0(%arg0: i32, %arg1: i32, %arg2: i32) -> (i32, i32) {
    %c0_i32 = arith.constant 0 : i32
    return %arg0, %arg2 : i32, i32
  }
  func.func @transform_1(%arg0: i32, %arg1: i32, %arg2: i32) -> (i32, i32) {
    %c0_i32 = arith.constant 0 : i32
    return %arg2, %arg1 : i32, i32
  }
  func.func @transform_2(%arg0: i32, %arg1: i32, %arg2: i32) -> (i32, i32) {
    %c0_i32 = arith.constant 0 : i32
    %c0_i32_0 = arith.constant 0 : i32
    return %c0_i32, %arg1 : i32, i32
  }
  func.func @transform_3(%arg0: i32, %arg1: i32, %arg2: i32) -> (i32, i32) {
    %c0_i32 = arith.constant 0 : i32
    %c0_i32_0 = arith.constant 0 : i32
    return %c0_i32, %arg1 : i32, i32
  }
  func.func @transform_4(%arg0: i32, %arg1: i32, %arg2: i32) -> (i32, i32) {
    %c0_i32 = arith.constant 0 : i32
    return %arg0, %arg1 : i32, i32
  }
}

module attributes {stable_mosaic.version = 11 : i64} {
  func.func @_fused_matmul_kernel(%arg0: i32, %arg1: i32, %arg2: i32, %arg3: memref<8x128xbf16, #tpu.memory_space<vmem>>, %arg4: memref<128x128xbf16, #tpu.memory_space<vmem>>, %arg5: memref<1x128xf32, #tpu.memory_space<vmem>>, %arg6: memref<1x128xf32, #tpu.memory_space<vmem>>, %arg7: memref<8x128xbf16, #tpu.memory_space<vmem>>, %arg8: memref<8x128xf32, #tpu.memory_space<vmem>>) attributes {dimension_semantics = [#tpu.dimension_semantics<parallel>, #tpu.dimension_semantics<parallel>, #tpu.dimension_semantics<arbitrary>], iteration_bounds = array<i64: 1, 1, 1>, scalar_prefetch = 0 : i64, scratch_operands = 1 : i64, tpu.core_type = #tpu.core_type<tc>, window_params = [{transform_indices = @transform_0, window_bounds = array<i64: 8, 128>}, {transform_indices = @transform_1, window_bounds = array<i64: 128, 128>}, {transform_indices = @transform_2, window_bounds = array<i64: 1, 128>}, {transform_indices = @transform_3, window_bounds = array<i64: 1, 128>}, {transform_indices = @transform_4, window_bounds = array<i64: 8, 128>}]} {
    %c0_i32 = arith.constant 0 : i32
    %0 = arith.cmpi eq, %arg2, %c0_i32 : i32
    %1 = arith.extui %0 : i1 to i32
    %c0_i32_0 = arith.constant 0 : i32
    %2 = arith.cmpi ne, %1, %c0_i32_0 : i32
    scf.if %2 {
      %cst_10 = arith.constant 0.000000e+00 : f32
      %12 = vector.broadcast %cst_10 : f32 to vector<8x128xf32>
      %c0_11 = arith.constant 0 : index
      %c0_12 = arith.constant 0 : index
      %13 = vector.load %arg8[%c0_11, %c0_12] : memref<8x128xf32, #tpu.memory_space<vmem>>, vector<8x128xf32>
      tpu.vector_store %arg8[%c0_11, %c0_12], %12 {strides = array<i32>} : memref<8x128xf32, #tpu.memory_space<vmem>>, vector<8x128xf32>,
    } else {
    }
    %c0 = arith.constant 0 : index
    %c0_1 = arith.constant 0 : index
    %3 = vector.load %arg8[%c0, %c0_1] : memref<8x128xf32, #tpu.memory_space<vmem>>, vector<8x128xf32>
    %c0_2 = arith.constant 0 : index
    %c0_3 = arith.constant 0 : index
    %4 = vector.load %arg3[%c0_2, %c0_3] : memref<8x128xbf16, #tpu.memory_space<vmem>>, vector<8x128xbf16>
    %c0_4 = arith.constant 0 : index
    %c0_5 = arith.constant 0 : index
    %5 = vector.load %arg4[%c0_4, %c0_5] : memref<128x128xbf16, #tpu.memory_space<vmem>>, vector<128x128xbf16>
    %cst = arith.constant dense<0.000000e+00> : vector<8x128xf32>
    %6 = tpu.matmul %4, %5, %cst {dimension_numbers = #tpu.dot_dimension_numbers<[1], [0], [0], [1], [0, 0, 1, 1], [], []>} : vector<8x128xbf16>, vector<128x128xbf16>, vector<8x128xf32> -> vector<8x128xf32>
    %7 = arith.addf %3, %6 : vector<8x128xf32>
    %c0_6 = arith.constant 0 : index
    %c0_7 = arith.constant 0 : index
    %8 = vector.load %arg8[%c0_6, %c0_7] : memref<8x128xf32, #tpu.memory_space<vmem>>, vector<8x128xf32>
    tpu.vector_store %arg8[%c0_6, %c0_7], %7 {strides = array<i32>} : memref<8x128xf32, #tpu.memory_space<vmem>>, vector<8x128xf32>,
    %c0_i32_8 = arith.constant 0 : i32
    %9 = arith.cmpi eq, %arg2, %c0_i32_8 : i32
    %10 = arith.extui %9 : i1 to i32
    %c0_i32_9 = arith.constant 0 : i32
    %11 = arith.cmpi ne, %10, %c0_i32_9 : i32
    scf.if %11 {
      %c0_10 = arith.constant 0 : index
      %c0_11 = arith.constant 0 : index
      %12 = vector.load %arg8[%c0_10, %c0_11] : memref<8x128xf32, #tpu.memory_space<vmem>>, vector<8x128xf32>
      %c0_12 = arith.constant 0 : index
      %c0_13 = arith.constant 0 : index
      %13 = vector.load %arg5[%c0_12, %c0_13] : memref<1x128xf32, #tpu.memory_space<vmem>>, vector<1x128xf32>
      %14 = vector.broadcast %13 : vector<1x128xf32> to vector<8x128xf32>
      %15 = arith.mulf %12, %14 : vector<8x128xf32>
      %c0_14 = arith.constant 0 : index
      %c0_15 = arith.constant 0 : index
      %16 = vector.load %arg6[%c0_14, %c0_15] : memref<1x128xf32, #tpu.memory_space<vmem>>, vector<1x128xf32>
      %17 = vector.broadcast %16 : vector<1x128xf32> to vector<8x128xf32>
      %18 = arith.addf %15, %17 : vector<8x128xf32>
      %cst_16 = arith.constant 0.000000e+00 : f32
      %19 = vector.broadcast %cst_16 : f32 to vector<8x128xf32>
      %20 = arith.subf %19, %18 : vector<8x128xf32>
      %21 = math.exp %20 : vector<8x128xf32>
      %cst_17 = arith.constant 1.000000e+00 : f32
      %22 = vector.broadcast %cst_17 : f32 to vector<8x128xf32>
      %23 = arith.addf %22, %21 : vector<8x128xf32>
      %24 = tpu.reciprocal %23 {approx = true} : vector<8x128xf32> -> vector<8x128xf32>
      %25 = arith.mulf %18, %24 : vector<8x128xf32>
      %26 = arith.truncf %25 : vector<8x128xf32> to vector<8x128xbf16>
      %c0_18 = arith.constant 0 : index
      %c0_19 = arith.constant 0 : index
      %27 = vector.load %arg7[%c0_18, %c0_19] : memref<8x128xbf16, #tpu.memory_space<vmem>>, vector<8x128xbf16>
      tpu.vector_store %arg7[%c0_18, %c0_19], %26 {strides = array<i32>} : memref<8x128xbf16, #tpu.memory_space<vmem>>, vector<8x128xbf16>,
    } else {
    }
    return
  }
  func.func @transform_0(%arg0: i32, %arg1: i32, %arg2: i32) -> (i32, i32) {
    %c0_i32 = arith.constant 0 : i32
    return %arg0, %arg2 : i32, i32
  }
  func.func @transform_1(%arg0: i32, %arg1: i32, %arg2: i32) -> (i32, i32) {
    %c0_i32 = arith.constant 0 : i32
    return %arg2, %arg1 : i32, i32
  }
  func.func @transform_2(%arg0: i32, %arg1: i32, %arg2: i32) -> (i32, i32) {
    %c0_i32 = arith.constant 0 : i32
    %c0_i32_0 = arith.constant 0 : i32
    return %c0_i32, %arg1 : i32, i32
  }
  func.func @transform_3(%arg0: i32, %arg1: i32, %arg2: i32) -> (i32, i32) {
    %c0_i32 = arith.constant 0 : i32
    %c0_i32_0 = arith.constant 0 : i32
    return %c0_i32, %arg1 : i32, i32
  }
  func.func @transform_4(%arg0: i32, %arg1: i32, %arg2: i32) -> (i32, i32) {
    %c0_i32 = arith.constant 0 : i32
    return %arg0, %arg1 : i32, i32
  }
}

module attributes {stable_mosaic.version = 11 : i64} {
  func.func @_fused_matmul_kernel(%arg0: i32, %arg1: i32, %arg2: i32, %arg3: memref<32x128xbf16, #tpu.memory_space<vmem>>, %arg4: memref<128x128xbf16, #tpu.memory_space<vmem>>, %arg5: memref<1x128xf32, #tpu.memory_space<vmem>>, %arg6: memref<1x128xf32, #tpu.memory_space<vmem>>, %arg7: memref<32x128xbf16, #tpu.memory_space<vmem>>, %arg8: memref<32x128xf32, #tpu.memory_space<vmem>>) attributes {dimension_semantics = [#tpu.dimension_semantics<parallel>, #tpu.dimension_semantics<parallel>, #tpu.dimension_semantics<arbitrary>], iteration_bounds = array<i64: 1, 1, 1>, scalar_prefetch = 0 : i64, scratch_operands = 1 : i64, tpu.core_type = #tpu.core_type<tc>, window_params = [{transform_indices = @transform_0, window_bounds = array<i64: 32, 128>}, {transform_indices = @transform_1, window_bounds = array<i64: 128, 128>}, {transform_indices = @transform_2, window_bounds = array<i64: 1, 128>}, {transform_indices = @transform_3, window_bounds = array<i64: 1, 128>}, {transform_indices = @transform_4, window_bounds = array<i64: 32, 128>}]} {
    %c0_i32 = arith.constant 0 : i32
    %0 = arith.cmpi eq, %arg2, %c0_i32 : i32
    %1 = arith.extui %0 : i1 to i32
    %c0_i32_0 = arith.constant 0 : i32
    %2 = arith.cmpi ne, %1, %c0_i32_0 : i32
    scf.if %2 {
      %cst_10 = arith.constant 0.000000e+00 : f32
      %12 = vector.broadcast %cst_10 : f32 to vector<32x128xf32>
      %c0_11 = arith.constant 0 : index
      %c0_12 = arith.constant 0 : index
      %13 = vector.load %arg8[%c0_11, %c0_12] : memref<32x128xf32, #tpu.memory_space<vmem>>, vector<32x128xf32>
      tpu.vector_store %arg8[%c0_11, %c0_12], %12 {strides = array<i32>} : memref<32x128xf32, #tpu.memory_space<vmem>>, vector<32x128xf32>,
    } else {
    }
    %c0 = arith.constant 0 : index
    %c0_1 = arith.constant 0 : index
    %3 = vector.load %arg8[%c0, %c0_1] : memref<32x128xf32, #tpu.memory_space<vmem>>, vector<32x128xf32>
    %c0_2 = arith.constant 0 : index
    %c0_3 = arith.constant 0 : index
    %4 = vector.load %arg3[%c0_2, %c0_3] : memref<32x128xbf16, #tpu.memory_space<vmem>>, vector<32x128xbf16>
    %c0_4 = arith.constant 0 : index
    %c0_5 = arith.constant 0 : index
    %5 = vector.load %arg4[%c0_4, %c0_5] : memref<128x128xbf16, #tpu.memory_space<vmem>>, vector<128x128xbf16>
    %cst = arith.constant dense<0.000000e+00> : vector<32x128xf32>
    %6 = tpu.matmul %4, %5, %cst {dimension_numbers = #tpu.dot_dimension_numbers<[1], [0], [0], [1], [0, 0, 1, 1], [], []>} : vector<32x128xbf16>, vector<128x128xbf16>, vector<32x128xf32> -> vector<32x128xf32>
    %7 = arith.addf %3, %6 : vector<32x128xf32>
    %c0_6 = arith.constant 0 : index
    %c0_7 = arith.constant 0 : index
    %8 = vector.load %arg8[%c0_6, %c0_7] : memref<32x128xf32, #tpu.memory_space<vmem>>, vector<32x128xf32>
    tpu.vector_store %arg8[%c0_6, %c0_7], %7 {strides = array<i32>} : memref<32x128xf32, #tpu.memory_space<vmem>>, vector<32x128xf32>,
    %c0_i32_8 = arith.constant 0 : i32
    %9 = arith.cmpi eq, %arg2, %c0_i32_8 : i32
    %10 = arith.extui %9 : i1 to i32
    %c0_i32_9 = arith.constant 0 : i32
    %11 = arith.cmpi ne, %10, %c0_i32_9 : i32
    scf.if %11 {
      %c0_10 = arith.constant 0 : index
      %c0_11 = arith.constant 0 : index
      %12 = vector.load %arg8[%c0_10, %c0_11] : memref<32x128xf32, #tpu.memory_space<vmem>>, vector<32x128xf32>
      %c0_12 = arith.constant 0 : index
      %c0_13 = arith.constant 0 : index
      %13 = vector.load %arg5[%c0_12, %c0_13] : memref<1x128xf32, #tpu.memory_space<vmem>>, vector<1x128xf32>
      %14 = vector.broadcast %13 : vector<1x128xf32> to vector<32x128xf32>
      %15 = arith.mulf %12, %14 : vector<32x128xf32>
      %c0_14 = arith.constant 0 : index
      %c0_15 = arith.constant 0 : index
      %16 = vector.load %arg6[%c0_14, %c0_15] : memref<1x128xf32, #tpu.memory_space<vmem>>, vector<1x128xf32>
      %17 = vector.broadcast %16 : vector<1x128xf32> to vector<32x128xf32>
      %18 = arith.addf %15, %17 : vector<32x128xf32>
      %cst_16 = arith.constant 0.000000e+00 : f32
      %19 = vector.broadcast %cst_16 : f32 to vector<32x128xf32>
      %20 = arith.subf %19, %18 : vector<32x128xf32>
      %21 = math.exp %20 : vector<32x128xf32>
      %cst_17 = arith.constant 1.000000e+00 : f32
      %22 = vector.broadcast %cst_17 : f32 to vector<32x128xf32>
      %23 = arith.addf %22, %21 : vector<32x128xf32>
      %24 = tpu.reciprocal %23 {approx = true} : vector<32x128xf32> -> vector<32x128xf32>
      %25 = arith.mulf %18, %24 : vector<32x128xf32>
      %26 = arith.truncf %25 : vector<32x128xf32> to vector<32x128xbf16>
      %c0_18 = arith.constant 0 : index
      %c0_19 = arith.constant 0 : index
      %27 = vector.load %arg7[%c0_18, %c0_19] : memref<32x128xbf16, #tpu.memory_space<vmem>>, vector<32x128xbf16>
      tpu.vector_store %arg7[%c0_18, %c0_19], %26 {strides = array<i32>} : memref<32x128xbf16, #tpu.memory_space<vmem>>, vector<32x128xbf16>,
    } else {
    }
    return
  }
  func.func @transform_0(%arg0: i32, %arg1: i32, %arg2: i32) -> (i32, i32) {
    %c0_i32 = arith.constant 0 : i32
    return %arg0, %arg2 : i32, i32
  }
  func.func @transform_1(%arg0: i32, %arg1: i32, %arg2: i32) -> (i32, i32) {
    %c0_i32 = arith.constant 0 : i32
    return %arg2, %arg1 : i32, i32
  }
  func.func @transform_2(%arg0: i32, %arg1: i32, %arg2: i32) -> (i32, i32) {
    %c0_i32 = arith.constant 0 : i32
    %c0_i32_0 = arith.constant 0 : i32
    return %c0_i32, %arg1 : i32, i32
  }
  func.func @transform_3(%arg0: i32, %arg1: i32, %arg2: i32) -> (i32, i32) {
    %c0_i32 = arith.constant 0 : i32
    %c0_i32_0 = arith.constant 0 : i32
    return %c0_i32, %arg1 : i32, i32
  }
  func.func @transform_4(%arg0: i32, %arg1: i32, %arg2: i32) -> (i32, i32) {
    %c0_i32 = arith.constant 0 : i32
    return %arg0, %arg1 : i32, i32
  }
}

module attributes {stable_mosaic.version = 11 : i64} {
  func.func @_fused_matmul_kernel(%arg0: i32, %arg1: i32, %arg2: i32, %arg3: memref<8x768xbf16, #tpu.memory_space<vmem>>, %arg4: memref<768x128xbf16, #tpu.memory_space<vmem>>, %arg5: memref<1x128xf32, #tpu.memory_space<vmem>>, %arg6: memref<1x128xf32, #tpu.memory_space<vmem>>, %arg7: memref<8x128xbf16, #tpu.memory_space<vmem>>, %arg8: memref<8x128xf32, #tpu.memory_space<vmem>>) attributes {dimension_semantics = [#tpu.dimension_semantics<parallel>, #tpu.dimension_semantics<parallel>, #tpu.dimension_semantics<arbitrary>], iteration_bounds = array<i64: 1, 1, 1>, scalar_prefetch = 0 : i64, scratch_operands = 1 : i64, tpu.core_type = #tpu.core_type<tc>, window_params = [{transform_indices = @transform_0, window_bounds = array<i64: 8, 768>}, {transform_indices = @transform_1, window_bounds = array<i64: 768, 128>}, {transform_indices = @transform_2, window_bounds = array<i64: 1, 128>}, {transform_indices = @transform_3, window_bounds = array<i64: 1, 128>}, {transform_indices = @transform_4, window_bounds = array<i64: 8, 128>}]} {
    %c0_i32 = arith.constant 0 : i32
    %0 = arith.cmpi eq, %arg2, %c0_i32 : i32
    %1 = arith.extui %0 : i1 to i32
    %c0_i32_0 = arith.constant 0 : i32
    %2 = arith.cmpi ne, %1, %c0_i32_0 : i32
    scf.if %2 {
      %cst_10 = arith.constant 0.000000e+00 : f32
      %12 = vector.broadcast %cst_10 : f32 to vector<8x128xf32>
      %c0_11 = arith.constant 0 : index
      %c0_12 = arith.constant 0 : index
      %13 = vector.load %arg8[%c0_11, %c0_12] : memref<8x128xf32, #tpu.memory_space<vmem>>, vector<8x128xf32>
      tpu.vector_store %arg8[%c0_11, %c0_12], %12 {strides = array<i32>} : memref<8x128xf32, #tpu.memory_space<vmem>>, vector<8x128xf32>,
    } else {
    }
    %c0 = arith.constant 0 : index
    %c0_1 = arith.constant 0 : index
    %3 = vector.load %arg8[%c0, %c0_1] : memref<8x128xf32, #tpu.memory_space<vmem>>, vector<8x128xf32>
    %c0_2 = arith.constant 0 : index
    %c0_3 = arith.constant 0 : index
    %4 = vector.load %arg3[%c0_2, %c0_3] : memref<8x768xbf16, #tpu.memory_space<vmem>>, vector<8x768xbf16>
    %c0_4 = arith.constant 0 : index
    %c0_5 = arith.constant 0 : index
    %5 = vector.load %arg4[%c0_4, %c0_5] : memref<768x128xbf16, #tpu.memory_space<vmem>>, vector<768x128xbf16>
    %cst = arith.constant dense<0.000000e+00> : vector<8x128xf32>
    %6 = tpu.matmul %4, %5, %cst {dimension_numbers = #tpu.dot_dimension_numbers<[1], [0], [0], [1], [0, 0, 1, 1], [], []>} : vector<8x768xbf16>, vector<768x128xbf16>, vector<8x128xf32> -> vector<8x128xf32>
    %7 = arith.addf %3, %6 : vector<8x128xf32>
    %c0_6 = arith.constant 0 : index
    %c0_7 = arith.constant 0 : index
    %8 = vector.load %arg8[%c0_6, %c0_7] : memref<8x128xf32, #tpu.memory_space<vmem>>, vector<8x128xf32>
    tpu.vector_store %arg8[%c0_6, %c0_7], %7 {strides = array<i32>} : memref<8x128xf32, #tpu.memory_space<vmem>>, vector<8x128xf32>,
    %c0_i32_8 = arith.constant 0 : i32
    %9 = arith.cmpi eq, %arg2, %c0_i32_8 : i32
    %10 = arith.extui %9 : i1 to i32
    %c0_i32_9 = arith.constant 0 : i32
    %11 = arith.cmpi ne, %10, %c0_i32_9 : i32
    scf.if %11 {
      %c0_10 = arith.constant 0 : index
      %c0_11 = arith.constant 0 : index
      %12 = vector.load %arg8[%c0_10, %c0_11] : memref<8x128xf32, #tpu.memory_space<vmem>>, vector<8x128xf32>
      %c0_12 = arith.constant 0 : index
      %c0_13 = arith.constant 0 : index
      %13 = vector.load %arg5[%c0_12, %c0_13] : memref<1x128xf32, #tpu.memory_space<vmem>>, vector<1x128xf32>
      %14 = vector.broadcast %13 : vector<1x128xf32> to vector<8x128xf32>
      %15 = arith.mulf %12, %14 : vector<8x128xf32>
      %c0_14 = arith.constant 0 : index
      %c0_15 = arith.constant 0 : index
      %16 = vector.load %arg6[%c0_14, %c0_15] : memref<1x128xf32, #tpu.memory_space<vmem>>, vector<1x128xf32>
      %17 = vector.broadcast %16 : vector<1x128xf32> to vector<8x128xf32>
      %18 = arith.addf %15, %17 : vector<8x128xf32>
      %19 = arith.truncf %18 : vector<8x128xf32> to vector<8x128xbf16>
      %c0_16 = arith.constant 0 : index
      %c0_17 = arith.constant 0 : index
      %20 = vector.load %arg7[%c0_16, %c0_17] : memref<8x128xbf16, #tpu.memory_space<vmem>>, vector<8x128xbf16>
      tpu.vector_store %arg7[%c0_16, %c0_17], %19 {strides = array<i32>} : memref<8x128xbf16, #tpu.memory_space<vmem>>, vector<8x128xbf16>,
    } else {
    }
    return
  }
  func.func @transform_0(%arg0: i32, %arg1: i32, %arg2: i32) -> (i32, i32) {
    %c0_i32 = arith.constant 0 : i32
    return %arg0, %arg2 : i32, i32
  }
  func.func @transform_1(%arg0: i32, %arg1: i32, %arg2: i32) -> (i32, i32) {
    %c0_i32 = arith.constant 0 : i32
    return %arg2, %arg1 : i32, i32
  }
  func.func @transform_2(%arg0: i32, %arg1: i32, %arg2: i32) -> (i32, i32) {
    %c0_i32 = arith.constant 0 : i32
    %c0_i32_0 = arith.constant 0 : i32
    return %c0_i32, %arg1 : i32, i32
  }
  func.func @transform_3(%arg0: i32, %arg1: i32, %arg2: i32) -> (i32, i32) {
    %c0_i32 = arith.constant 0 : i32
    %c0_i32_0 = arith.constant 0 : i32
    return %c0_i32, %arg1 : i32, i32
  }
  func.func @transform_4(%arg0: i32, %arg1: i32, %arg2: i32) -> (i32, i32) {
    %c0_i32 = arith.constant 0 : i32
    return %arg0, %arg1 : i32, i32
  }
}

module attributes {stable_mosaic.version = 11 : i64} {
  func.func @_mlp_head_kernel(%arg0: memref<8x128xbf16, #tpu.memory_space<vmem>>, %arg1: memref<128x128xbf16, #tpu.memory_space<vmem>>, %arg2: memref<1x128xf32, #tpu.memory_space<vmem>>, %arg3: memref<128x128xbf16, #tpu.memory_space<vmem>>, %arg4: memref<1x128xf32, #tpu.memory_space<vmem>>, %arg5: memref<128x128xbf16, #tpu.memory_space<vmem>>, %arg6: memref<1x128xf32, #tpu.memory_space<vmem>>, %arg7: memref<8x128xf32, #tpu.memory_space<vmem>>) attributes {dimension_semantics = [], scalar_prefetch = 0 : i64, scratch_operands = 0 : i64, tpu.core_type = #tpu.core_type<tc>} {
    %c0 = arith.constant 0 : index
    %c0_0 = arith.constant 0 : index
    %0 = vector.load %arg0[%c0, %c0_0] : memref<8x128xbf16, #tpu.memory_space<vmem>>, vector<8x128xbf16>
    %c0_1 = arith.constant 0 : index
    %c0_2 = arith.constant 0 : index
    %1 = vector.load %arg1[%c0_1, %c0_2] : memref<128x128xbf16, #tpu.memory_space<vmem>>, vector<128x128xbf16>
    %cst = arith.constant dense<0.000000e+00> : vector<8x128xf32>
    %2 = tpu.matmul %0, %1, %cst {dimension_numbers = #tpu.dot_dimension_numbers<[1], [0], [0], [1], [0, 0, 1, 1], [], []>} : vector<8x128xbf16>, vector<128x128xbf16>, vector<8x128xf32> -> vector<8x128xf32>
    %c0_3 = arith.constant 0 : index
    %c0_4 = arith.constant 0 : index
    %3 = vector.load %arg2[%c0_3, %c0_4] : memref<1x128xf32, #tpu.memory_space<vmem>>, vector<1x128xf32>
    %4 = vector.broadcast %3 : vector<1x128xf32> to vector<8x128xf32>
    %5 = arith.addf %2, %4 : vector<8x128xf32>
    %cst_5 = arith.constant 0.000000e+00 : f32
    %6 = vector.broadcast %cst_5 : f32 to vector<8x128xf32>
    %7 = arith.subf %6, %5 : vector<8x128xf32>
    %8 = math.exp %7 : vector<8x128xf32>
    %cst_6 = arith.constant 1.000000e+00 : f32
    %9 = vector.broadcast %cst_6 : f32 to vector<8x128xf32>
    %10 = arith.addf %9, %8 : vector<8x128xf32>
    %11 = tpu.reciprocal %10 {approx = true} : vector<8x128xf32> -> vector<8x128xf32>
    %12 = arith.mulf %5, %11 : vector<8x128xf32>
    %13 = arith.truncf %12 : vector<8x128xf32> to vector<8x128xbf16>
    %c0_7 = arith.constant 0 : index
    %c0_8 = arith.constant 0 : index
    %14 = vector.load %arg3[%c0_7, %c0_8] : memref<128x128xbf16, #tpu.memory_space<vmem>>, vector<128x128xbf16>
    %cst_9 = arith.constant dense<0.000000e+00> : vector<8x128xf32>
    %15 = tpu.matmul %13, %14, %cst_9 {dimension_numbers = #tpu.dot_dimension_numbers<[1], [0], [0], [1], [0, 0, 1, 1], [], []>} : vector<8x128xbf16>, vector<128x128xbf16>, vector<8x128xf32> -> vector<8x128xf32>
    %c0_10 = arith.constant 0 : index
    %c0_11 = arith.constant 0 : index
    %16 = vector.load %arg4[%c0_10, %c0_11] : memref<1x128xf32, #tpu.memory_space<vmem>>, vector<1x128xf32>
    %17 = vector.broadcast %16 : vector<1x128xf32> to vector<8x128xf32>
    %18 = arith.addf %15, %17 : vector<8x128xf32>
    %cst_12 = arith.constant 0.000000e+00 : f32
    %19 = vector.broadcast %cst_12 : f32 to vector<8x128xf32>
    %20 = arith.subf %19, %18 : vector<8x128xf32>
    %21 = math.exp %20 : vector<8x128xf32>
    %cst_13 = arith.constant 1.000000e+00 : f32
    %22 = vector.broadcast %cst_13 : f32 to vector<8x128xf32>
    %23 = arith.addf %22, %21 : vector<8x128xf32>
    %24 = tpu.reciprocal %23 {approx = true} : vector<8x128xf32> -> vector<8x128xf32>
    %25 = arith.mulf %18, %24 : vector<8x128xf32>
    %26 = arith.truncf %25 : vector<8x128xf32> to vector<8x128xbf16>
    %c0_14 = arith.constant 0 : index
    %c0_15 = arith.constant 0 : index
    %27 = vector.load %arg5[%c0_14, %c0_15] : memref<128x128xbf16, #tpu.memory_space<vmem>>, vector<128x128xbf16>
    %cst_16 = arith.constant dense<0.000000e+00> : vector<8x128xf32>
    %28 = tpu.matmul %26, %27, %cst_16 {dimension_numbers = #tpu.dot_dimension_numbers<[1], [0], [0], [1], [0, 0, 1, 1], [], []>} : vector<8x128xbf16>, vector<128x128xbf16>, vector<8x128xf32> -> vector<8x128xf32>
    %c0_17 = arith.constant 0 : index
    %c0_18 = arith.constant 0 : index
    %29 = vector.load %arg6[%c0_17, %c0_18] : memref<1x128xf32, #tpu.memory_space<vmem>>, vector<1x128xf32>
    %30 = vector.broadcast %29 : vector<1x128xf32> to vector<8x128xf32>
    %31 = arith.addf %28, %30 : vector<8x128xf32>
    %c0_19 = arith.constant 0 : index
    %c0_20 = arith.constant 0 : index
    %32 = vector.load %arg7[%c0_19, %c0_20] : memref<8x128xf32, #tpu.memory_space<vmem>>, vector<8x128xf32>
    tpu.vector_store %arg7[%c0_19, %c0_20], %31 {strides = array<i32>} : memref<8x128xf32, #tpu.memory_space<vmem>>, vector<8x128xf32>,
    return
  }
}

module attributes {stable_mosaic.version = 11 : i64} {
  func.func @_fused_matmul_kernel(%arg0: i32, %arg1: i32, %arg2: i32, %arg3: memref<8x128xbf16, #tpu.memory_space<vmem>>, %arg4: memref<128x128xbf16, #tpu.memory_space<vmem>>, %arg5: memref<1x128xf32, #tpu.memory_space<vmem>>, %arg6: memref<1x128xf32, #tpu.memory_space<vmem>>, %arg7: memref<8x128xf32, #tpu.memory_space<vmem>>, %arg8: memref<8x128xf32, #tpu.memory_space<vmem>>) attributes {dimension_semantics = [#tpu.dimension_semantics<parallel>, #tpu.dimension_semantics<parallel>, #tpu.dimension_semantics<arbitrary>], iteration_bounds = array<i64: 1, 1, 1>, scalar_prefetch = 0 : i64, scratch_operands = 1 : i64, tpu.core_type = #tpu.core_type<tc>, window_params = [{transform_indices = @transform_0, window_bounds = array<i64: 8, 128>}, {transform_indices = @transform_1, window_bounds = array<i64: 128, 128>}, {transform_indices = @transform_2, window_bounds = array<i64: 1, 128>}, {transform_indices = @transform_3, window_bounds = array<i64: 1, 128>}, {transform_indices = @transform_4, window_bounds = array<i64: 8, 128>}]} {
    %c0_i32 = arith.constant 0 : i32
    %0 = arith.cmpi eq, %arg2, %c0_i32 : i32
    %1 = arith.extui %0 : i1 to i32
    %c0_i32_0 = arith.constant 0 : i32
    %2 = arith.cmpi ne, %1, %c0_i32_0 : i32
    scf.if %2 {
      %cst_10 = arith.constant 0.000000e+00 : f32
      %12 = vector.broadcast %cst_10 : f32 to vector<8x128xf32>
      %c0_11 = arith.constant 0 : index
      %c0_12 = arith.constant 0 : index
      %13 = vector.load %arg8[%c0_11, %c0_12] : memref<8x128xf32, #tpu.memory_space<vmem>>, vector<8x128xf32>
      tpu.vector_store %arg8[%c0_11, %c0_12], %12 {strides = array<i32>} : memref<8x128xf32, #tpu.memory_space<vmem>>, vector<8x128xf32>,
    } else {
    }
    %c0 = arith.constant 0 : index
    %c0_1 = arith.constant 0 : index
    %3 = vector.load %arg8[%c0, %c0_1] : memref<8x128xf32, #tpu.memory_space<vmem>>, vector<8x128xf32>
    %c0_2 = arith.constant 0 : index
    %c0_3 = arith.constant 0 : index
    %4 = vector.load %arg3[%c0_2, %c0_3] : memref<8x128xbf16, #tpu.memory_space<vmem>>, vector<8x128xbf16>
    %c0_4 = arith.constant 0 : index
    %c0_5 = arith.constant 0 : index
    %5 = vector.load %arg4[%c0_4, %c0_5] : memref<128x128xbf16, #tpu.memory_space<vmem>>, vector<128x128xbf16>
    %cst = arith.constant dense<0.000000e+00> : vector<8x128xf32>
    %6 = tpu.matmul %4, %5, %cst {dimension_numbers = #tpu.dot_dimension_numbers<[1], [0], [0], [1], [0, 0, 1, 1], [], []>} : vector<8x128xbf16>, vector<128x128xbf16>, vector<8x128xf32> -> vector<8x128xf32>
    %7 = arith.addf %3, %6 : vector<8x128xf32>
    %c0_6 = arith.constant 0 : index
    %c0_7 = arith.constant 0 : index
    %8 = vector.load %arg8[%c0_6, %c0_7] : memref<8x128xf32, #tpu.memory_space<vmem>>, vector<8x128xf32>
    tpu.vector_store %arg8[%c0_6, %c0_7], %7 {strides = array<i32>} : memref<8x128xf32, #tpu.memory_space<vmem>>, vector<8x128xf32>,
    %c0_i32_8 = arith.constant 0 : i32
    %9 = arith.cmpi eq, %arg2, %c0_i32_8 : i32
    %10 = arith.extui %9 : i1 to i32
    %c0_i32_9 = arith.constant 0 : i32
    %11 = arith.cmpi ne, %10, %c0_i32_9 : i32
    scf.if %11 {
      %c0_10 = arith.constant 0 : index
      %c0_11 = arith.constant 0 : index
      %12 = vector.load %arg8[%c0_10, %c0_11] : memref<8x128xf32, #tpu.memory_space<vmem>>, vector<8x128xf32>
      %c0_12 = arith.constant 0 : index
      %c0_13 = arith.constant 0 : index
      %13 = vector.load %arg5[%c0_12, %c0_13] : memref<1x128xf32, #tpu.memory_space<vmem>>, vector<1x128xf32>
      %14 = vector.broadcast %13 : vector<1x128xf32> to vector<8x128xf32>
      %15 = arith.mulf %12, %14 : vector<8x128xf32>
      %c0_14 = arith.constant 0 : index
      %c0_15 = arith.constant 0 : index
      %16 = vector.load %arg6[%c0_14, %c0_15] : memref<1x128xf32, #tpu.memory_space<vmem>>, vector<1x128xf32>
      %17 = vector.broadcast %16 : vector<1x128xf32> to vector<8x128xf32>
      %18 = arith.addf %15, %17 : vector<8x128xf32>
      %cst_16 = arith.constant 0.000000e+00 : f32
      %19 = vector.broadcast %cst_16 : f32 to vector<8x128xf32>
      %20 = arith.subf %19, %18 : vector<8x128xf32>
      %21 = math.exp %20 : vector<8x128xf32>
      %cst_17 = arith.constant 1.000000e+00 : f32
      %22 = vector.broadcast %cst_17 : f32 to vector<8x128xf32>
      %23 = arith.addf %22, %21 : vector<8x128xf32>
      %24 = tpu.reciprocal %23 {approx = true} : vector<8x128xf32> -> vector<8x128xf32>
      %c0_18 = arith.constant 0 : index
      %c0_19 = arith.constant 0 : index
      %25 = vector.load %arg7[%c0_18, %c0_19] : memref<8x128xf32, #tpu.memory_space<vmem>>, vector<8x128xf32>
      tpu.vector_store %arg7[%c0_18, %c0_19], %24 {strides = array<i32>} : memref<8x128xf32, #tpu.memory_space<vmem>>, vector<8x128xf32>,
    } else {
    }
    return
  }
  func.func @transform_0(%arg0: i32, %arg1: i32, %arg2: i32) -> (i32, i32) {
    %c0_i32 = arith.constant 0 : i32
    return %arg0, %arg2 : i32, i32
  }
  func.func @transform_1(%arg0: i32, %arg1: i32, %arg2: i32) -> (i32, i32) {
    %c0_i32 = arith.constant 0 : i32
    return %arg2, %arg1 : i32, i32
  }
  func.func @transform_2(%arg0: i32, %arg1: i32, %arg2: i32) -> (i32, i32) {
    %c0_i32 = arith.constant 0 : i32
    %c0_i32_0 = arith.constant 0 : i32
    return %c0_i32, %arg1 : i32, i32
  }
  func.func @transform_3(%arg0: i32, %arg1: i32, %arg2: i32) -> (i32, i32) {
    %c0_i32 = arith.constant 0 : i32
    %c0_i32_0 = arith.constant 0 : i32
    return %c0_i32, %arg1 : i32, i32
  }
  func.func @transform_4(%arg0: i32, %arg1: i32, %arg2: i32) -> (i32, i32) {
    %c0_i32 = arith.constant 0 : i32
    return %arg0, %arg1 : i32, i32
  }
}

</mosaic_0001>

<bundles_post_ra>
// kernel: genconvit_vae_forward.16
= control target key start
LH: loop header
LB: loop body
LE: loop exit
PB: predicated region body
PF: predicated region fallthrough
CT: control target
= control target key end

     0   :  { %s1000_s1 = inlined_call_operand.vmem [shape: bf16[128,128], index: 1, kind: input, shape index: {}]   ;;  %s1001_s0 = inlined_call_operand.vmem [shape: bf16[128,128], index: 0, kind: input, shape index: {}]   ;;  %s1002_s2 = inlined_call_operand.vmem [shape: f32[1,128], index: 2, kind: input, shape index: {}]   ;;  %s1003_s3 = inlined_call_operand.vmem [shape: f32[1,128], index: 3, kind: input, shape index: {}]   ;;  %s1004_s4 = inlined_call_operand.vmem [shape: bf16[128,128], index: 4, kind: output, shape index: {}]  }
   0x1   :  { %v717_v0 = vld [vmem:[%s1000_s1] sm:$0xff]   ;;  %v718_v1 = vld [vmem:[%s1000_s1 + $0x8] sm:$0xff]   ;;  %v719_v2 = vld [vmem:[%s1000_s1 + $0x10] sm:$0xff]  }
   0x2   :  { %669 = vmatprep.subr.bf16.mxu0 %v717_v0  ;;  %701 = vmatprep.subr.bf16.mxu1 %v717_v0  ;;  %v720_v3 = vld [vmem:[%s1000_s1 + $0x18] sm:$0xff]   ;;  %v725_v4 = vld [vmem:[%s1001_s0] sm:$0xff]   ;;  %v722_v7 = vld [vmem:[%s1000_s1 + $0x28] sm:$0xff]  }
   0x3   :  { %670 = vmatpush3.bf16.msra.mxu0 %v717_v0  ;;  %709 = vmatpush3.bf16.msra.mxu1 %v717_v0  ;;  %v726_v5 = vld [vmem:[%s1001_s0 + $0x20] sm:$0xff]   ;;  %v723_v8 = vld [vmem:[%s1000_s1 + $0x30] sm:$0xff]   ;;  %v724_v9 = vld [vmem:[%s1000_s1 + $0x38] sm:$0xff]  }
   0x4   :  { %671 = vmatprep.subr.bf16.mxu0 %v718_v1  ;;  %702 = vmatprep.subr.bf16.mxu1 %v718_v1  ;;  %v721_v6 = vld [vmem:[%s1000_s1 + $0x20] sm:$0xff]   ;;  %v727_v10 = vld [vmem:[%s1001_s0 + $0x8] sm:$0xff]   ;;  %v729_v12 = vld [vmem:[%s1001_s0 + $0x10] sm:$0xff]  }
   0x5   :  { %685 = vmatprep.mubr.bf16.mxu0 %v725_v4  ;;  %693 = vmatprep.mubr.bf16.mxu1 %v726_v5  ;;  %v728_v11 = vld [vmem:[%s1001_s0 + $0x28] sm:$0xff]   ;;  %v730_v13 = vld [vmem:[%s1001_s0 + $0x30] sm:$0xff]   ;;  %v731_v14 = vld [vmem:[%s1001_s0 + $0x18] sm:$0xff]  }
   0x6   :  { %v732_v15 = vld [vmem:[%s1001_s0 + $0x38] sm:$0xff]   ;;  %v873_v16 = vld [vmem:[%s1002_s2] ss:$0 sm:$0xff] }
   0x7   :  { %672 = vmatpush3.bf16.msra.mxu0 %v718_v1  ;;  %710 = vmatpush3.bf16.msra.mxu1 %v718_v1  ;;  %v878_v18 = vld [vmem:[%s1003_s3] ss:$0 sm:$0xff] }
   0x8   :  { %673 = vmatprep.subr.bf16.mxu0 %v719_v2  ;;  %703 = vmatprep.subr.bf16.mxu1 %v719_v2 }
   0xb   :  { %674 = vmatpush3.bf16.msra.mxu0 %v719_v2  ;;  %711 = vmatpush3.bf16.msra.mxu1 %v719_v2 }
   0xc   :  { %675 = vmatprep.subr.bf16.mxu0 %v720_v3  ;;  %704 = vmatprep.subr.bf16.mxu1 %v720_v3 }
   0xf   :  { %676 = vmatpush3.bf16.msra.mxu0 %v720_v3  ;;  %712 = vmatpush3.bf16.msra.mxu1 %v720_v3 }
  0x10   :  { %677 = vmatprep.subr.bf16.mxu0 %v721_v6  ;;  %705 = vmatprep.subr.bf16.mxu1 %v721_v6 }
  0x13   :  { %678 = vmatpush3.bf16.msra.mxu0 %v721_v6  ;;  %713 = vmatpush3.bf16.msra.mxu1 %v721_v6 }
  0x14   :  { %679 = vmatprep.subr.bf16.mxu0 %v722_v7  ;;  %706 = vmatprep.subr.bf16.mxu1 %v722_v7 }
  0x17   :  { %680 = vmatpush3.bf16.msra.mxu0 %v722_v7  ;;  %714 = vmatpush3.bf16.msra.mxu1 %v722_v7 }
  0x18   :  { %681 = vmatprep.subr.bf16.mxu0 %v723_v8  ;;  %707 = vmatprep.subr.bf16.mxu1 %v723_v8 }
  0x1b   :  { %682 = vmatpush3.bf16.msra.mxu0 %v723_v8  ;;  %715 = vmatpush3.bf16.msra.mxu1 %v723_v8 }
  0x1c   :  { %683 = vmatprep.subr.bf16.mxu0 %v724_v9  ;;  %708 = vmatprep.subr.bf16.mxu1 %v724_v9 }
  0x1f   :  { %684 = vmatpush3.bf16.msra.mxu0 %v724_v9  ;;  %716 = vmatpush3.bf16.msra.mxu1 %v724_v9 }
  0x22   :  { %686 = vmatmul.mubr.bf16.vlgmr.msra.gmra.mrb[0].mxu0 %v727_v10  ;;  %694 = vmatmul.mubr.bf16.vlgmr.msra.gmra.mrb[0].mxu1 %v728_v11 }
  0x23   :  { %689 = vmatprep.mubr.bf16.mxu0 %v729_v12  ;;  %697 = vmatprep.mubr.bf16.mxu1 %v730_v13 }
  0x2a   :  { %690 = vmatmul.mubr.bf16.gmra.mrb[4].mxu0 %v731_v14  ;;  %698 = vmatmul.mubr.bf16.gmra.mrb[4].mxu1 %v732_v15 }
  0xf5   :  { %v687_v17 = vpop.f32.mrb[0].mxu0  ;;  %v695_v19 = vpop.f32.mrb[0].mxu1 }
  0xf6   :  { %v339_v20 = vmul.f32 %v687_v17, %v873_v16  ;;  %v347_v21 = vmul.f32 %v695_v19, %v873_v16  ;;  %v216_v22 = vpop.f32.mrb[1].mxu0  ;;  %v248_v23 = vpop.f32.mrb[1].mxu1 }
  0xf7   :  { %v337_v24 = vmul.f32 %v873_v16, %v216_v22  ;;  %v345_v25 = vmul.f32 %v873_v16, %v248_v23  ;;  %v688_v26 = vpop.f32.mrb[2].mxu0  ;;  %v696_v27 = vpop.f32.mrb[2].mxu1 }
  0xf8   :  { %v885_v28 = vadd.f32 %v878_v18, %v339_v20  ;;  %v888_v29 = vadd.f32 %v878_v18, %v347_v21  ;;  %v340_v30 = vmul.f32 %v688_v26, %v873_v16  ;;  %v348_v31 = vmul.f32 %v696_v27, %v873_v16  ;;  %v219_v32 = vpop.f32.mrb[3].mxu0  ;;  %v251_v33 = vpop.f32.mrb[3].mxu1 }
  0xf9   :  { %v893_v34 = vadd.f32 %v878_v18, %v337_v24  ;;  %v896_v35 = vadd.f32 %v878_v18, %v345_v25  ;;  %v338_v36 = vmul.f32 %v873_v16, %v219_v32  ;;  %v346_v37 = vmul.f32 %v873_v16, %v251_v33 }
  0xfa   :  { %v378_v38 = vsub.f32 0.0, %v885_v28  ;;  %v386_v39 = vsub.f32 0.0, %v888_v29  ;;  %v903_v40 = vadd.f32 %v878_v18, %v340_v30  ;;  %v906_v41 = vadd.f32 %v878_v18, %v348_v31 }
  0xfb   :  { %v376_v42 = vsub.f32 0.0, %v893_v34  ;;  %v384_v43 = vsub.f32 0.0, %v896_v35  ;;  %v911_v44 = vadd.f32 %v878_v18, %v338_v36  ;;  %v914_v45 = vadd.f32 %v878_v18, %v346_v37 }
  0xfc   :  { %v396_v46 = vmul.f32 1.442695, %v378_v38  ;;  %v412_v47 = vmul.f32 1.442695, %v386_v39  ;;  %v379_v48 = vsub.f32 0.0, %v903_v40  ;;  %v387_v49 = vsub.f32 0.0, %v906_v41 }
  0xfd   :  { %v392_v50 = vmul.f32 1.442695, %v376_v42  ;;  %v408_v51 = vmul.f32 1.442695, %v384_v43  ;;  %v377_v52 = vsub.f32 0.0, %v911_v44  ;;  %v385_v53 = vsub.f32 0.0, %v914_v45 }
  0xfe   :  { %733 = vpow2.f32 %v396_v46  ;;  %v398_v54 = vmul.f32 1.442695, %v379_v48  ;;  %v691_v55 = vpop.f32.mrb[4].mxu0  ;;  %v699_v56 = vpop.f32.mrb[4].mxu1  ;;  %v414_v57 = vmul.f32 1.442695, %v387_v49 }
  0xff   :  { %735 = vpow2.f32 %v412_v47  ;;  %v394_v58 = vmul.f32 1.442695, %v377_v52  ;;  %v343_v59 = vmul.f32 %v691_v55, %v873_v16  ;;  %v232_v60 = vpop.f32.mrb[5].mxu0  ;;  %v264_v61 = vpop.f32.mrb[5].mxu1  ;;  %v351_v62 = vmul.f32 %v699_v56, %v873_v16 }
 0x100   :  { %737 = vpow2.f32 %v392_v50  ;;  %v341_v63 = vmul.f32 %v873_v16, %v232_v60  ;;  %v349_v0 = vmul.f32 %v873_v16, %v264_v61  ;;  %v692_v1 = vpop.f32.mrb[6].mxu0  ;;  %v700_v2 = vpop.f32.mrb[6].mxu1  ;;  %v410_v3 = vmul.f32 1.442695, %v385_v53 }
 0x101   :  { %739 = vpow2.f32 %v408_v51  ;;  %v925_v4 = vadd.f32 %v878_v18, %v343_v59  ;;  %v235_v5 = vpop.f32.mrb[7].mxu0  ;;  %v267_v6 = vpop.f32.mrb[7].mxu1  ;;  %v928_v7 = vadd.f32 %v878_v18, %v351_v62  ;;  %v344_v11 = vmul.f32 %v692_v1, %v873_v16 }
 0x102   :  { %741 = vpow2.f32 %v398_v54  ;;  %v931_v8 = vadd.f32 %v878_v18, %v341_v63  ;;  %v934_v9 = vadd.f32 %v878_v18, %v349_v0  ;;  %v352_v23 = vmul.f32 %v700_v2, %v873_v16 }
 0x103   :  { %743 = vpow2.f32 %v414_v57  ;;  %v382_v10 = vsub.f32 0.0, %v925_v4  ;;  %v390_v12 = vsub.f32 0.0, %v928_v7  ;;  %v942_v21 = vadd.f32 %v878_v18, %v344_v11 }
 0x104   :  { %745 = vpow2.f32 %v394_v58  ;;  %v380_v13 = vsub.f32 0.0, %v931_v8  ;;  %v388_v14 = vsub.f32 0.0, %v934_v9  ;;  %v342_v26 = vmul.f32 %v873_v16, %v235_v5 }
 0x105   :  { %747 = vpow2.f32 %v410_v3  ;;  %v404_v15 = vmul.f32 1.442695, %v382_v10  ;;  %v420_v17 = vmul.f32 1.442695, %v390_v12  ;;  %v350_v31 = vmul.f32 %v873_v16, %v267_v6 }
 0x106   :  { %v400_v19 = vmul.f32 1.442695, %v380_v13  ;;  %v416_v20 = vmul.f32 1.442695, %v388_v14  ;;  %v383_v36 = vsub.f32 0.0, %v942_v21  ;;  %v949_v39 = vadd.f32 %v878_v18, %v352_v23 }
 0x107   :  { %749 = vpow2.f32 %v404_v15  ;;  %v952_v46 = vadd.f32 %v878_v18, %v342_v26  ;;  %v955_v48 = vadd.f32 %v878_v18, %v350_v31 }
 0x108   :  { %v734_v22 = vpop.eup %733  ;;  %751 = vpow2.f32 %v420_v17  ;;  %v406_v51 = vmul.f32 1.442695, %v383_v36  ;;  %v391_v53 = vsub.f32 0.0, %v949_v39 }
 0x109   :  { %v736_v24 = vpop.eup %735  ;;  %v426_v25 = vadd.f32 1.0, %v734_v22  ;;  %753 = vpow2.f32 %v400_v19  ;;  %v381_v55 = vsub.f32 0.0, %v952_v46  ;;  %v389_v57 = vsub.f32 0.0, %v955_v48 }
 0x10a   :  { %v738_v27 = vpop.eup %737  ;;  %v434_v30 = vadd.f32 1.0, %v736_v24  ;;  %755 = vpow2.f32 %v416_v20  ;;  %v422_v59 = vmul.f32 1.442695, %v391_v53 }
 0x10b   :  { %v740_v32 = vpop.eup %739  ;;  %757 = vrcp.f32 %v426_v25  ;;  %v424_v33 = vadd.f32 1.0, %v738_v27  ;;  %v402_v61 = vmul.f32 1.442695, %v381_v55  ;;  %v418_v63 = vmul.f32 1.442695, %v389_v57 }
 0x10c   :  { %v742_v37 = vpop.eup %741  ;;  %759 = vrcp.f32 %v434_v30  ;;  %v432_v38 = vadd.f32 1.0, %v740_v32 }
 0x10d   :  { %v744_v42 = vpop.eup %743  ;;  %761 = vrcp.f32 %v424_v33  ;;  %v427_v43 = vadd.f32 1.0, %v742_v37 }
 0x10e   :  { %v746_v47 = vpop.eup %745  ;;  %763 = vrcp.f32 %v432_v38  ;;  %v435_v16 = vadd.f32 1.0, %v744_v42 }
 0x10f   :  { %v748_v49 = vpop.eup %747  ;;  %765 = vrcp.f32 %v427_v43  ;;  %v425_v50 = vadd.f32 1.0, %v746_v47 }
 0x110   :  { %767 = vrcp.f32 %v435_v16  ;;  %v433_v52 = vadd.f32 1.0, %v748_v49 }
 0x111   :  { %v750_v54 = vpop.eup %749  ;;  %769 = vrcp.f32 %v425_v50 }
 0x112   :  { %v752_v56 = vpop.eup %751  ;;  %771 = vrcp.f32 %v433_v52  ;;  %v430_v10 = vadd.f32 1.0, %v750_v54 }
 0x113   :  { %v754_v58 = vpop.eup %753  ;;  %773 = vpow2.f32 %v406_v51 }
 0x114   :  { %v756_v18 = vpop.eup %755  ;;  %775 = vpow2.f32 %v422_v59 }
 0x115   :  { %v758_v60 = vpop.eup %757  ;;  %777 = vpow2.f32 %v402_v61 }
 0x116   :  { %v760_v62 = vpop.eup %759  ;;  %v458_v5 = vmul.f32 %v758_v60, %v885_v28  ;;  %779 = vpow2.f32 %v418_v63 }
 0x117   :  { %v762_v0 = vpop.eup %761  ;;  %v466_v12 = vmul.f32 %v760_v62, %v888_v29  ;;  %781 = vrcp.f32 %v430_v10  ;;  %v438_v29 = vadd.f32 1.0, %v752_v56 }
 0x118   :  { %v764_v1 = vpop.eup %763  ;;  %v456_v15 = vmul.f32 %v762_v0, %v893_v34 }
 0x119   :  { %v766_v2 = vpop.eup %765  ;;  %v464_v22 = vmul.f32 %v764_v1, %v896_v35  ;;  %v436_v35 = vadd.f32 1.0, %v756_v18 }
 0x11a   :  { %v768_v3 = vpop.eup %767  ;;  %v459_v6 = vmul.f32 %v766_v2, %v903_v40 }
 0x11b   :  { %v770_v11 = vpop.eup %769  ;;  %v467_v13 = vmul.f32 %v768_v3, %v906_v41 }
 0x11c   :  { %v772_v14 = vpop.eup %771  ;;  %v614_v17 = vpack.c.bf16 %v459_v6, %v458_v5  ;;  %v457_v19 = vmul.f32 %v770_v11, %v911_v44  ;;  %v428_v44 = vadd.f32 1.0, %v754_v58 }
 0x11d   :  { %v774_v20 = vpop.eup %773  ;;  %v634_v23 = vpack.c.bf16 %v467_v13, %v466_v12  ;;  %v465_v28 = vmul.f32 %v772_v14, %v914_v45 }
 0x11e   :  { %646 = vst [vmem:[%s1004_s4 + $0x8] sm:$0xff] %v614_v17   ;;  %v609_v40 = vpack.c.bf16 %v457_v19, %v456_v15  ;;  %v431_v41 = vadd.f32 1.0, %v774_v20  ;;  %v776_v45 = vpop.eup %775 }
 0x11f   :  { %650 = vst [vmem:[%s1004_s4 + $0x28] sm:$0xff] %v634_v23   ;;  %v629_v34 = vpack.c.bf16 %v465_v28, %v464_v22  ;;  %v778_v24 = vpop.eup %777  ;;  %v439_v25 = vadd.f32 1.0, %v776_v45 }
 0x120   :  { %610 = vst [vmem:[%s1004_s4] sm:$0xff] %v609_v40   ;;  %783 = vrcp.f32 %v431_v41  ;;  %v780_v26 = vpop.eup %779  ;;  %v429_v27 = vadd.f32 1.0, %v778_v24 }
 0x121   :  { %649 = vst [vmem:[%s1004_s4 + $0x20] sm:$0xff] %v629_v34   ;;  %785 = vrcp.f32 %v438_v29  ;;  %v437_v30 = vadd.f32 1.0, %v780_v26  ;;  %v782_v31 = vpop.eup %781 }
 0x122   :  { %787 = vrcp.f32 %v428_v44  ;;  %v462_v33 = vmul.f32 %v782_v31, %v925_v4 }
 0x123   :  { %789 = vrcp.f32 %v436_v35 }
 0x124   :  { %791 = vrcp.f32 %v439_v25 }
 0x125   :  { %793 = vrcp.f32 %v429_v27 }
 0x126   :  { %795 = vrcp.f32 %v437_v30 }
 0x12a   :  { %v784_v32 = vpop.eup %783 }
 0x12b   :  { %v463_v36 = vmul.f32 %v784_v32, %v942_v21  ;;  %v786_v37 = vpop.eup %785 }
 0x12c   :  { %v788_v38 = vpop.eup %787  ;;  %v470_v49 = vmul.f32 %v786_v37, %v928_v7 }
 0x12d   :  { %v624_v42 = vpack.c.bf16 %v463_v36, %v462_v33  ;;  %v790_v43 = vpop.eup %789  ;;  %v460_v52 = vmul.f32 %v788_v38, %v931_v8 }
 0x12e   :  { %v792_v47 = vpop.eup %791  ;;  %v468_v21 = vmul.f32 %v790_v43, %v934_v9 }
 0x12f   :  { %648 = vst [vmem:[%s1004_s4 + $0x18] sm:$0xff] %v624_v42   ;;  %v794_v16 = vpop.eup %793  ;;  %v471_v50 = vmul.f32 %v792_v47, %v949_v39 }
 0x130   :  { %v796_v51 = vpop.eup %795  ;;  %v461_v4 = vmul.f32 %v794_v16, %v952_v46 }
 0x131   :  { %v644_v53 = vpack.c.bf16 %v471_v50, %v470_v49  ;;  %v469_v54 = vmul.f32 %v796_v51, %v955_v48 }
 0x132   :  { %v619_v55 = vpack.c.bf16 %v461_v4, %v460_v52 }
 0x133   :  { %652 = vst [vmem:[%s1004_s4 + $0x38] sm:$0xff] %v644_v53   ;;  %v639_v56 = vpack.c.bf16 %v469_v54, %v468_v21 }
 0x134   :  { %647 = vst [vmem:[%s1004_s4 + $0x10] sm:$0xff] %v619_v55  }
 0x135   :  { %651 = vst [vmem:[%s1004_s4 + $0x30] sm:$0xff] %v639_v56  }

// kernel: genconvit_vae_forward.17
= control target key start
LH: loop header
LB: loop body
LE: loop exit
PB: predicated region body
PF: predicated region fallthrough
CT: control target
= control target key end

     0   :  { %s536_s1 = inlined_call_operand.vmem [shape: bf16[256,128], index: 1, kind: input, shape index: {}]   ;;  %s537_s0 = inlined_call_operand.vmem [shape: bf16[32,256], index: 0, kind: input, shape index: {}]   ;;  %s538_s2 = inlined_call_operand.vmem [shape: f32[1,128], index: 2, kind: input, shape index: {}]   ;;  %s539_s3 = inlined_call_operand.vmem [shape: f32[1,128], index: 3, kind: input, shape index: {}]   ;;  %s540_s4 = inlined_call_operand.vmem [shape: bf16[32,128], index: 4, kind: output, shape index: {}]  }
   0x1   :  { %v401_v0 = vld [vmem:[%s536_s1 + $0x40] sm:$0xff]   ;;  %v403_v2 = vld [vmem:[%s536_s1 + $0x48] sm:$0xff]   ;;  %v405_v4 = vld [vmem:[%s536_s1 + $0x50] sm:$0xff]  }
   0x2   :  { %v402_v1 = vld [vmem:[%s536_s1] sm:$0xff]   ;;  %357 = vmatprep.subr.bf16.mxu0 %v401_v0  ;;  %385 = vmatprep.subr.bf16.mxu1 %v401_v0  ;;  %v404_v3 = vld [vmem:[%s536_s1 + $0x8] sm:$0xff]   ;;  %v406_v5 = vld [vmem:[%s536_s1 + $0x10] sm:$0xff]  }
   0x3   :  { %358 = vmatpush3.bf16.msra.mxu0 %v402_v1  ;;  %393 = vmatpush3.bf16.msra.mxu1 %v402_v1  ;;  %v407_v6 = vld [vmem:[%s536_s1 + $0x58] sm:$0xff]   ;;  %v409_v8 = vld [vmem:[%s536_s1 + $0x60] sm:$0xff]   ;;  %v411_v10 = vld [vmem:[%s536_s1 + $0x68] sm:$0xff]  }
   0x4   :  { %359 = vmatprep.subr.bf16.mxu0 %v403_v2  ;;  %386 = vmatprep.subr.bf16.mxu1 %v403_v2  ;;  %v408_v7 = vld [vmem:[%s536_s1 + $0x18] sm:$0xff]   ;;  %v410_v9 = vld [vmem:[%s536_s1 + $0x20] sm:$0xff]   ;;  %v412_v13 = vld [vmem:[%s536_s1 + $0x28] sm:$0xff]  }
   0x5   :  { %v419_v11 = vld [vmem:[%s537_s0 + $0x4] ss:$8 sps:$4 sm:$0xff]   ;;  %v422_v12 = vld [vmem:[%s537_s0 + $0x14] ss:$8 sps:$4 sm:$0xff]   ;;  %v417_v18 = vld [vmem:[%s537_s0] ss:$8 sps:$4 sm:$0xff]  }
   0x6   :  { %v413_v14 = vld [vmem:[%s536_s1 + $0x70] sm:$0xff]   ;;  %214 = vmatprep.mubr.bf16.mxu0 %v419_v11  ;;  %222 = vmatprep.mubr.bf16.mxu1 %v422_v12  ;;  %v415_v16 = vld [vmem:[%s536_s1 + $0x78] sm:$0xff]   ;;  %v336_v23 = vld [vmem:[%s538_s2] ss:$0 sm:$0xff] }
   0x7   :  { %360 = vmatpush3.bf16.msra.mxu0 %v404_v3  ;;  %394 = vmatpush3.bf16.msra.mxu1 %v404_v3  ;;  %v414_v15 = vld [vmem:[%s536_s1 + $0x30] sm:$0xff]   ;;  %v416_v17 = vld [vmem:[%s536_s1 + $0x38] sm:$0xff]   ;;  %v337_v29 = vld [vmem:[%s539_s3] ss:$0 sm:$0xff] }
   0x8   :  { %361 = vmatprep.subr.bf16.mxu0 %v405_v4  ;;  %387 = vmatprep.subr.bf16.mxu1 %v405_v4  ;;  %v420_v19 = vld [vmem:[%s537_s0 + $0x10] ss:$8 sps:$4 sm:$0xff]  }
   0xb   :  { %362 = vmatpush3.bf16.msra.mxu0 %v406_v5  ;;  %395 = vmatpush3.bf16.msra.mxu1 %v406_v5 }
   0xc   :  { %363 = vmatprep.subr.bf16.mxu0 %v407_v6  ;;  %388 = vmatprep.subr.bf16.mxu1 %v407_v6 }
   0xf   :  { %364 = vmatpush3.bf16.msra.mxu0 %v408_v7  ;;  %396 = vmatpush3.bf16.msra.mxu1 %v408_v7 }
  0x10   :  { %365 = vmatprep.subr.bf16.mxu0 %v409_v8  ;;  %389 = vmatprep.subr.bf16.mxu1 %v409_v8 }
  0x13   :  { %366 = vmatpush3.bf16.msra.mxu0 %v410_v9  ;;  %397 = vmatpush3.bf16.msra.mxu1 %v410_v9 }
  0x14   :  { %367 = vmatprep.subr.bf16.mxu0 %v411_v10  ;;  %390 = vmatprep.subr.bf16.mxu1 %v411_v10 }
  0x17   :  { %368 = vmatpush3.bf16.msra.mxu0 %v412_v13  ;;  %398 = vmatpush3.bf16.msra.mxu1 %v412_v13 }
  0x18   :  { %369 = vmatprep.subr.bf16.mxu0 %v413_v14  ;;  %391 = vmatprep.subr.bf16.mxu1 %v413_v14 }
  0x1b   :  { %370 = vmatpush3.bf16.msra.mxu0 %v414_v15  ;;  %399 = vmatpush3.bf16.msra.mxu1 %v414_v15 }
  0x1c   :  { %371 = vmatprep.subr.bf16.mxu0 %v415_v16  ;;  %392 = vmatprep.subr.bf16.mxu1 %v415_v16 }
  0x1f   :  { %372 = vmatpush3.bf16.msra.mxu0 %v416_v17  ;;  %400 = vmatpush3.bf16.msra.mxu1 %v416_v17 }
  0x22   :  { %215 = vmatmul.mubr.bf16.vlgmr.msra.gmra.mrb[0].mxu0 %v417_v18  ;;  %223 = vmatmul.mubr.bf16.vlgmr.msra.gmra.mrb[0].mxu1 %v420_v19 }
  0xf5   :  { %v373_v20 = vpop.f32.mrb[0].mxu0  ;;  %v379_v21 = vpop.f32.mrb[0].mxu1 }
  0xf6   :  { %v374_v22 = vpop.f32.mrb[1].mxu0  ;;  %v380_v24 = vpop.f32.mrb[1].mxu1 }
  0xf7   :  { %v375_v25 = vadd.f32 %v374_v22, %v373_v20  ;;  %v381_v26 = vadd.f32 %v380_v24, %v379_v21  ;;  %v376_v27 = vpop.f32.mrb[2].mxu0  ;;  %v382_v28 = vpop.f32.mrb[2].mxu1 }
  0xf8   :  { %v377_v30 = vpop.f32.mrb[3].mxu0  ;;  %v383_v31 = vpop.f32.mrb[3].mxu1 }
  0xf9   :  { %v253_v32 = vmul.f32 %v375_v25, %v336_v23  ;;  %v255_v33 = vmul.f32 %v381_v26, %v336_v23  ;;  %v378_v34 = vadd.f32 %v377_v30, %v376_v27  ;;  %v384_v35 = vadd.f32 %v383_v31, %v382_v28 }
  0xfb   :  { %v264_v36 = vadd.f32 %v337_v29, %v253_v32  ;;  %v266_v37 = vadd.f32 %v337_v29, %v255_v33  ;;  %v254_v38 = vmul.f32 %v378_v34, %v336_v23  ;;  %v256_v39 = vmul.f32 %v384_v35, %v336_v23 }
  0xfd   :  { %v268_v40 = vsub.f32 0.0, %v264_v36  ;;  %v270_v41 = vsub.f32 0.0, %v266_v37  ;;  %v265_v42 = vadd.f32 %v337_v29, %v254_v38  ;;  %v267_v43 = vadd.f32 %v337_v29, %v256_v39 }
  0xff   :  { %v272_v44 = vmul.f32 1.442695, %v268_v40  ;;  %v276_v45 = vmul.f32 1.442695, %v270_v41  ;;  %v269_v46 = vsub.f32 0.0, %v265_v42  ;;  %v271_v47 = vsub.f32 0.0, %v267_v43 }
 0x101   :  { %423 = vpow2.f32 %v272_v44  ;;  %v274_v48 = vmul.f32 1.442695, %v269_v46  ;;  %v278_v49 = vmul.f32 1.442695, %v271_v47 }
 0x102   :  { %425 = vpow2.f32 %v276_v45 }
 0x103   :  { %427 = vpow2.f32 %v274_v48 }
 0x104   :  { %429 = vpow2.f32 %v278_v49 }
 0x10b   :  { %v424_v50 = vpop.eup %423 }
 0x10c   :  { %v426_v51 = vpop.eup %425  ;;  %v280_v52 = vadd.f32 1.0, %v424_v50 }
 0x10d   :  { %v428_v53 = vpop.eup %427  ;;  %v282_v54 = vadd.f32 1.0, %v426_v51 }
 0x10e   :  { %v430_v55 = vpop.eup %429  ;;  %431 = vrcp.f32 %v280_v52  ;;  %v281_v56 = vadd.f32 1.0, %v428_v53 }
 0x10f   :  { %433 = vrcp.f32 %v282_v54  ;;  %v283_v57 = vadd.f32 1.0, %v430_v55 }
 0x110   :  { %435 = vrcp.f32 %v281_v56 }
 0x111   :  { %437 = vrcp.f32 %v283_v57 }
 0x118   :  { %v432_v58 = vpop.eup %431 }
 0x119   :  { %v434_v59 = vpop.eup %433  ;;  %v288_v62 = vmul.f32 %v432_v58, %v264_v36 }
 0x11a   :  { %v436_v60 = vpop.eup %435  ;;  %v290_v0 = vmul.f32 %v434_v59, %v266_v37 }
 0x11b   :  { %v438_v61 = vpop.eup %437  ;;  %v289_v63 = vmul.f32 %v436_v60, %v265_v42 }
 0x11c   :  { %v291_v1 = vmul.f32 %v438_v61, %v267_v43 }
 0x11d   :  { %v349_v2 = vpack.c.bf16 %v289_v63, %v288_v62 }
 0x11e   :  { %v354_v3 = vpack.c.bf16 %v291_v1, %v290_v0 }
 0x11f   :  { %350 = vst [vmem:[%s540_s4] sm:$0xff] %v349_v2  }
 0x120   :  { %356 = vst [vmem:[%s540_s4 + $0x8] sm:$0xff] %v354_v3  }

// kernel: genconvit_vae_forward.18
= control target key start
LH: loop header
LB: loop body
LE: loop exit
PB: predicated region body
PF: predicated region fallthrough
CT: control target
= control target key end

     0   :  { %v456_v1 = vmov 0.0   ;;  %vm457_vm0 = vmmov 0   ;;  %s570_s1 = inlined_call_operand.vmem [shape: bf16[384,128], index: 1, kind: input, shape index: {}]   ;;  %s571_s0 = inlined_call_operand.vmem [shape: bf16[8,384], index: 0, kind: input, shape index: {}]   ;;  %s572_s2 = inlined_call_operand.vmem [shape: f32[1,128], index: 2, kind: input, shape index: {}]   ;;  %s573_s3 = inlined_call_operand.vmem [shape: f32[1,128], index: 3, kind: input, shape index: {}]   ;;  %s574_s4 = inlined_call_operand.vmem [shape: bf16[8,128], index: 4, kind: output, shape index: {}]  }
   0x1   :  { %v425_v0 = vld [vmem:[%s570_s1 + $0x40] sm:$0xff]   ;;  %403 = vmatprep.subr.bf16.mxu1 %v456_v1  ;;  %419 = vmatprep.mubr.msk.bf16.mxu1 %vm457_vm0, %v456_v1  ;;  %v428_v4 = vld [vmem:[%s570_s1 + $0x48] sm:$0xff]   ;;  %v431_v7 = vld [vmem:[%s570_s1 + $0x50] sm:$0xff]  }
   0x2   :  { %v426_v2 = vld [vmem:[%s570_s1] sm:$0xff]   ;;  %372 = vmatprep.subr.bf16.mxu0 %v425_v0  ;;  %v429_v5 = vld [vmem:[%s570_s1 + $0x8] sm:$0xff]   ;;  %v432_v8 = vld [vmem:[%s570_s1 + $0x10] sm:$0xff]  }
   0x3   :  { %v427_v3 = vld [vmem:[%s570_s1 + $0x80] sm:$0xff]   ;;  %373 = vmatpush3.bf16.msra.mxu0 %v426_v2  ;;  %v430_v6 = vld [vmem:[%s570_s1 + $0x88] sm:$0xff]   ;;  %v433_v9 = vld [vmem:[%s570_s1 + $0x90] sm:$0xff]  }
   0x4   :  { %404 = vmatpush3.bf16.msra.mxu1 %v427_v3  ;;  %374 = vmatprep.subr.bf16.mxu0 %v428_v4  ;;  %v434_v10 = vld [vmem:[%s570_s1 + $0x58] sm:$0xff]   ;;  %v437_v13 = vld [vmem:[%s570_s1 + $0x60] sm:$0xff]   ;;  %v440_v16 = vld [vmem:[%s570_s1 + $0x68] sm:$0xff]  }
   0x5   :  { %405 = vmatprep.subr.bf16.mxu1 %v456_v1  ;;  %v435_v11 = vld [vmem:[%s570_s1 + $0x18] sm:$0xff]   ;;  %v438_v14 = vld [vmem:[%s570_s1 + $0x20] sm:$0xff]   ;;  %v441_v17 = vld [vmem:[%s570_s1 + $0x28] sm:$0xff]  }
   0x6   :  { %v436_v12 = vld [vmem:[%s570_s1 + $0x98] sm:$0xff]   ;;  %v439_v15 = vld [vmem:[%s570_s1 + $0xa0] sm:$0xff]   ;;  %v442_v18 = vld [vmem:[%s570_s1 + $0xa8] sm:$0xff]  }
   0x7   :  { %375 = vmatpush3.bf16.msra.mxu0 %v429_v5  ;;  %v443_v19 = vld [vmem:[%s570_s1 + $0x70] sm:$0xff]   ;;  %v446_v22 = vld [vmem:[%s570_s1 + $0x78] sm:$0xff]   ;;  %v24_v23 = vld [vmem:[%s571_s0] sm:$0xff] }
   0x8   :  { %406 = vmatpush3.bf16.msra.mxu1 %v430_v6  ;;  %376 = vmatprep.subr.bf16.mxu0 %v431_v7  ;;  %v444_v20 = vld [vmem:[%s570_s1 + $0x30] sm:$0xff]   ;;  %v344_v24 = vcombine.high %v24_v23, %v24_v23  ;;  %v447_v25 = vld [vmem:[%s570_s1 + $0x38] sm:$0xff]   ;;  %v343_v27 = vcombine.low %v24_v23, %v24_v23  ;;  %v451_v28 = vld [vmem:[%s571_s0 + $0x8] ss:$0 sps:$4 sm:$0xff]  }
   0x9   :  { %407 = vmatprep.subr.bf16.mxu1 %v456_v1  ;;  %v445_v21 = vld [vmem:[%s570_s1 + $0xb0] sm:$0xff]   ;;  %v448_v26 = vld [vmem:[%s570_s1 + $0xb8] sm:$0xff]   ;;  %v370_v35 = vld [vmem:[%s572_s2] ss:$0 sm:$0xff] }
   0xa   :  { %261 = vmatprep.mubr.bf16.mxu0 %v344_v24  ;;  %v371_v40 = vld [vmem:[%s573_s3] ss:$0 sm:$0xff] }
   0xb   :  { %377 = vmatpush3.bf16.msra.mxu0 %v432_v8 }
   0xc   :  { %408 = vmatpush3.bf16.msra.mxu1 %v433_v9  ;;  %378 = vmatprep.subr.bf16.mxu0 %v434_v10 }
   0xd   :  { %409 = vmatprep.subr.bf16.mxu1 %v456_v1 }
   0xf   :  { %379 = vmatpush3.bf16.msra.mxu0 %v435_v11 }
  0x10   :  { %410 = vmatpush3.bf16.msra.mxu1 %v436_v12  ;;  %380 = vmatprep.subr.bf16.mxu0 %v437_v13 }
  0x11   :  { %411 = vmatprep.subr.bf16.mxu1 %v456_v1 }
  0x13   :  { %381 = vmatpush3.bf16.msra.mxu0 %v438_v14 }
  0x14   :  { %412 = vmatpush3.bf16.msra.mxu1 %v439_v15  ;;  %382 = vmatprep.subr.bf16.mxu0 %v440_v16 }
  0x15   :  { %413 = vmatprep.subr.bf16.mxu1 %v456_v1 }
  0x17   :  { %383 = vmatpush3.bf16.msra.mxu0 %v441_v17 }
  0x18   :  { %414 = vmatpush3.bf16.msra.mxu1 %v442_v18  ;;  %384 = vmatprep.subr.bf16.mxu0 %v443_v19 }
  0x19   :  { %415 = vmatprep.subr.bf16.mxu1 %v456_v1 }
  0x1b   :  { %385 = vmatpush3.bf16.msra.mxu0 %v444_v20 }
  0x1c   :  { %416 = vmatpush3.bf16.msra.mxu1 %v445_v21  ;;  %386 = vmatprep.subr.bf16.mxu0 %v446_v22 }
  0x1d   :  { %417 = vmatprep.subr.bf16.mxu1 %v456_v1 }
  0x1f   :  { %387 = vmatpush3.bf16.msra.mxu0 %v447_v25 }
  0x20   :  { %418 = vmatpush3.bf16.msra.mxu1 %v448_v26 }
  0x22   :  { %262 = vmatmul.mubr.bf16.vlgmr.msra.gmra.mrb[0].mxu0 %v343_v27 }
  0x23   :  { %420 = vmatmul.mubr.bf16.vlgmr.msra.gmra.mrb[0].mxu1 %v451_v28 }
  0xf5   :  { %v388_v29 = vpop.f32.mrb[0].mxu0 }
  0xf6   :  { %v303_v30 = vpop.f32.mrb[0].mxu1  ;;  %v389_v31 = vpop.f32.mrb[1].mxu0 }
  0xf7   :  { %v390_v32 = vadd.f32 %v389_v31, %v388_v29  ;;  %v421_v33 = vpop.f32.mrb[1].mxu1  ;;  %v391_v34 = vpop.f32.mrb[2].mxu0 }
  0xf8   :  { %v306_v36 = vpop.f32.mrb[2].mxu1  ;;  %v392_v37 = vpop.f32.mrb[3].mxu0 }
  0xf9   :  { %v304_v38 = vadd.f32 %v390_v32, %v303_v30  ;;  %v422_v39 = vpop.f32.mrb[3].mxu1 }
  0xfb   :  { %v322_v41 = vmul.f32 %v370_v35, %v304_v38 }
  0xfd   :  { %v330_v42 = vadd.f32 %v371_v40, %v322_v41 }
  0xff   :  { %v331_v43 = vsub.f32 0.0, %v330_v42 }
 0x101   :  { %v332_v44 = vmul.f32 1.442695, %v331_v43 }
 0x103   :  { %452 = vpow2.f32 %v332_v44 }
 0x10d   :  { %v453_v45 = vpop.eup %452 }
 0x10e   :  { %v334_v46 = vadd.f32 1.0, %v453_v45 }
 0x110   :  { %454 = vrcp.f32 %v334_v46 }
 0x11a   :  { %v455_v47 = vpop.eup %454 }
 0x11b   :  { %v336_v48 = vmul.f32 %v455_v47, %v330_v42 }
 0x11d   :  { %v337_v49 = vpack.c.bf16 %v336_v48, %v336_v48 }
 0x11f   :  { %338 = vst [vmem:[%s574_s4] sm:$0xf] %v337_v49 }

// kernel: genconvit_vae_forward.20
= control target key start
LH: loop header
LB: loop body
LE: loop exit
PB: predicated region body
PF: predicated region fallthrough
CT: control target
= control target key end

     0   :  { %v259_v1 = vmov 0   ;;  %v175_v18 = vlaneseq  ;;  %s348_s1 = inlined_call_operand.vmem [shape: bf16[128,256], index: 1, kind: input, shape index: {}]   ;;  %s349_s0 = inlined_call_operand.vmem [shape: bf16[8,128], index: 0, kind: input, shape index: {}]   ;;  %s350_s2 = inlined_call_operand.vmem [shape: f32[1,256], index: 2, kind: input, shape index: {}]   ;;  %s351_s3 = inlined_call_operand.vmem [shape: f32[8,256], index: 3, kind: input, shape index: {}]   ;;  %s352_s4 = inlined_call_operand.vmem [shape: bf16[8,256], index: 4, kind: output, shape index: {}]  }
   0x1   :  { %v231_v0 = vld [vmem:[%s348_s1 + $0x4] ss:$8 sps:$4 sm:$0xff]   ;;  %155 = vmatprep.mubr.bf16.mxu0 %v259_v1  ;;  %v233_v2 = vld [vmem:[%s348_s1] ss:$8 sps:$4 sm:$0xff]   ;;  %v234_v3 = vld [vmem:[%s348_s1 + $0x14] ss:$8 sps:$4 sm:$0xff]  }
   0x2   :  { %123 = vmatprep.subr.bf16.mxu0 %v231_v0  ;;  %v236_v4 = vld [vmem:[%s348_s1 + $0x10] ss:$8 sps:$4 sm:$0xff]   ;;  %v237_v5 = vld [vmem:[%s348_s1 + $0x24] ss:$8 sps:$4 sm:$0xff]   ;;  %v239_v6 = vld [vmem:[%s348_s1 + $0x20] ss:$8 sps:$4 sm:$0xff]  }
   0x3   :  { %124 = vmatpush1.bf16.msra.mxu0 %v233_v2  ;;  %v240_v7 = vld [vmem:[%s348_s1 + $0x34] ss:$8 sps:$4 sm:$0xff]   ;;  %v242_v8 = vld [vmem:[%s348_s1 + $0x30] ss:$8 sps:$4 sm:$0xff]   ;;  %v243_v9 = vld [vmem:[%s348_s1 + $0x44] ss:$8 sps:$4 sm:$0xff]  }
   0x4   :  { %125 = vmatprep.subr.bf16.mxu0 %v234_v3  ;;  %v245_v10 = vld [vmem:[%s348_s1 + $0x40] ss:$8 sps:$4 sm:$0xff]   ;;  %v246_v11 = vld [vmem:[%s348_s1 + $0x54] ss:$8 sps:$4 sm:$0xff]   ;;  %v248_v12 = vld [vmem:[%s348_s1 + $0x50] ss:$8 sps:$4 sm:$0xff]  }
   0x5   :  { %v249_v13 = vld [vmem:[%s348_s1 + $0x64] ss:$8 sps:$4 sm:$0xff]   ;;  %v251_v14 = vld [vmem:[%s348_s1 + $0x60] ss:$8 sps:$4 sm:$0xff]   ;;  %v252_v15 = vld [vmem:[%s348_s1 + $0x74] ss:$8 sps:$4 sm:$0xff]  }
   0x6   :  { %v254_v16 = vld [vmem:[%s348_s1 + $0x70] ss:$8 sps:$4 sm:$0xff]   ;;  %v26_v17 = vld [vmem:[%s349_s0] sm:$0xf]  ;;  %v176_v19 = vshrl.u32 %v175_v18, 7  ;;  %v188_v36 = vld [vmem:[%s351_s3 + $0x8] sm:$0xff] }
   0x7   :  { %126 = vmatpush1.bf16.msra.mxu0 %v236_v4  ;;  %v173_v21 = vld [vmem:[%s350_s2] sm:$0x3] }
   0x8   :  { %127 = vmatprep.subr.bf16.mxu0 %v237_v5  ;;  %v177_v20 = vsub.s32 0, %v176_v19  ;;  %v181_v22 = vsub.s32 1, %v176_v19  ;;  %v187_v35 = vld [vmem:[%s351_s3] sm:$0xff] }
   0xa   :  { %v178_v23 = vrot.slane %v173_v21, %v177_v20  ;;  %v182_v24 = vrot.slane %v173_v21, %v181_v22 }
   0xb   :  { %128 = vmatpush1.bf16.msra.mxu0 %v239_v6 }
   0xc   :  { %129 = vmatprep.subr.bf16.mxu0 %v240_v7 }
   0xf   :  { %130 = vmatpush1.bf16.msra.mxu0 %v242_v8 }
  0x10   :  { %131 = vmatprep.subr.bf16.mxu0 %v243_v9 }
  0x13   :  { %132 = vmatpush1.bf16.msra.mxu0 %v245_v10 }
  0x14   :  { %133 = vmatprep.subr.bf16.mxu0 %v246_v11 }
  0x17   :  { %134 = vmatpush1.bf16.msra.mxu0 %v248_v12 }
  0x18   :  { %135 = vmatprep.subr.bf16.mxu0 %v249_v13 }
  0x1b   :  { %136 = vmatpush1.bf16.msra.mxu0 %v251_v14 }
  0x1c   :  { %137 = vmatprep.subr.bf16.mxu0 %v252_v15 }
  0x1f   :  { %138 = vmatpush1.bf16.msra.mxu0 %v254_v16 }
  0x22   :  { %156 = vmatmul.mubr.bf16.vlgmr.msra.gmra.mrb[0].mxu0 %v26_v17 }
  0xf5   :  { %v157_v25 = vpop.f32.mrb[0].mxu0 }
  0xf6   :  { %v185_v26 = vadd.f32 %v178_v23, %v157_v25  ;;  %v159_v27 = vpop.f32.mrb[1].mxu0 }
  0xf7   :  { %v186_v28 = vadd.f32 %v182_v24, %v159_v27  ;;  %v161_v29 = vpop.f32.mrb[2].mxu0 }
  0xf8   :  { %v189_v30 = vmul.f32 0.5, %v185_v26  ;;  %v162_v31 = vpop.f32.mrb[3].mxu0 }
  0xf9   :  { %v190_v32 = vmul.f32 0.5, %v186_v28 }
  0xfa   :  { %v191_v33 = vmul.f32 1.442695, %v189_v30 }
  0xfb   :  { %v193_v34 = vmul.f32 1.442695, %v190_v32 }
  0xfc   :  { %255 = vpow2.f32 %v191_v33 }
  0xfd   :  { %257 = vpow2.f32 %v193_v34 }
 0x106   :  { %v256_v37 = vpop.eup %255 }
 0x107   :  { %v258_v38 = vpop.eup %257  ;;  %v195_v39 = vmul.f32 %v256_v37, %v187_v35 }
 0x108   :  { %v196_v40 = vmul.f32 %v258_v38, %v188_v36 }
 0x109   :  { %v197_v41 = vadd.f32 %v195_v39, %v185_v26 }
 0x10a   :  { %v198_v42 = vadd.f32 %v196_v40, %v186_v28 }
 0x10c   :  { %v229_v43 = vpack.c.bf16 %v198_v42, %v197_v41 }
 0x10e   :  { %207 = vst [vmem:[%s352_s4] sm:$0xff] %v229_v43 }

// kernel: genconvit_vae_forward.21
= control target key start
LH: loop header
LB: loop body
LE: loop exit
PB: predicated region body
PF: predicated region fallthrough
CT: control target
= control target key end

     0   :  { %v277_v35 = vlaneseq  ;;  %s555_s1 = inlined_call_operand.vmem [shape: bf16[256,256], index: 1, kind: input, shape index: {}]   ;;  %s556_s0 = inlined_call_operand.vmem [shape: bf16[8,256], index: 0, kind: input, shape index: {}]   ;;  %s557_s2 = inlined_call_operand.vmem [shape: f32[1,256], index: 2, kind: input, shape index: {}]   ;;  %s558_s3 = inlined_call_operand.vmem [shape: f32[1,256], index: 3, kind: input, shape index: {}]   ;;  %s559_s4 = inlined_call_operand.vmem [shape: bf16[8,256], index: 4, kind: output, shape index: {}]  }
   0x1   :  { %v364_v0 = vld [vmem:[%s555_s1 + $0x4] ss:$8 sps:$4 sm:$0xff]   ;;  %v366_v1 = vld [vmem:[%s555_s1] ss:$8 sps:$4 sm:$0xff]   ;;  %v367_v2 = vld [vmem:[%s555_s1 + $0x14] ss:$8 sps:$4 sm:$0xff]  }
   0x2   :  { %225 = vmatprep.subr.bf16.mxu0 %v364_v0  ;;  %v369_v3 = vld [vmem:[%s555_s1 + $0x10] ss:$8 sps:$4 sm:$0xff]   ;;  %v370_v4 = vld [vmem:[%s555_s1 + $0x24] ss:$8 sps:$4 sm:$0xff]   ;;  %v372_v5 = vld [vmem:[%s555_s1 + $0x20] ss:$8 sps:$4 sm:$0xff]  }
   0x3   :  { %226 = vmatpush1.bf16.msra.mxu0 %v366_v1  ;;  %v373_v6 = vld [vmem:[%s555_s1 + $0x34] ss:$8 sps:$4 sm:$0xff]   ;;  %v375_v7 = vld [vmem:[%s555_s1 + $0x30] ss:$8 sps:$4 sm:$0xff]   ;;  %v376_v8 = vld [vmem:[%s555_s1 + $0x44] ss:$8 sps:$4 sm:$0xff]  }
   0x4   :  { %227 = vmatprep.subr.bf16.mxu0 %v367_v2  ;;  %v378_v9 = vld [vmem:[%s555_s1 + $0x40] ss:$8 sps:$4 sm:$0xff]   ;;  %v379_v10 = vld [vmem:[%s555_s1 + $0x54] ss:$8 sps:$4 sm:$0xff]   ;;  %v381_v11 = vld [vmem:[%s555_s1 + $0x50] ss:$8 sps:$4 sm:$0xff]  }
   0x5   :  { %v382_v12 = vld [vmem:[%s555_s1 + $0x64] ss:$8 sps:$4 sm:$0xff]   ;;  %v384_v15 = vld [vmem:[%s555_s1 + $0x60] ss:$8 sps:$4 sm:$0xff]   ;;  %v385_v16 = vld [vmem:[%s555_s1 + $0x74] ss:$8 sps:$4 sm:$0xff]  }
   0x6   :  { %v25_v13 = vld [vmem:[%s556_s0] sm:$0xff]  ;;  %v387_v17 = vld [vmem:[%s555_s1 + $0x70] ss:$8 sps:$4 sm:$0xff]   ;;  %v391_v20 = vld [vmem:[%s555_s1 + $0x94] ss:$8 sps:$4 sm:$0xff]   ;;  %v278_v36 = vshrl.u32 %v277_v35, 7 }
   0x7   :  { %228 = vmatpush1.bf16.msra.mxu0 %v369_v3  ;;  %v329_v14 = vcombine.high %v25_v13, %v25_v13  ;;  %v388_v18 = vld [vmem:[%s555_s1 + $0x84] ss:$8 sps:$4 sm:$0xff]   ;;  %v390_v19 = vld [vmem:[%s555_s1 + $0x80] ss:$8 sps:$4 sm:$0xff]   ;;  %v393_v21 = vld [vmem:[%s555_s1 + $0x90] ss:$8 sps:$4 sm:$0xff]   ;;  %v328_v34 = vcombine.low %v25_v13, %v25_v13 }
   0x8   :  { %229 = vmatprep.subr.bf16.mxu0 %v370_v4  ;;  %v394_v22 = vld [vmem:[%s555_s1 + $0xa4] ss:$8 sps:$4 sm:$0xff]   ;;  %v396_v23 = vld [vmem:[%s555_s1 + $0xa0] ss:$8 sps:$4 sm:$0xff]   ;;  %v397_v24 = vld [vmem:[%s555_s1 + $0xb4] ss:$8 sps:$4 sm:$0xff]  }
   0x9   :  { %257 = vmatprep.mubr.bf16.mxu0 %v329_v14  ;;  %v399_v25 = vld [vmem:[%s555_s1 + $0xb0] ss:$8 sps:$4 sm:$0xff]   ;;  %v400_v26 = vld [vmem:[%s555_s1 + $0xc4] ss:$8 sps:$4 sm:$0xff]   ;;  %v402_v27 = vld [vmem:[%s555_s1 + $0xc0] ss:$8 sps:$4 sm:$0xff]  }
   0xa   :  { %v403_v28 = vld [vmem:[%s555_s1 + $0xd4] ss:$8 sps:$4 sm:$0xff]   ;;  %v405_v29 = vld [vmem:[%s555_s1 + $0xd0] ss:$8 sps:$4 sm:$0xff]   ;;  %v406_v30 = vld [vmem:[%s555_s1 + $0xe4] ss:$8 sps:$4 sm:$0xff]  }
   0xb   :  { %230 = vmatpush1.bf16.msra.mxu0 %v372_v5  ;;  %v408_v31 = vld [vmem:[%s555_s1 + $0xe0] ss:$8 sps:$4 sm:$0xff]   ;;  %v409_v32 = vld [vmem:[%s555_s1 + $0xf4] ss:$8 sps:$4 sm:$0xff]   ;;  %v411_v33 = vld [vmem:[%s555_s1 + $0xf0] ss:$8 sps:$4 sm:$0xff]  }
   0xc   :  { %231 = vmatprep.subr.bf16.mxu0 %v373_v6  ;;  %v279_v37 = vsub.s32 0, %v278_v36  ;;  %v275_v38 = vld [vmem:[%s557_s2] sm:$0x3]  ;;  %v283_v39 = vsub.s32 1, %v278_v36 }
   0xd   :  { %v289_v40 = vld [vmem:[%s558_s3] sm:$0x3] }
   0xe   :  { %v280_v41 = vrot.slane %v275_v38, %v279_v37  ;;  %v284_v42 = vrot.slane %v275_v38, %v283_v39  ;;  %v294_v43 = vrot.slane %v289_v40, %v279_v37  ;;  %v298_v45 = vrot.slane %v289_v40, %v283_v39 }
   0xf   :  { %232 = vmatpush1.bf16.msra.mxu0 %v375_v7 }
  0x10   :  { %233 = vmatprep.subr.bf16.mxu0 %v376_v8 }
  0x13   :  { %234 = vmatpush1.bf16.msra.mxu0 %v378_v9 }
  0x14   :  { %235 = vmatprep.subr.bf16.mxu0 %v379_v10 }
  0x17   :  { %236 = vmatpush1.bf16.msra.mxu0 %v381_v11 }
  0x18   :  { %237 = vmatprep.subr.bf16.mxu0 %v382_v12 }
  0x1b   :  { %238 = vmatpush1.bf16.msra.mxu0 %v384_v15 }
  0x1c   :  { %239 = vmatprep.subr.bf16.mxu0 %v385_v16 }
  0x1f   :  { %240 = vmatpush1.bf16.msra.mxu0 %v387_v17 }
  0x20   :  { %241 = vmatprep.subr.bf16.mxu0 %v388_v18 }
  0x23   :  { %242 = vmatpush1.bf16.msra.mxu0 %v390_v19 }
  0x24   :  { %243 = vmatprep.subr.bf16.mxu0 %v391_v20 }
  0x27   :  { %244 = vmatpush1.bf16.msra.mxu0 %v393_v21 }
  0x28   :  { %245 = vmatprep.subr.bf16.mxu0 %v394_v22 }
  0x2b   :  { %246 = vmatpush1.bf16.msra.mxu0 %v396_v23 }
  0x2c   :  { %247 = vmatprep.subr.bf16.mxu0 %v397_v24 }
  0x2f   :  { %248 = vmatpush1.bf16.msra.mxu0 %v399_v25 }
  0x30   :  { %249 = vmatprep.subr.bf16.mxu0 %v400_v26 }
  0x33   :  { %250 = vmatpush1.bf16.msra.mxu0 %v402_v27 }
  0x34   :  { %251 = vmatprep.subr.bf16.mxu0 %v403_v28 }
  0x37   :  { %252 = vmatpush1.bf16.msra.mxu0 %v405_v29 }
  0x38   :  { %253 = vmatprep.subr.bf16.mxu0 %v406_v30 }
  0x3b   :  { %254 = vmatpush1.bf16.msra.mxu0 %v408_v31 }
  0x3c   :  { %255 = vmatprep.subr.bf16.mxu0 %v409_v32 }
  0x3f   :  { %256 = vmatpush1.bf16.msra.mxu0 %v411_v33 }
  0x42   :  { %258 = vmatmul.mubr.bf16.vlgmr.msra.gmra.mrb[0].mxu0 %v328_v34 }
 0x115   :  { %v259_v44 = vpop.f32.mrb[0].mxu0 }
 0x116   :  { %v287_v46 = vmul.f32 %v280_v41, %v259_v44  ;;  %v261_v47 = vpop.f32.mrb[1].mxu0 }
 0x117   :  { %v288_v48 = vmul.f32 %v284_v42, %v261_v47  ;;  %v263_v49 = vpop.f32.mrb[2].mxu0 }
 0x118   :  { %v301_v50 = vadd.f32 %v294_v43, %v287_v46  ;;  %v264_v51 = vpop.f32.mrb[3].mxu0 }
 0x119   :  { %v302_v52 = vadd.f32 %v298_v45, %v288_v48 }
 0x11a   :  { %v303_v53 = vsub.f32 0.0, %v301_v50 }
 0x11b   :  { %v304_v54 = vsub.f32 0.0, %v302_v52 }
 0x11c   :  { %v305_v55 = vmul.f32 1.442695, %v303_v53 }
 0x11d   :  { %v307_v56 = vmul.f32 1.442695, %v304_v54 }
 0x11e   :  { %414 = vpow2.f32 %v305_v55 }
 0x11f   :  { %416 = vpow2.f32 %v307_v56 }
 0x128   :  { %v415_v57 = vpop.eup %414 }
 0x129   :  { %v417_v58 = vpop.eup %416  ;;  %v309_v59 = vadd.f32 1.0, %v415_v57 }
 0x12a   :  { %v310_v60 = vadd.f32 1.0, %v417_v58 }
 0x12b   :  { %418 = vrcp.f32 %v309_v59 }
 0x12c   :  { %420 = vrcp.f32 %v310_v60 }
 0x135   :  { %v419_v61 = vpop.eup %418 }
 0x136   :  { %v421_v62 = vpop.eup %420  ;;  %v313_v63 = vmul.f32 %v419_v61, %v301_v50 }
 0x137   :  { %v314_v0 = vmul.f32 %v421_v62, %v302_v52 }
 0x139   :  { %v363_v1 = vpack.c.bf16 %v314_v0, %v313_v63 }
 0x13b   :  { %323 = vst [vmem:[%s559_s4] sm:$0xff] %v363_v1 }

// kernel: genconvit_vae_forward.19
= control target key start
LH: loop header
LB: loop body
LE: loop exit
PB: predicated region body
PF: predicated region fallthrough
CT: control target
= control target key end

     0   :  { %v690_v36 = vmov 0.0   ;;  %vm691_vm0 = vmmov 0   ;;  %s855_s1 = inlined_call_operand.vmem [shape: bf16[640,128], index: 1, kind: input, shape index: {}]   ;;  %s856_s0 = inlined_call_operand.vmem [shape: bf16[8,640], index: 0, kind: input, shape index: {}]   ;;  %s857_s2 = inlined_call_operand.vmem [shape: f32[1,128], index: 2, kind: input, shape index: {}]   ;;  %s858_s3 = inlined_call_operand.vmem [shape: f32[1,128], index: 3, kind: input, shape index: {}]   ;;  %s859_s4 = inlined_call_operand.vmem [shape: bf16[8,128], index: 4, kind: output, shape index: {}]  }
   0x1   :  { %v641_v0 = vld [vmem:[%s855_s1 + $0x40] sm:$0xff]   ;;  %v645_v4 = vld [vmem:[%s855_s1 + $0x48] sm:$0xff]   ;;  %v649_v8 = vld [vmem:[%s855_s1 + $0x50] sm:$0xff]  }
   0x2   :  { %v642_v1 = vld [vmem:[%s855_s1 + $0xc0] sm:$0xff]   ;;  %566 = vmatprep.subr.bf16.mxu0 %v641_v0  ;;  %v646_v5 = vld [vmem:[%s855_s1 + $0xc8] sm:$0xff]   ;;  %v650_v9 = vld [vmem:[%s855_s1 + $0xd0] sm:$0xff]  }
   0x3   :  { %v643_v2 = vld [vmem:[%s855_s1] sm:$0xff]   ;;  %588 = vmatprep.subr.bf16.mxu1 %v642_v1  ;;  %v647_v6 = vld [vmem:[%s855_s1 + $0x8] sm:$0xff]   ;;  %v651_v10 = vld [vmem:[%s855_s1 + $0x10] sm:$0xff]  }
   0x4   :  { %v644_v3 = vld [vmem:[%s855_s1 + $0x80] sm:$0xff]   ;;  %567 = vmatpush3.bf16.msra.mxu0 %v643_v2  ;;  %v648_v7 = vld [vmem:[%s855_s1 + $0x88] sm:$0xff]   ;;  %v652_v11 = vld [vmem:[%s855_s1 + $0x90] sm:$0xff]  }
   0x5   :  { %589 = vmatpush3.bf16.msra.mxu1 %v644_v3  ;;  %568 = vmatprep.subr.bf16.mxu0 %v645_v4  ;;  %v653_v12 = vld [vmem:[%s855_s1 + $0x58] sm:$0xff]   ;;  %v657_v16 = vld [vmem:[%s855_s1 + $0x60] sm:$0xff]   ;;  %v661_v20 = vld [vmem:[%s855_s1 + $0x68] sm:$0xff]  }
   0x6   :  { %590 = vmatprep.subr.bf16.mxu1 %v646_v5  ;;  %v654_v13 = vld [vmem:[%s855_s1 + $0xd8] sm:$0xff]   ;;  %v658_v17 = vld [vmem:[%s855_s1 + $0xe0] sm:$0xff]   ;;  %v662_v21 = vld [vmem:[%s855_s1 + $0xe8] sm:$0xff]  }
   0x7   :  { %v655_v14 = vld [vmem:[%s855_s1 + $0x18] sm:$0xff]   ;;  %v659_v18 = vld [vmem:[%s855_s1 + $0x20] sm:$0xff]   ;;  %v663_v22 = vld [vmem:[%s855_s1 + $0x28] sm:$0xff]  }
   0x8   :  { %569 = vmatpush3.bf16.msra.mxu0 %v647_v6  ;;  %v656_v15 = vld [vmem:[%s855_s1 + $0x98] sm:$0xff]   ;;  %v660_v19 = vld [vmem:[%s855_s1 + $0xa0] sm:$0xff]   ;;  %v664_v23 = vld [vmem:[%s855_s1 + $0xa8] sm:$0xff]  }
   0x9   :  { %591 = vmatpush3.bf16.msra.mxu1 %v648_v7  ;;  %570 = vmatprep.subr.bf16.mxu0 %v649_v8  ;;  %v665_v24 = vld [vmem:[%s855_s1 + $0x70] sm:$0xff]   ;;  %v669_v28 = vld [vmem:[%s855_s1 + $0x78] sm:$0xff]   ;;  %v24_v32 = vld [vmem:[%s856_s0] sm:$0xff] }
   0xa   :  { %592 = vmatprep.subr.bf16.mxu1 %v650_v9  ;;  %v666_v25 = vld [vmem:[%s855_s1 + $0xf0] sm:$0xff]   ;;  %v670_v29 = vld [vmem:[%s855_s1 + $0xf8] sm:$0xff]   ;;  %v519_v33 = vcombine.low %v24_v32, %v24_v32  ;;  %v520_v34 = vcombine.high %v24_v32, %v24_v32  ;;  %v25_v35 = vld [vmem:[%s856_s0 + $0x8] sm:$0xff] }
   0xb   :  { %v667_v26 = vld [vmem:[%s855_s1 + $0x30] sm:$0xff]   ;;  %v671_v30 = vld [vmem:[%s855_s1 + $0x38] sm:$0xff]   ;;  %v521_v37 = vcombine.low %v25_v35, %v25_v35  ;;  %v522_v38 = vcombine.high %v25_v35, %v25_v35  ;;  %v678_v39 = vld [vmem:[%s855_s1 + $0x100] sm:$0xff]  }
   0xc   :  { %571 = vmatpush3.bf16.msra.mxu0 %v651_v10  ;;  %v668_v27 = vld [vmem:[%s855_s1 + $0xb0] sm:$0xff]   ;;  %v672_v31 = vld [vmem:[%s855_s1 + $0xb8] sm:$0xff]   ;;  %397 = vmatprep.mubr.bf16.mxu0 %v520_v34  ;;  %v679_v40 = vld [vmem:[%s855_s1 + $0x108] sm:$0xff]  }
   0xd   :  { %593 = vmatpush3.bf16.msra.mxu1 %v652_v11  ;;  %572 = vmatprep.subr.bf16.mxu0 %v653_v12  ;;  %v680_v41 = vld [vmem:[%s855_s1 + $0x110] sm:$0xff]   ;;  %v681_v42 = vld [vmem:[%s855_s1 + $0x118] sm:$0xff]   ;;  %v682_v43 = vld [vmem:[%s855_s1 + $0x120] sm:$0xff]  }
   0xe   :  { %594 = vmatprep.subr.bf16.mxu1 %v654_v13  ;;  %437 = vmatprep.mubr.bf16.mxu1 %v522_v38  ;;  %v683_v44 = vld [vmem:[%s855_s1 + $0x128] sm:$0xff]   ;;  %v684_v45 = vld [vmem:[%s855_s1 + $0x130] sm:$0xff]   ;;  %v685_v46 = vld [vmem:[%s855_s1 + $0x138] sm:$0xff]  }
   0xf   :  { %v675_v47 = vld [vmem:[%s856_s0 + $0x10] ss:$0 sps:$4 sm:$0xff]   ;;  %v564_v60 = vld [vmem:[%s857_s2] ss:$0 sm:$0xff] }
  0x10   :  { %573 = vmatpush3.bf16.msra.mxu0 %v655_v14  ;;  %v565_v63 = vld [vmem:[%s858_s3] ss:$0 sm:$0xff] }
  0x11   :  { %595 = vmatpush3.bf16.msra.mxu1 %v656_v15  ;;  %574 = vmatprep.subr.bf16.mxu0 %v657_v16 }
  0x12   :  { %596 = vmatprep.subr.bf16.mxu1 %v658_v17 }
  0x14   :  { %575 = vmatpush3.bf16.msra.mxu0 %v659_v18 }
  0x15   :  { %597 = vmatpush3.bf16.msra.mxu1 %v660_v19  ;;  %576 = vmatprep.subr.bf16.mxu0 %v661_v20 }
  0x16   :  { %598 = vmatprep.subr.bf16.mxu1 %v662_v21 }
  0x18   :  { %577 = vmatpush3.bf16.msra.mxu0 %v663_v22 }
  0x19   :  { %599 = vmatpush3.bf16.msra.mxu1 %v664_v23  ;;  %578 = vmatprep.subr.bf16.mxu0 %v665_v24 }
  0x1a   :  { %600 = vmatprep.subr.bf16.mxu1 %v666_v25 }
  0x1c   :  { %579 = vmatpush3.bf16.msra.mxu0 %v667_v26 }
  0x1d   :  { %601 = vmatpush3.bf16.msra.mxu1 %v668_v27  ;;  %580 = vmatprep.subr.bf16.mxu0 %v669_v28 }
  0x1e   :  { %602 = vmatprep.subr.bf16.mxu1 %v670_v29 }
  0x20   :  { %581 = vmatpush3.bf16.msra.mxu0 %v671_v30 }
  0x21   :  { %603 = vmatpush3.bf16.msra.mxu1 %v672_v31  ;;  %619 = vmatprep.subr.bf16.mxu0 %v690_v36 }
  0x23   :  { %398 = vmatmul.mubr.bf16.vlgmr.msra.gmra.mrb[0].mxu0 %v519_v33 }
  0x24   :  { %438 = vmatmul.mubr.bf16.vlgmr.msra.gmra.mrb[0].mxu1 %v521_v37  ;;  %620 = vmatpush3.bf16.msra.mxu0 %v678_v39 }
  0x25   :  { %621 = vmatprep.subr.bf16.mxu0 %v690_v36  ;;  %635 = vmatprep.mubr.msk.bf16.mxu0 %vm691_vm0, %v690_v36 }
  0x28   :  { %622 = vmatpush3.bf16.msra.mxu0 %v679_v40 }
  0x29   :  { %623 = vmatprep.subr.bf16.mxu0 %v690_v36 }
  0x2c   :  { %624 = vmatpush3.bf16.msra.mxu0 %v680_v41 }
  0x2d   :  { %625 = vmatprep.subr.bf16.mxu0 %v690_v36 }
  0x30   :  { %626 = vmatpush3.bf16.msra.mxu0 %v681_v42 }
  0x31   :  { %627 = vmatprep.subr.bf16.mxu0 %v690_v36 }
  0x34   :  { %628 = vmatpush3.bf16.msra.mxu0 %v682_v43 }
  0x35   :  { %629 = vmatprep.subr.bf16.mxu0 %v690_v36 }
  0x38   :  { %630 = vmatpush3.bf16.msra.mxu0 %v683_v44 }
  0x39   :  { %631 = vmatprep.subr.bf16.mxu0 %v690_v36 }
  0x3c   :  { %632 = vmatpush3.bf16.msra.mxu0 %v684_v45 }
  0x3d   :  { %633 = vmatprep.subr.bf16.mxu0 %v690_v36 }
  0x40   :  { %634 = vmatpush3.bf16.msra.mxu0 %v685_v46 }
  0x43   :  { %636 = vmatmul.mubr.bf16.vlgmr.msra.gmra.mrb[4].mxu0 %v675_v47 }
  0xf6   :  { %v582_v48 = vpop.f32.mrb[0].mxu0 }
  0xf7   :  { %v604_v49 = vpop.f32.mrb[0].mxu1  ;;  %v583_v50 = vpop.f32.mrb[1].mxu0 }
  0xf8   :  { %v584_v51 = vadd.f32 %v583_v50, %v582_v48  ;;  %v605_v52 = vpop.f32.mrb[1].mxu1  ;;  %v585_v53 = vpop.f32.mrb[2].mxu0 }
  0xf9   :  { %v606_v54 = vadd.f32 %v605_v52, %v604_v49  ;;  %v586_v55 = vpop.f32.mrb[3].mxu0  ;;  %v607_v56 = vpop.f32.mrb[2].mxu1 }
  0xfa   :  { %v608_v57 = vpop.f32.mrb[3].mxu1 }
  0xfb   :  { %v440_v58 = vadd.f32 %v606_v54, %v584_v51 }
 0x116   :  { %v479_v59 = vpop.f32.mrb[4].mxu0 }
 0x117   :  { %v480_v61 = vadd.f32 %v479_v59, %v440_v58  ;;  %v637_v62 = vpop.f32.mrb[5].mxu0 }
 0x118   :  { %v482_v0 = vpop.f32.mrb[6].mxu0 }
 0x119   :  { %v498_v1 = vmul.f32 %v564_v60, %v480_v61  ;;  %v638_v2 = vpop.f32.mrb[7].mxu0 }
 0x11b   :  { %v506_v3 = vadd.f32 %v565_v63, %v498_v1 }
 0x11d   :  { %v507_v4 = vsub.f32 0.0, %v506_v3 }
 0x11f   :  { %v508_v5 = vmul.f32 1.442695, %v507_v4 }
 0x121   :  { %686 = vpow2.f32 %v508_v5 }
 0x12b   :  { %v687_v6 = vpop.eup %686 }
 0x12c   :  { %v510_v7 = vadd.f32 1.0, %v687_v6 }
 0x12e   :  { %688 = vrcp.f32 %v510_v7 }
 0x138   :  { %v689_v8 = vpop.eup %688 }
 0x139   :  { %v512_v9 = vmul.f32 %v689_v8, %v506_v3 }
 0x13b   :  { %v513_v10 = vpack.c.bf16 %v512_v9, %v512_v9 }
 0x13d   :  { %514 = vst [vmem:[%s859_s4] sm:$0xf] %v513_v10 }

// kernel: genconvit_vae_forward.22
= control target key start
LH: loop header
LB: loop body
LE: loop exit
PB: predicated region body
PF: predicated region fallthrough
CT: control target
= control target key end

     0   :  { %v216_v0 = vmov 0.0   ;;  %vm217_vm0 = vmmov 0   ;;  %s279_s1 = inlined_call_operand.vmem [shape: bf16[128,128], index: 1, kind: input, shape index: {}]   ;;  %s280_s0 = inlined_call_operand.vmem [shape: bf16[8,128], index: 0, kind: input, shape index: {}]   ;;  %s281_s2 = inlined_call_operand.vmem [shape: f32[1,128], index: 2, kind: input, shape index: {}]   ;;  %s282_s3 = inlined_call_operand.vmem [shape: f32[1,128], index: 3, kind: input, shape index: {}]   ;;  %s283_s4 = inlined_call_operand.vmem [shape: bf16[8,128], index: 4, kind: output, shape index: {}]  }
   0x1   :  { %182 = vmatprep.subr.bf16.mxu0 %v216_v0  ;;  %v204_v1 = vld [vmem:[%s279_s1] sm:$0xff]   ;;  %198 = vmatprep.mubr.msk.bf16.mxu0 %vm217_vm0, %v216_v0  ;;  %v205_v2 = vld [vmem:[%s279_s1 + $0x8] sm:$0xff]   ;;  %v206_v3 = vld [vmem:[%s279_s1 + $0x10] sm:$0xff]  }
   0x2   :  { %183 = vmatpush3.bf16.msra.mxu0 %v204_v1  ;;  %v207_v4 = vld [vmem:[%s279_s1 + $0x18] sm:$0xff]   ;;  %v208_v5 = vld [vmem:[%s279_s1 + $0x20] sm:$0xff]   ;;  %v209_v6 = vld [vmem:[%s279_s1 + $0x28] sm:$0xff]  }
   0x3   :  { %184 = vmatprep.subr.bf16.mxu0 %v216_v0  ;;  %v210_v7 = vld [vmem:[%s279_s1 + $0x30] sm:$0xff]   ;;  %v211_v8 = vld [vmem:[%s279_s1 + $0x38] sm:$0xff]   ;;  %v24_v9 = vld [vmem:[%s280_s0] sm:$0xf] }
   0x4   :  { %v171_v10 = vld [vmem:[%s281_s2] ss:$0 sm:$0xff] }
   0x5   :  { %v172_v12 = vld [vmem:[%s282_s3] ss:$0 sm:$0xff] }
   0x6   :  { %185 = vmatpush3.bf16.msra.mxu0 %v205_v2 }
   0x7   :  { %186 = vmatprep.subr.bf16.mxu0 %v216_v0 }
   0xa   :  { %187 = vmatpush3.bf16.msra.mxu0 %v206_v3 }
   0xb   :  { %188 = vmatprep.subr.bf16.mxu0 %v216_v0 }
   0xe   :  { %189 = vmatpush3.bf16.msra.mxu0 %v207_v4 }
   0xf   :  { %190 = vmatprep.subr.bf16.mxu0 %v216_v0 }
  0x12   :  { %191 = vmatpush3.bf16.msra.mxu0 %v208_v5 }
  0x13   :  { %192 = vmatprep.subr.bf16.mxu0 %v216_v0 }
  0x16   :  { %193 = vmatpush3.bf16.msra.mxu0 %v209_v6 }
  0x17   :  { %194 = vmatprep.subr.bf16.mxu0 %v216_v0 }
  0x1a   :  { %195 = vmatpush3.bf16.msra.mxu0 %v210_v7 }
  0x1b   :  { %196 = vmatprep.subr.bf16.mxu0 %v216_v0 }
  0x1e   :  { %197 = vmatpush3.bf16.msra.mxu0 %v211_v8 }
  0x21   :  { %199 = vmatmul.mubr.bf16.vlgmr.msra.gmra.mrb[0].mxu0 %v24_v9 }
  0xf4   :  { %v123_v11 = vpop.f32.mrb[0].mxu0 }
  0xf5   :  { %v142_v13 = vmul.f32 %v171_v10, %v123_v11  ;;  %v200_v14 = vpop.f32.mrb[1].mxu0 }
  0xf6   :  { %v126_v15 = vpop.f32.mrb[2].mxu0 }
  0xf7   :  { %v150_v16 = vadd.f32 %v172_v12, %v142_v13  ;;  %v201_v17 = vpop.f32.mrb[3].mxu0 }
  0xf9   :  { %v151_v18 = vsub.f32 0.0, %v150_v16 }
  0xfb   :  { %v152_v19 = vmul.f32 1.442695, %v151_v18 }
  0xfd   :  { %212 = vpow2.f32 %v152_v19 }
 0x107   :  { %v213_v20 = vpop.eup %212 }
 0x108   :  { %v154_v21 = vadd.f32 1.0, %v213_v20 }
 0x10a   :  { %214 = vrcp.f32 %v154_v21 }
 0x114   :  { %v215_v22 = vpop.eup %214 }
 0x115   :  { %v156_v23 = vmul.f32 %v215_v22, %v150_v16 }
 0x117   :  { %v157_v24 = vpack.c.bf16 %v156_v23, %v156_v23 }
 0x119   :  { %158 = vst [vmem:[%s283_s4] sm:$0xf] %v157_v24 }

// kernel: genconvit_vae_forward.23
= control target key start
LH: loop header
LB: loop body
LE: loop exit
PB: predicated region body
PF: predicated region fallthrough
CT: control target
= control target key end

     0   :  { %s398_s1 = inlined_call_operand.vmem [shape: bf16[128,128], index: 1, kind: input, shape index: {}]   ;;  %s399_s0 = inlined_call_operand.vmem [shape: bf16[32,128], index: 0, kind: input, shape index: {}]   ;;  %s400_s2 = inlined_call_operand.vmem [shape: f32[1,128], index: 2, kind: input, shape index: {}]   ;;  %s401_s3 = inlined_call_operand.vmem [shape: f32[1,128], index: 3, kind: input, shape index: {}]   ;;  %s402_s4 = inlined_call_operand.vmem [shape: bf16[32,128], index: 4, kind: output, shape index: {}]  }
   0x1   :  { %v305_v0 = vld [vmem:[%s398_s1] sm:$0xff]   ;;  %v306_v1 = vld [vmem:[%s398_s1 + $0x8] sm:$0xff]   ;;  %v307_v2 = vld [vmem:[%s398_s1 + $0x10] sm:$0xff]  }
   0x2   :  { %285 = vmatprep.subr.bf16.mxu0 %v305_v0  ;;  %v308_v3 = vld [vmem:[%s398_s1 + $0x18] sm:$0xff]   ;;  %v313_v4 = vld [vmem:[%s399_s0] sm:$0xff]   ;;  %v310_v6 = vld [vmem:[%s398_s1 + $0x28] sm:$0xff]  }
   0x3   :  { %286 = vmatpush3.bf16.msra.mxu0 %v305_v0  ;;  %301 = vmatprep.mubr.bf16.mxu0 %v313_v4  ;;  %v309_v5 = vld [vmem:[%s398_s1 + $0x20] sm:$0xff]   ;;  %v311_v7 = vld [vmem:[%s398_s1 + $0x30] sm:$0xff]   ;;  %v312_v8 = vld [vmem:[%s398_s1 + $0x38] sm:$0xff]  }
   0x4   :  { %287 = vmatprep.subr.bf16.mxu0 %v306_v1  ;;  %v314_v9 = vld [vmem:[%s399_s0 + $0x8] sm:$0xff]   ;;  %v254_v10 = vld [vmem:[%s400_s2] ss:$0 sm:$0xff] }
   0x5   :  { %v255_v12 = vld [vmem:[%s401_s3] ss:$0 sm:$0xff] }
   0x7   :  { %288 = vmatpush3.bf16.msra.mxu0 %v306_v1 }
   0x8   :  { %289 = vmatprep.subr.bf16.mxu0 %v307_v2 }
   0xb   :  { %290 = vmatpush3.bf16.msra.mxu0 %v307_v2 }
   0xc   :  { %291 = vmatprep.subr.bf16.mxu0 %v308_v3 }
   0xf   :  { %292 = vmatpush3.bf16.msra.mxu0 %v308_v3 }
  0x10   :  { %293 = vmatprep.subr.bf16.mxu0 %v309_v5 }
  0x13   :  { %294 = vmatpush3.bf16.msra.mxu0 %v309_v5 }
  0x14   :  { %295 = vmatprep.subr.bf16.mxu0 %v310_v6 }
  0x17   :  { %296 = vmatpush3.bf16.msra.mxu0 %v310_v6 }
  0x18   :  { %297 = vmatprep.subr.bf16.mxu0 %v311_v7 }
  0x1b   :  { %298 = vmatpush3.bf16.msra.mxu0 %v311_v7 }
  0x1c   :  { %299 = vmatprep.subr.bf16.mxu0 %v312_v8 }
  0x1f   :  { %300 = vmatpush3.bf16.msra.mxu0 %v312_v8 }
  0x22   :  { %302 = vmatmul.mubr.bf16.vlgmr.msra.gmra.mrb[0].mxu0 %v314_v9 }
  0xf5   :  { %v303_v11 = vpop.f32.mrb[0].mxu0 }
  0xf6   :  { %v183_v13 = vmul.f32 %v303_v11, %v254_v10  ;;  %v144_v14 = vpop.f32.mrb[1].mxu0 }
  0xf7   :  { %v181_v15 = vmul.f32 %v254_v10, %v144_v14  ;;  %v304_v16 = vpop.f32.mrb[2].mxu0 }
  0xf8   :  { %v194_v17 = vadd.f32 %v255_v12, %v183_v13  ;;  %v184_v18 = vmul.f32 %v304_v16, %v254_v10  ;;  %v147_v19 = vpop.f32.mrb[3].mxu0 }
  0xf9   :  { %v192_v20 = vadd.f32 %v255_v12, %v181_v15  ;;  %v182_v21 = vmul.f32 %v254_v10, %v147_v19 }
  0xfa   :  { %v198_v22 = vsub.f32 0.0, %v194_v17  ;;  %v195_v23 = vadd.f32 %v255_v12, %v184_v18 }
  0xfb   :  { %v196_v24 = vsub.f32 0.0, %v192_v20  ;;  %v193_v25 = vadd.f32 %v255_v12, %v182_v21 }
  0xfc   :  { %v204_v26 = vmul.f32 1.442695, %v198_v22  ;;  %v199_v27 = vsub.f32 0.0, %v195_v23 }
  0xfd   :  { %v200_v28 = vmul.f32 1.442695, %v196_v24  ;;  %v197_v29 = vsub.f32 0.0, %v193_v25 }
  0xfe   :  { %315 = vpow2.f32 %v204_v26  ;;  %v206_v30 = vmul.f32 1.442695, %v199_v27 }
  0xff   :  { %317 = vpow2.f32 %v200_v28  ;;  %v202_v31 = vmul.f32 1.442695, %v197_v29 }
 0x100   :  { %319 = vpow2.f32 %v206_v30 }
 0x101   :  { %321 = vpow2.f32 %v202_v31 }
 0x108   :  { %v316_v32 = vpop.eup %315 }
 0x109   :  { %v318_v33 = vpop.eup %317  ;;  %v210_v34 = vadd.f32 1.0, %v316_v32 }
 0x10a   :  { %v320_v35 = vpop.eup %319  ;;  %v208_v36 = vadd.f32 1.0, %v318_v33 }
 0x10b   :  { %v322_v37 = vpop.eup %321  ;;  %323 = vrcp.f32 %v210_v34  ;;  %v211_v38 = vadd.f32 1.0, %v320_v35 }
 0x10c   :  { %325 = vrcp.f32 %v208_v36  ;;  %v209_v39 = vadd.f32 1.0, %v322_v37 }
 0x10d   :  { %327 = vrcp.f32 %v211_v38 }
 0x10e   :  { %329 = vrcp.f32 %v209_v39 }
 0x115   :  { %v324_v40 = vpop.eup %323 }
 0x116   :  { %v326_v41 = vpop.eup %325  ;;  %v218_v44 = vmul.f32 %v324_v40, %v194_v17 }
 0x117   :  { %v328_v42 = vpop.eup %327  ;;  %v216_v46 = vmul.f32 %v326_v41, %v192_v20 }
 0x118   :  { %v330_v43 = vpop.eup %329  ;;  %v219_v45 = vmul.f32 %v328_v42, %v195_v23 }
 0x119   :  { %v217_v47 = vmul.f32 %v330_v43, %v193_v25 }
 0x11a   :  { %v272_v48 = vpack.c.bf16 %v219_v45, %v218_v44 }
 0x11b   :  { %v267_v49 = vpack.c.bf16 %v217_v47, %v216_v46 }
 0x11c   :  { %274 = vst [vmem:[%s402_s4 + $0x8] sm:$0xff] %v272_v48  }
 0x11d   :  { %268 = vst [vmem:[%s402_s4] sm:$0xff] %v267_v49  }

// kernel: genconvit_vae_forward.30
= control target key start
LH: loop header
LB: loop body
LE: loop exit
PB: predicated region body
PF: predicated region fallthrough
CT: control target
= control target key end

     0   :  { %s943_s1 = inlined_call_operand.vmem [shape: bf16[768,128], index: 1, kind: input, shape index: {}]   ;;  %s944_s0 = inlined_call_operand.vmem [shape: bf16[8,768], index: 0, kind: input, shape index: {}]   ;;  %s945_s2 = inlined_call_operand.vmem [shape: f32[1,128], index: 2, kind: input, shape index: {}]   ;;  %s946_s3 = inlined_call_operand.vmem [shape: f32[1,128], index: 3, kind: input, shape index: {}]   ;;  %s947_s4 = inlined_call_operand.vmem [shape: bf16[8,128], index: 4, kind: output, shape index: {}]  }
   0x1   :  { %v702_v0 = vld [vmem:[%s943_s1 + $0x40] sm:$0xff]   ;;  %v706_v4 = vld [vmem:[%s943_s1 + $0x48] sm:$0xff]   ;;  %v710_v8 = vld [vmem:[%s943_s1 + $0x50] sm:$0xff]  }
   0x2   :  { %v703_v1 = vld [vmem:[%s943_s1 + $0xc0] sm:$0xff]   ;;  %636 = vmatprep.subr.bf16.mxu0 %v702_v0  ;;  %v707_v5 = vld [vmem:[%s943_s1 + $0xc8] sm:$0xff]   ;;  %v711_v9 = vld [vmem:[%s943_s1 + $0xd0] sm:$0xff]  }
   0x3   :  { %v704_v2 = vld [vmem:[%s943_s1] sm:$0xff]   ;;  %658 = vmatprep.subr.bf16.mxu1 %v703_v1  ;;  %v708_v6 = vld [vmem:[%s943_s1 + $0x8] sm:$0xff]   ;;  %v712_v10 = vld [vmem:[%s943_s1 + $0x10] sm:$0xff]  }
   0x4   :  { %v705_v3 = vld [vmem:[%s943_s1 + $0x80] sm:$0xff]   ;;  %637 = vmatpush3.bf16.msra.mxu0 %v704_v2  ;;  %v709_v7 = vld [vmem:[%s943_s1 + $0x88] sm:$0xff]   ;;  %v713_v11 = vld [vmem:[%s943_s1 + $0x90] sm:$0xff]  }
   0x5   :  { %659 = vmatpush3.bf16.msra.mxu1 %v705_v3  ;;  %638 = vmatprep.subr.bf16.mxu0 %v706_v4  ;;  %v714_v12 = vld [vmem:[%s943_s1 + $0x58] sm:$0xff]   ;;  %v718_v16 = vld [vmem:[%s943_s1 + $0x60] sm:$0xff]   ;;  %v722_v20 = vld [vmem:[%s943_s1 + $0x68] sm:$0xff]  }
   0x6   :  { %660 = vmatprep.subr.bf16.mxu1 %v707_v5  ;;  %v715_v13 = vld [vmem:[%s943_s1 + $0xd8] sm:$0xff]   ;;  %v719_v17 = vld [vmem:[%s943_s1 + $0xe0] sm:$0xff]   ;;  %v723_v21 = vld [vmem:[%s943_s1 + $0xe8] sm:$0xff]  }
   0x7   :  { %v716_v14 = vld [vmem:[%s943_s1 + $0x18] sm:$0xff]   ;;  %v720_v18 = vld [vmem:[%s943_s1 + $0x20] sm:$0xff]   ;;  %v724_v22 = vld [vmem:[%s943_s1 + $0x28] sm:$0xff]  }
   0x8   :  { %639 = vmatpush3.bf16.msra.mxu0 %v708_v6  ;;  %v717_v15 = vld [vmem:[%s943_s1 + $0x98] sm:$0xff]   ;;  %v721_v19 = vld [vmem:[%s943_s1 + $0xa0] sm:$0xff]   ;;  %v725_v23 = vld [vmem:[%s943_s1 + $0xa8] sm:$0xff]  }
   0x9   :  { %661 = vmatpush3.bf16.msra.mxu1 %v709_v7  ;;  %640 = vmatprep.subr.bf16.mxu0 %v710_v8  ;;  %v726_v24 = vld [vmem:[%s943_s1 + $0x70] sm:$0xff]   ;;  %v730_v28 = vld [vmem:[%s943_s1 + $0x78] sm:$0xff]   ;;  %v24_v32 = vld [vmem:[%s944_s0] sm:$0xff] }
   0xa   :  { %662 = vmatprep.subr.bf16.mxu1 %v711_v9  ;;  %v727_v25 = vld [vmem:[%s943_s1 + $0xf0] sm:$0xff]   ;;  %v731_v29 = vld [vmem:[%s943_s1 + $0xf8] sm:$0xff]   ;;  %v25_v33 = vld [vmem:[%s944_s0 + $0x8] sm:$0xff]  ;;  %v580_v34 = vcombine.low %v24_v32, %v24_v32  ;;  %v581_v35 = vcombine.high %v24_v32, %v24_v32 }
   0xb   :  { %v728_v26 = vld [vmem:[%s943_s1 + $0x30] sm:$0xff]   ;;  %v732_v30 = vld [vmem:[%s943_s1 + $0x38] sm:$0xff]   ;;  %v582_v36 = vcombine.low %v25_v33, %v25_v33  ;;  %v583_v37 = vcombine.high %v25_v33, %v25_v33  ;;  %v738_v38 = vld [vmem:[%s943_s1 + $0x140] sm:$0xff]  }
   0xc   :  { %641 = vmatpush3.bf16.msra.mxu0 %v712_v10  ;;  %v729_v27 = vld [vmem:[%s943_s1 + $0xb0] sm:$0xff]   ;;  %v733_v31 = vld [vmem:[%s943_s1 + $0xb8] sm:$0xff]   ;;  %v739_v39 = vld [vmem:[%s943_s1 + $0x100] sm:$0xff]   ;;  %464 = vmatprep.mubr.bf16.mxu0 %v581_v35 }
   0xd   :  { %663 = vmatpush3.bf16.msra.mxu1 %v713_v11  ;;  %642 = vmatprep.subr.bf16.mxu0 %v714_v12  ;;  %v740_v40 = vld [vmem:[%s943_s1 + $0x148] sm:$0xff]   ;;  %v742_v42 = vld [vmem:[%s943_s1 + $0x150] sm:$0xff]   ;;  %v744_v44 = vld [vmem:[%s943_s1 + $0x158] sm:$0xff]  }
   0xe   :  { %664 = vmatprep.subr.bf16.mxu1 %v715_v13  ;;  %504 = vmatprep.mubr.bf16.mxu1 %v583_v37  ;;  %v741_v41 = vld [vmem:[%s943_s1 + $0x108] sm:$0xff]   ;;  %v743_v43 = vld [vmem:[%s943_s1 + $0x110] sm:$0xff]   ;;  %v745_v45 = vld [vmem:[%s943_s1 + $0x118] sm:$0xff]  }
   0xf   :  { %v746_v46 = vld [vmem:[%s943_s1 + $0x160] sm:$0xff]   ;;  %v26_v47 = vld [vmem:[%s944_s0 + $0x10] sm:$0xff]  ;;  %v748_v50 = vld [vmem:[%s943_s1 + $0x168] sm:$0xff]  }
  0x10   :  { %643 = vmatpush3.bf16.msra.mxu0 %v716_v14  ;;  %v585_v48 = vcombine.high %v26_v47, %v26_v47  ;;  %v747_v49 = vld [vmem:[%s943_s1 + $0x120] sm:$0xff]   ;;  %v749_v51 = vld [vmem:[%s943_s1 + $0x128] sm:$0xff]   ;;  %v750_v52 = vld [vmem:[%s943_s1 + $0x170] sm:$0xff]   ;;  %v584_v56 = vcombine.low %v26_v47, %v26_v47 }
  0x11   :  { %665 = vmatpush3.bf16.msra.mxu1 %v717_v15  ;;  %644 = vmatprep.subr.bf16.mxu0 %v718_v16  ;;  %v751_v53 = vld [vmem:[%s943_s1 + $0x130] sm:$0xff]   ;;  %v752_v54 = vld [vmem:[%s943_s1 + $0x178] sm:$0xff]   ;;  %v634_v8 = vld [vmem:[%s945_s2] ss:$0 sm:$0xff] }
  0x12   :  { %666 = vmatprep.subr.bf16.mxu1 %v719_v17  ;;  %v753_v55 = vld [vmem:[%s943_s1 + $0x138] sm:$0xff]   ;;  %v635_v11 = vld [vmem:[%s946_s3] ss:$0 sm:$0xff] }
  0x14   :  { %645 = vmatpush3.bf16.msra.mxu0 %v720_v18 }
  0x15   :  { %667 = vmatpush3.bf16.msra.mxu1 %v721_v19  ;;  %646 = vmatprep.subr.bf16.mxu0 %v722_v20 }
  0x16   :  { %668 = vmatprep.subr.bf16.mxu1 %v723_v21 }
  0x18   :  { %647 = vmatpush3.bf16.msra.mxu0 %v724_v22 }
  0x19   :  { %669 = vmatpush3.bf16.msra.mxu1 %v725_v23  ;;  %648 = vmatprep.subr.bf16.mxu0 %v726_v24 }
  0x1a   :  { %670 = vmatprep.subr.bf16.mxu1 %v727_v25 }
  0x1c   :  { %649 = vmatpush3.bf16.msra.mxu0 %v728_v26 }
  0x1d   :  { %671 = vmatpush3.bf16.msra.mxu1 %v729_v27  ;;  %650 = vmatprep.subr.bf16.mxu0 %v730_v28 }
  0x1e   :  { %672 = vmatprep.subr.bf16.mxu1 %v731_v29 }
  0x20   :  { %651 = vmatpush3.bf16.msra.mxu0 %v732_v30 }
  0x21   :  { %673 = vmatpush3.bf16.msra.mxu1 %v733_v31  ;;  %680 = vmatprep.subr.bf16.mxu0 %v738_v38 }
  0x23   :  { %465 = vmatmul.mubr.bf16.vlgmr.msra.gmra.mrb[0].mxu0 %v580_v34 }
  0x24   :  { %505 = vmatmul.mubr.bf16.vlgmr.msra.gmra.mrb[0].mxu1 %v582_v36  ;;  %681 = vmatpush3.bf16.msra.mxu0 %v739_v39 }
  0x25   :  { %682 = vmatprep.subr.bf16.mxu0 %v740_v40  ;;  %544 = vmatprep.mubr.bf16.mxu0 %v585_v48 }
  0x28   :  { %683 = vmatpush3.bf16.msra.mxu0 %v741_v41 }
  0x29   :  { %684 = vmatprep.subr.bf16.mxu0 %v742_v42 }
  0x2c   :  { %685 = vmatpush3.bf16.msra.mxu0 %v743_v43 }
  0x2d   :  { %686 = vmatprep.subr.bf16.mxu0 %v744_v44 }
  0x30   :  { %687 = vmatpush3.bf16.msra.mxu0 %v745_v45 }
  0x31   :  { %688 = vmatprep.subr.bf16.mxu0 %v746_v46 }
  0x34   :  { %689 = vmatpush3.bf16.msra.mxu0 %v747_v49 }
  0x35   :  { %690 = vmatprep.subr.bf16.mxu0 %v748_v50 }
  0x38   :  { %691 = vmatpush3.bf16.msra.mxu0 %v749_v51 }
  0x39   :  { %692 = vmatprep.subr.bf16.mxu0 %v750_v52 }
  0x3c   :  { %693 = vmatpush3.bf16.msra.mxu0 %v751_v53 }
  0x3d   :  { %694 = vmatprep.subr.bf16.mxu0 %v752_v54 }
  0x40   :  { %695 = vmatpush3.bf16.msra.mxu0 %v753_v55 }
  0x43   :  { %545 = vmatmul.mubr.bf16.vlgmr.msra.gmra.mrb[4].mxu0 %v584_v56 }
  0xf6   :  { %v652_v57 = vpop.f32.mrb[0].mxu0 }
  0xf7   :  { %v674_v58 = vpop.f32.mrb[0].mxu1  ;;  %v653_v59 = vpop.f32.mrb[1].mxu0 }
  0xf8   :  { %v675_v60 = vpop.f32.mrb[1].mxu1  ;;  %v654_v61 = vadd.f32 %v653_v59, %v652_v57  ;;  %v655_v63 = vpop.f32.mrb[2].mxu0 }
  0xf9   :  { %v676_v62 = vadd.f32 %v675_v60, %v674_v58  ;;  %v677_v0 = vpop.f32.mrb[2].mxu1  ;;  %v656_v1 = vpop.f32.mrb[3].mxu0 }
  0xfa   :  { %v678_v2 = vpop.f32.mrb[3].mxu1 }
  0xfb   :  { %v507_v3 = vadd.f32 %v676_v62, %v654_v61 }
 0x116   :  { %v696_v4 = vpop.f32.mrb[4].mxu0 }
 0x117   :  { %v697_v5 = vpop.f32.mrb[5].mxu0 }
 0x118   :  { %v698_v6 = vadd.f32 %v697_v5, %v696_v4  ;;  %v699_v7 = vpop.f32.mrb[6].mxu0 }
 0x119   :  { %v700_v9 = vpop.f32.mrb[7].mxu0 }
 0x11a   :  { %v547_v10 = vadd.f32 %v698_v6, %v507_v3 }
 0x11c   :  { %v565_v12 = vmul.f32 %v634_v8, %v547_v10 }
 0x11e   :  { %v573_v13 = vadd.f32 %v635_v11, %v565_v12 }
 0x120   :  { %v574_v14 = vpack.c.bf16 %v573_v13, %v573_v13 }
 0x122   :  { %575 = vst [vmem:[%s947_s4] sm:$0xf] %v574_v14 }

// kernel: genconvit_vae_forward.31
= control target key start
LH: loop header
LB: loop body
LE: loop exit
PB: predicated region body
PF: predicated region fallthrough
CT: control target
= control target key end

     0   :  { %v528_v0 = vmov 0.0   ;;  %vm529_vm0 = vmmov 0   ;;  %s687_s1 = inlined_call_operand.vmem [shape: bf16[128,128], index: 1, kind: input, shape index: {}]   ;;  %s688_s0 = inlined_call_operand.vmem [shape: bf16[8,128], index: 0, kind: input, shape index: {}]   ;;  %s689_s3 = inlined_call_operand.vmem [shape: bf16[128,128], index: 3, kind: input, shape index: {}]   ;;  %s690_s2 = inlined_call_operand.vmem [shape: f32[1,128], index: 2, kind: input, shape index: {}]   ;;  %s691_s5 = inlined_call_operand.vmem [shape: bf16[128,128], index: 5, kind: input, shape index: {}]   ;;  %s692_s4 = inlined_call_operand.vmem [shape: f32[1,128], index: 4, kind: input, shape index: {}]   ;;  %s693_s6 = inlined_call_operand.vmem [shape: f32[1,128], index: 6, kind: input, shape index: {}]   ;;  %s694_s7 = inlined_call_operand.vmem [shape: f32[8,128], index: 7, kind: output, shape index: {}]  }
   0x1   :  { %434 = vmatprep.subr.bf16.mxu0 %v528_v0  ;;  %v496_v1 = vld [vmem:[%s687_s1] sm:$0xff]   ;;  %450 = vmatprep.mubr.msk.bf16.mxu0 %vm529_vm0, %v528_v0  ;;  %v497_v2 = vld [vmem:[%s687_s1 + $0x8] sm:$0xff]   ;;  %v498_v3 = vld [vmem:[%s687_s1 + $0x10] sm:$0xff]  }
   0x2   :  { %454 = vmatprep.subr.bf16.mxu1 %v528_v0  ;;  %470 = vmatprep.mubr.msk.bf16.mxu1 %vm529_vm0, %v528_v0  ;;  %v499_v4 = vld [vmem:[%s687_s1 + $0x18] sm:$0xff]   ;;  %v500_v5 = vld [vmem:[%s687_s1 + $0x20] sm:$0xff]   ;;  %v501_v6 = vld [vmem:[%s687_s1 + $0x28] sm:$0xff]  }
   0x3   :  { %435 = vmatpush3.bf16.msra.mxu0 %v496_v1  ;;  %v502_v7 = vld [vmem:[%s687_s1 + $0x30] sm:$0xff]   ;;  %v503_v8 = vld [vmem:[%s687_s1 + $0x38] sm:$0xff]   ;;  %v27_v9 = vld [vmem:[%s688_s0] sm:$0xf] }
   0x4   :  { %436 = vmatprep.subr.bf16.mxu0 %v528_v0  ;;  %v504_v10 = vld [vmem:[%s689_s3] sm:$0xff]   ;;  %v505_v11 = vld [vmem:[%s689_s3 + $0x8] sm:$0xff]   ;;  %v506_v12 = vld [vmem:[%s689_s3 + $0x10] sm:$0xff]  }
   0x5   :  { %455 = vmatpush3.bf16.msra.mxu1 %v504_v10  ;;  %v507_v13 = vld [vmem:[%s689_s3 + $0x18] sm:$0xff]   ;;  %v508_v14 = vld [vmem:[%s689_s3 + $0x20] sm:$0xff]   ;;  %v509_v15 = vld [vmem:[%s689_s3 + $0x28] sm:$0xff]  }
   0x6   :  { %456 = vmatprep.subr.bf16.mxu1 %v528_v0  ;;  %v510_v16 = vld [vmem:[%s689_s3 + $0x30] sm:$0xff]   ;;  %v511_v17 = vld [vmem:[%s689_s3 + $0x38] sm:$0xff]   ;;  %v380_v18 = vld [vmem:[%s690_s2] ss:$0 sm:$0xff] }
   0x7   :  { %437 = vmatpush3.bf16.msra.mxu0 %v497_v2  ;;  %v512_v31 = vld [vmem:[%s691_s5] sm:$0xff]   ;;  %v513_v32 = vld [vmem:[%s691_s5 + $0x8] sm:$0xff]   ;;  %v514_v33 = vld [vmem:[%s691_s5 + $0x10] sm:$0xff]  }
   0x8   :  { %438 = vmatprep.subr.bf16.mxu0 %v528_v0  ;;  %v515_v34 = vld [vmem:[%s691_s5 + $0x18] sm:$0xff]   ;;  %v516_v35 = vld [vmem:[%s691_s5 + $0x20] sm:$0xff]   ;;  %v517_v36 = vld [vmem:[%s691_s5 + $0x28] sm:$0xff]  }
   0x9   :  { %457 = vmatpush3.bf16.msra.mxu1 %v505_v11  ;;  %v518_v37 = vld [vmem:[%s691_s5 + $0x30] sm:$0xff]   ;;  %v519_v38 = vld [vmem:[%s691_s5 + $0x38] sm:$0xff]   ;;  %v389_v39 = vld [vmem:[%s692_s4] ss:$0 sm:$0xff] }
   0xa   :  { %458 = vmatprep.subr.bf16.mxu1 %v528_v0  ;;  %v398_v52 = vld [vmem:[%s693_s6] ss:$0 sm:$0xff] }
   0xb   :  { %439 = vmatpush3.bf16.msra.mxu0 %v498_v3 }
   0xc   :  { %440 = vmatprep.subr.bf16.mxu0 %v528_v0 }
   0xd   :  { %459 = vmatpush3.bf16.msra.mxu1 %v506_v12 }
   0xe   :  { %460 = vmatprep.subr.bf16.mxu1 %v528_v0 }
   0xf   :  { %441 = vmatpush3.bf16.msra.mxu0 %v499_v4 }
  0x10   :  { %442 = vmatprep.subr.bf16.mxu0 %v528_v0 }
  0x11   :  { %461 = vmatpush3.bf16.msra.mxu1 %v507_v13 }
  0x12   :  { %462 = vmatprep.subr.bf16.mxu1 %v528_v0 }
  0x13   :  { %443 = vmatpush3.bf16.msra.mxu0 %v500_v5 }
  0x14   :  { %444 = vmatprep.subr.bf16.mxu0 %v528_v0 }
  0x15   :  { %463 = vmatpush3.bf16.msra.mxu1 %v508_v14 }
  0x16   :  { %464 = vmatprep.subr.bf16.mxu1 %v528_v0 }
  0x17   :  { %445 = vmatpush3.bf16.msra.mxu0 %v501_v6 }
  0x18   :  { %446 = vmatprep.subr.bf16.mxu0 %v528_v0 }
  0x19   :  { %465 = vmatpush3.bf16.msra.mxu1 %v509_v15 }
  0x1a   :  { %466 = vmatprep.subr.bf16.mxu1 %v528_v0 }
  0x1b   :  { %447 = vmatpush3.bf16.msra.mxu0 %v502_v7 }
  0x1c   :  { %448 = vmatprep.subr.bf16.mxu0 %v528_v0 }
  0x1d   :  { %467 = vmatpush3.bf16.msra.mxu1 %v510_v16 }
  0x1e   :  { %468 = vmatprep.subr.bf16.mxu1 %v528_v0 }
  0x1f   :  { %449 = vmatpush3.bf16.msra.mxu0 %v503_v8 }
  0x20   :  { %474 = vmatprep.subr.bf16.mxu0 %v528_v0 }
  0x21   :  { %469 = vmatpush3.bf16.msra.mxu1 %v511_v17 }
  0x22   :  { %451 = vmatmul.mubr.bf16.vlgmr.msra.gmra.mrb[0].mxu0 %v27_v9 }
  0x23   :  { %490 = vmatprep.mubr.msk.bf16.mxu0 %vm529_vm0, %v528_v0  ;;  %475 = vmatpush3.bf16.msra.mxu0 %v512_v31 }
  0x24   :  { %476 = vmatprep.subr.bf16.mxu0 %v528_v0 }
  0x27   :  { %477 = vmatpush3.bf16.msra.mxu0 %v513_v32 }
  0x28   :  { %478 = vmatprep.subr.bf16.mxu0 %v528_v0 }
  0x2b   :  { %479 = vmatpush3.bf16.msra.mxu0 %v514_v33 }
  0x2c   :  { %480 = vmatprep.subr.bf16.mxu0 %v528_v0 }
  0x2f   :  { %481 = vmatpush3.bf16.msra.mxu0 %v515_v34 }
  0x30   :  { %482 = vmatprep.subr.bf16.mxu0 %v528_v0 }
  0x33   :  { %483 = vmatpush3.bf16.msra.mxu0 %v516_v35 }
  0x34   :  { %484 = vmatprep.subr.bf16.mxu0 %v528_v0 }
  0x37   :  { %485 = vmatpush3.bf16.msra.mxu0 %v517_v36 }
  0x38   :  { %486 = vmatprep.subr.bf16.mxu0 %v528_v0 }
  0x3b   :  { %487 = vmatpush3.bf16.msra.mxu0 %v518_v37 }
  0x3c   :  { %488 = vmatprep.subr.bf16.mxu0 %v528_v0 }
  0x3f   :  { %489 = vmatpush3.bf16.msra.mxu0 %v519_v38 }
  0xf5   :  { %v133_v19 = vpop.f32.mrb[0].mxu0 }
  0xf6   :  { %v134_v20 = vadd.f32 %v380_v18, %v133_v19  ;;  %v452_v21 = vpop.f32.mrb[1].mxu0 }
  0xf7   :  { %v136_v22 = vpop.f32.mrb[2].mxu0 }
  0xf8   :  { %v139_v23 = vsub.f32 0.0, %v134_v20  ;;  %v453_v24 = vpop.f32.mrb[3].mxu0 }
  0xfa   :  { %v140_v25 = vmul.f32 1.442695, %v139_v23 }
  0xfc   :  { %520 = vpow2.f32 %v140_v25 }
 0x106   :  { %v521_v26 = vpop.eup %520 }
 0x107   :  { %v142_v27 = vadd.f32 1.0, %v521_v26 }
 0x109   :  { %522 = vrcp.f32 %v142_v27 }
 0x113   :  { %v523_v28 = vpop.eup %522 }
 0x114   :  { %v144_v29 = vmul.f32 %v523_v28, %v134_v20 }
 0x116   :  { %v145_v30 = vpack.c.bf16 %v144_v29, %v144_v29 }
 0x118   :  { %471 = vmatmul.mubr.bf16.vlgmr.msra.gmra.mrb[0].mxu1 %v145_v30 }
 0x1eb   :  { %v251_v40 = vpop.f32.mrb[0].mxu1 }
 0x1ec   :  { %v252_v41 = vadd.f32 %v389_v39, %v251_v40  ;;  %v472_v42 = vpop.f32.mrb[1].mxu1 }
 0x1ed   :  { %v254_v43 = vpop.f32.mrb[2].mxu1 }
 0x1ee   :  { %v257_v44 = vsub.f32 0.0, %v252_v41  ;;  %v473_v45 = vpop.f32.mrb[3].mxu1 }
 0x1f0   :  { %v258_v46 = vmul.f32 1.442695, %v257_v44 }
 0x1f2   :  { %524 = vpow2.f32 %v258_v46 }
 0x1fc   :  { %v525_v47 = vpop.eup %524 }
 0x1fd   :  { %v260_v48 = vadd.f32 1.0, %v525_v47 }
 0x1ff   :  { %526 = vrcp.f32 %v260_v48 }
 0x209   :  { %v527_v49 = vpop.eup %526 }
 0x20a   :  { %v262_v50 = vmul.f32 %v527_v49, %v252_v41 }
 0x20c   :  { %v263_v51 = vpack.c.bf16 %v262_v50, %v262_v50 }
 0x20e   :  { %491 = vmatmul.mubr.bf16.vlgmr.msra.gmra.mrb[4].mxu0 %v263_v51 }
 0x2e1   :  { %v369_v53 = vpop.f32.mrb[4].mxu0 }
 0x2e2   :  { %v370_v54 = vadd.f32 %v398_v52, %v369_v53  ;;  %v492_v55 = vpop.f32.mrb[5].mxu0 }
 0x2e3   :  { %v372_v56 = vpop.f32.mrb[6].mxu0 }
 0x2e4   :  { %375 = vst [vmem:[%s694_s7] sm:$0xff] %v370_v54  ;;  %v493_v57 = vpop.f32.mrb[7].mxu0 }

// kernel: genconvit_vae_forward.29
= control target key start
LH: loop header
LB: loop body
LE: loop exit
PB: predicated region body
PF: predicated region fallthrough
CT: control target
= control target key end

     0   :  { %v214_v0 = vmov 0.0   ;;  %vm215_vm0 = vmmov 0   ;;  %s277_s1 = inlined_call_operand.vmem [shape: bf16[128,128], index: 1, kind: input, shape index: {}]   ;;  %s278_s0 = inlined_call_operand.vmem [shape: bf16[8,128], index: 0, kind: input, shape index: {}]   ;;  %s279_s2 = inlined_call_operand.vmem [shape: f32[1,128], index: 2, kind: input, shape index: {}]   ;;  %s280_s3 = inlined_call_operand.vmem [shape: f32[1,128], index: 3, kind: input, shape index: {}]   ;;  %s281_s4 = inlined_call_operand.vmem [shape: f32[8,128], index: 4, kind: output, shape index: {}]  }
   0x1   :  { %180 = vmatprep.subr.bf16.mxu0 %v214_v0  ;;  %v202_v1 = vld [vmem:[%s277_s1] sm:$0xff]   ;;  %196 = vmatprep.mubr.msk.bf16.mxu0 %vm215_vm0, %v214_v0  ;;  %v203_v2 = vld [vmem:[%s277_s1 + $0x8] sm:$0xff]   ;;  %v204_v3 = vld [vmem:[%s277_s1 + $0x10] sm:$0xff]  }
   0x2   :  { %181 = vmatpush3.bf16.msra.mxu0 %v202_v1  ;;  %v205_v4 = vld [vmem:[%s277_s1 + $0x18] sm:$0xff]   ;;  %v206_v5 = vld [vmem:[%s277_s1 + $0x20] sm:$0xff]   ;;  %v207_v6 = vld [vmem:[%s277_s1 + $0x28] sm:$0xff]  }
   0x3   :  { %182 = vmatprep.subr.bf16.mxu0 %v214_v0  ;;  %v208_v7 = vld [vmem:[%s277_s1 + $0x30] sm:$0xff]   ;;  %v209_v8 = vld [vmem:[%s277_s1 + $0x38] sm:$0xff]   ;;  %v24_v9 = vld [vmem:[%s278_s0] sm:$0xf] }
   0x4   :  { %v169_v10 = vld [vmem:[%s279_s2] ss:$0 sm:$0xff] }
   0x5   :  { %v170_v12 = vld [vmem:[%s280_s3] ss:$0 sm:$0xff] }
   0x6   :  { %183 = vmatpush3.bf16.msra.mxu0 %v203_v2 }
   0x7   :  { %184 = vmatprep.subr.bf16.mxu0 %v214_v0 }
   0xa   :  { %185 = vmatpush3.bf16.msra.mxu0 %v204_v3 }
   0xb   :  { %186 = vmatprep.subr.bf16.mxu0 %v214_v0 }
   0xe   :  { %187 = vmatpush3.bf16.msra.mxu0 %v205_v4 }
   0xf   :  { %188 = vmatprep.subr.bf16.mxu0 %v214_v0 }
  0x12   :  { %189 = vmatpush3.bf16.msra.mxu0 %v206_v5 }
  0x13   :  { %190 = vmatprep.subr.bf16.mxu0 %v214_v0 }
  0x16   :  { %191 = vmatpush3.bf16.msra.mxu0 %v207_v6 }
  0x17   :  { %192 = vmatprep.subr.bf16.mxu0 %v214_v0 }
  0x1a   :  { %193 = vmatpush3.bf16.msra.mxu0 %v208_v7 }
  0x1b   :  { %194 = vmatprep.subr.bf16.mxu0 %v214_v0 }
  0x1e   :  { %195 = vmatpush3.bf16.msra.mxu0 %v209_v8 }
  0x21   :  { %197 = vmatmul.mubr.bf16.vlgmr.msra.gmra.mrb[0].mxu0 %v24_v9 }
  0xf4   :  { %v123_v11 = vpop.f32.mrb[0].mxu0 }
  0xf5   :  { %v142_v13 = vmul.f32 %v169_v10, %v123_v11  ;;  %v198_v14 = vpop.f32.mrb[1].mxu0 }
  0xf6   :  { %v126_v15 = vpop.f32.mrb[2].mxu0 }
  0xf7   :  { %v150_v16 = vadd.f32 %v170_v12, %v142_v13  ;;  %v199_v17 = vpop.f32.mrb[3].mxu0 }
  0xf9   :  { %v151_v18 = vsub.f32 0.0, %v150_v16 }
  0xfb   :  { %v152_v19 = vmul.f32 1.442695, %v151_v18 }
  0xfd   :  { %210 = vpow2.f32 %v152_v19 }
 0x107   :  { %v211_v20 = vpop.eup %210 }
 0x108   :  { %v154_v21 = vadd.f32 1.0, %v211_v20 }
 0x10a   :  { %212 = vrcp.f32 %v154_v21 }
 0x114   :  { %v213_v22 = vpop.eup %212 }
 0x115   :  { %156 = vst [vmem:[%s281_s4] sm:$0xff] %v213_v22 }

</bundles_post_ra>
